<compile_context>
chip_gen: v7x
topology: tpu7x:2x2x1
jax: 0.10.0
libtpu: 0.0.40
codegen_flags: <defaults>
</compile_context>

<pallas_src>
import functools

import jax
import jax.numpy as jnp
import numpy as np
from jax.experimental import pallas as pl
from jax.experimental.pallas import tpu as pltpu

HIDDEN_SIZE = 125
INPUT_SIZE = 64 * 64 * 3   # 12288
OUTPUT_SIZE = 2
_LANE = 128


def _classifier_kernel(x_ref, w1_ref, b1_ref, w2_ref, b2_ref, out_ref, acc_ref):
    k = pl.program_id(0)

    @pl.when(k == 0)
    def _():
        acc_ref[...] = jnp.zeros_like(acc_ref)
        # Output block index is constant across the K axis, so it is VMEM-resident
        # and written back once; zero-init anyway so no path can ever write back
        # uninitialized data if the grid/index_map changes.
        out_ref[...] = jnp.zeros_like(out_ref)

    # Partial fc1: accumulate x_tile @ W1_tile into the f32 accumulator (MXU).
    acc_ref[...] += jnp.dot(
        x_ref[...], w1_ref[...], preferred_element_type=jnp.float32
    )

    @pl.when(k == pl.num_programs(0) - 1)
    def _():
        # fc1 bias + relu (f32)
        h = jnp.maximum(acc_ref[...] + b1_ref[...], 0.0)
        # fc2
        logits = (
            jnp.dot(h, w2_ref[...], preferred_element_type=jnp.float32)
            + b2_ref[...]
        )
        # log_softmax over dim=1 (last axis), max-shifted for stability
        m = jnp.max(logits, axis=-1, keepdims=True)
        shifted = logits - m
        lse = jnp.log(jnp.sum(jnp.exp(shifted), axis=-1, keepdims=True))
        out_ref[...] = (shifted - lse).astype(out_ref.dtype)


def prepare_params(w1, b1, w2, b2, *, compute_dtype=jnp.bfloat16):
    """One-time, load-time weight preparation (hoisted out of the per-call path).

    Pads the hidden dim to the 128-lane width (exact: relu(x@0 + 0) = 0 and the
    zero W2 rows contribute nothing to the logits) and casts the bandwidth-
    dominant W1 stream to `compute_dtype`.  Biases / W2 stay f32.
    w1: (K, H); b1: (H,); w2: (H, O); b2: (O,)  -- (in, out) layout, i.e. the
    transpose of PyTorch's nn.Linear weight.
    """
    K, H = w1.shape
    O = w2.shape[1]
    assert b1.shape == (H,) and w2.shape[0] == H and b2.shape == (O,)

    Hp = ((H + _LANE - 1) // _LANE) * _LANE
    if Hp != H:
        w1 = jnp.pad(w1, ((0, 0), (0, Hp - H)))
        b1 = jnp.pad(b1, ((0, Hp - H),))
        w2 = jnp.pad(w2, ((0, Hp - H), (0, 0)))

    w1_p = jnp.asarray(w1, compute_dtype)
    b1_p = jnp.asarray(b1, jnp.float32).reshape(1, Hp)
    w2_p = jnp.asarray(w2, jnp.float32)
    b2_p = jnp.asarray(b2, jnp.float32).reshape(1, O)
    return jax.block_until_ready((w1_p, b1_p, w2_p, b2_p))


@functools.partial(jax.jit, static_argnames=("tk",))
def simple_classifier_prepared(x, w1_p, b1_p, w2_p, b2_p, *, tk=None):
    """x: (B, K) f32; prepared params from `prepare_params` (padded / pre-cast)."""
    B, K = x.shape
    Kw, Hp = w1_p.shape
    O = w2_p.shape[1]
    assert Kw == K and b1_p.shape == (1, Hp) and w2_p.shape == (Hp, O)
    assert b2_p.shape == (1, O)

    compute_dtype = w1_p.dtype
    if tk is None:
        # bf16 (or narrower) stream: single grid step (double-buffered W1 tile
        # ~6 MiB, fine on every generation).  f32 exact path: split K so the
        # double-buffered f32 W1 tile stays comfortable on v5e.
        tk = K if jnp.dtype(compute_dtype).itemsize <= 2 else K // 2
    assert K % tk == 0, "input_size must be divisible by the K tile"

    # Only per-call prep left: cast of the tiny activation (B x K), negligible
    # next to the W1 stream.
    x_c = x.astype(compute_dtype)

    grid = (K // tk,)
    return pl.pallas_call(
        _classifier_kernel,
        out_shape=jax.ShapeDtypeStruct((B, O), jnp.float32),
        grid_spec=pltpu.PrefetchScalarGridSpec(
            num_scalar_prefetch=0,
            grid=grid,
            in_specs=[
                pl.BlockSpec((B, tk), lambda k: (0, k)),    # x tile
                pl.BlockSpec((tk, Hp), lambda k: (k, 0)),   # W1 tile (dominant stream)
                pl.BlockSpec((1, Hp), lambda k: (0, 0)),    # b1
                pl.BlockSpec((Hp, O), lambda k: (0, 0)),    # W2
                pl.BlockSpec((1, O), lambda k: (0, 0)),     # b2
            ],
            out_specs=pl.BlockSpec((B, O), lambda k: (0, 0)),
            scratch_shapes=[pltpu.VMEM((B, Hp), jnp.float32)],
        ),
        compiler_params=pltpu.CompilerParams(
            dimension_semantics=("arbitrary",),      # reduction over K
            vmem_limit_bytes=32 * 1024 * 1024,       # headroom for the big K tile
        ),
    )(x_c, w1_p, b1_p, w2_p, b2_p)


def simple_classifier(x, w1, b1, w2, b2, *, compute_dtype=jnp.bfloat16, tk=None):
    """Convenience one-shot path.  In real use, call `prepare_params` once at
    parameter-load time and reuse the prepared params across calls."""
    params = prepare_params(w1, b1, w2, b2, compute_dtype=compute_dtype)
    return simple_classifier_prepared(x, *params, tk=tk)


def _init_linear(key, fan_in, fan_out):
    # Mirrors nn.Linear default init: U(-1/sqrt(fan_in), 1/sqrt(fan_in)),
    # deterministic via jax.random.  Weight stored as (in, out).
    kw, kb = jax.random.split(key)
    bound = 1.0 / np.sqrt(fan_in)
    w = jax.random.uniform(kw, (fan_in, fan_out), jnp.float32, -bound, bound)
    b = jax.random.uniform(kb, (fan_out,), jnp.float32, -bound, bound)
    return w, b


def _reference(x, w1, b1, w2, b2):
    h = jnp.maximum(x @ w1 + b1, 0.0)
    logits = h @ w2 + b2
    return jax.nn.log_softmax(logits, axis=1)


if __name__ == "__main__":
    key = jax.random.PRNGKey(0)
    kx, k1, k2 = jax.random.split(key, 3)

    B = 2
    x = jax.random.normal(kx, (B, INPUT_SIZE), jnp.float32)
    w1, b1 = _init_linear(k1, INPUT_SIZE, HIDDEN_SIZE)
    w2, b2 = _init_linear(k2, HIDDEN_SIZE, OUTPUT_SIZE)

    ref = _reference(x, w1, b1, w2, b2)

    # Exact-semantics path (f32 streaming): matches the PyTorch f32 module.
    params_f32 = prepare_params(w1, b1, w2, b2, compute_dtype=jnp.float32)
    out_f32 = jax.block_until_ready(simple_classifier_prepared(x, *params_f32))
    np.testing.assert_allclose(
        np.asarray(out_f32), np.asarray(ref), rtol=1e-5, atol=1e-5
    )

    # Default fast path: weights pre-padded / pre-cast ONCE (bf16 W1 stream,
    # f32 MXU accumulation), single-step grid.
    params_bf16 = prepare_params(w1, b1, w2, b2, compute_dtype=jnp.bfloat16)
    out_bf16 = jax.block_until_ready(simple_classifier_prepared(x, *params_bf16))
    np.testing.assert_allclose(
        np.asarray(out_bf16), np.asarray(ref), rtol=3e-2, atol=3e-2
    )

    print("KERNEL_OK")
</pallas_src>

<mosaic_0001>
module attributes {stable_mosaic.version = 11 : i64} {
  func.func @_classifier_kernel(%arg0: i32, %arg1: memref<2x6144xf32, #tpu.memory_space<vmem>>, %arg2: memref<6144x128xf32, #tpu.memory_space<vmem>>, %arg3: memref<1x128xf32, #tpu.memory_space<vmem>>, %arg4: memref<128x2xf32, #tpu.memory_space<vmem>>, %arg5: memref<1x2xf32, #tpu.memory_space<vmem>>, %arg6: memref<2x2xf32, #tpu.memory_space<vmem>>, %arg7: memref<2x128xf32, #tpu.memory_space<vmem>>) attributes {dimension_semantics = [#tpu.dimension_semantics<arbitrary>], iteration_bounds = array<i64: 2>, scalar_prefetch = 0 : i64, scratch_operands = 1 : i64, tpu.core_type = #tpu.core_type<tc>, window_params = [{transform_indices = @transform_0, window_bounds = array<i64: 2, 6144>}, {transform_indices = @transform_1, window_bounds = array<i64: 6144, 128>}, {pipeline_mode = #tpu.pipeline_mode<synchronous>, transform_indices = @transform_2, window_bounds = array<i64: 1, 128>}, {pipeline_mode = #tpu.pipeline_mode<synchronous>, transform_indices = @transform_3, window_bounds = array<i64: 128, 2>}, {pipeline_mode = #tpu.pipeline_mode<synchronous>, transform_indices = @transform_4, window_bounds = array<i64: 1, 2>}, {pipeline_mode = #tpu.pipeline_mode<synchronous>, transform_indices = @transform_5, window_bounds = array<i64: 2, 2>}]} {
    %c0_i32 = arith.constant 0 : i32
    %0 = arith.cmpi eq, %arg0, %c0_i32 : i32
    %1 = arith.extui %0 : i1 to i32
    %c0_i32_0 = arith.constant 0 : i32
    %2 = arith.cmpi ne, %1, %c0_i32_0 : i32
    scf.if %2 {
      %cst_9 = arith.constant 0.000000e+00 : f32
      %12 = vector.broadcast %cst_9 : f32 to vector<2x128xf32>
      %c0_10 = arith.constant 0 : index
      %c0_11 = arith.constant 0 : index
      %13 = vector.load %arg7[%c0_10, %c0_11] : memref<2x128xf32, #tpu.memory_space<vmem>>, vector<2x128xf32>
      tpu.vector_store %arg7[%c0_10, %c0_11], %12 {strides = array<i32>} : memref<2x128xf32, #tpu.memory_space<vmem>>, vector<2x128xf32>,
      %cst_12 = arith.constant 0.000000e+00 : f32
      %14 = vector.broadcast %cst_12 : f32 to vector<2x2xf32>
      %c0_13 = arith.constant 0 : index
      %c0_14 = arith.constant 0 : index
      %15 = vector.load %arg6[%c0_13, %c0_14] : memref<2x2xf32, #tpu.memory_space<vmem>>, vector<2x2xf32>
      tpu.vector_store %arg6[%c0_13, %c0_14], %14 {strides = array<i32>} : memref<2x2xf32, #tpu.memory_space<vmem>>, vector<2x2xf32>,
    } else {
    }
    %c0 = arith.constant 0 : index
    %c0_1 = arith.constant 0 : index
    %3 = vector.load %arg7[%c0, %c0_1] : memref<2x128xf32, #tpu.memory_space<vmem>>, vector<2x128xf32>
    %c0_2 = arith.constant 0 : index
    %c0_3 = arith.constant 0 : index
    %4 = vector.load %arg1[%c0_2, %c0_3] : memref<2x6144xf32, #tpu.memory_space<vmem>>, vector<2x6144xf32>
    %c0_4 = arith.constant 0 : index
    %c0_5 = arith.constant 0 : index
    %5 = vector.load %arg2[%c0_4, %c0_5] : memref<6144x128xf32, #tpu.memory_space<vmem>>, vector<6144x128xf32>
    %cst = arith.constant dense<0.000000e+00> : vector<2x128xf32>
    %6 = tpu.matmul %4, %5, %cst {dimension_numbers = #tpu.dot_dimension_numbers<[1], [0], [0], [1], [0, 0, 1, 1], [], []>} : vector<2x6144xf32>, vector<6144x128xf32>, vector<2x128xf32> -> vector<2x128xf32>
    %7 = arith.addf %3, %6 : vector<2x128xf32>
    %c0_6 = arith.constant 0 : index
    %c0_7 = arith.constant 0 : index
    %8 = vector.load %arg7[%c0_6, %c0_7] : memref<2x128xf32, #tpu.memory_space<vmem>>, vector<2x128xf32>
    tpu.vector_store %arg7[%c0_6, %c0_7], %7 {strides = array<i32>} : memref<2x128xf32, #tpu.memory_space<vmem>>, vector<2x128xf32>,
    %c1_i32 = arith.constant 1 : i32
    %9 = arith.cmpi eq, %arg0, %c1_i32 : i32
    %10 = arith.extui %9 : i1 to i32
    %c0_i32_8 = arith.constant 0 : i32
    %11 = arith.cmpi ne, %10, %c0_i32_8 : i32
    scf.if %11 {
      %c0_9 = arith.constant 0 : index
      %c0_10 = arith.constant 0 : index
      %12 = vector.load %arg7[%c0_9, %c0_10] : memref<2x128xf32, #tpu.memory_space<vmem>>, vector<2x128xf32>
      %c0_11 = arith.constant 0 : index
      %c0_12 = arith.constant 0 : index
      %13 = vector.load %arg3[%c0_11, %c0_12] : memref<1x128xf32, #tpu.memory_space<vmem>>, vector<1x128xf32>
      %14 = vector.broadcast %13 : vector<1x128xf32> to vector<2x128xf32>
      %15 = arith.addf %12, %14 : vector<2x128xf32>
      %cst_13 = arith.constant 0.000000e+00 : f32
      %16 = vector.broadcast %cst_13 : f32 to vector<2x128xf32>
      %17 = arith.maximumf %15, %16 : vector<2x128xf32>
      %c0_14 = arith.constant 0 : index
      %c0_15 = arith.constant 0 : index
      %18 = vector.load %arg4[%c0_14, %c0_15] : memref<128x2xf32, #tpu.memory_space<vmem>>, vector<128x2xf32>
      %cst_16 = arith.constant dense<0.000000e+00> : vector<2x2xf32>
      %19 = tpu.matmul %17, %18, %cst_16 {dimension_numbers = #tpu.dot_dimension_numbers<[1], [0], [0], [1], [0, 0, 1, 1], [], []>} : vector<2x128xf32>, vector<128x2xf32>, vector<2x2xf32> -> vector<2x2xf32>
      %c0_17 = arith.constant 0 : index
      %c0_18 = arith.constant 0 : index
      %20 = vector.load %arg5[%c0_17, %c0_18] : memref<1x2xf32, #tpu.memory_space<vmem>>, vector<1x2xf32>
      %21 = vector.broadcast %20 : vector<1x2xf32> to vector<2x2xf32>
      %22 = arith.addf %19, %21 : vector<2x2xf32>
      %cst_19 = arith.constant dense<0xFF800000> : vector<2xf32>
      %23 = vector.multi_reduction <maximumf>, %22, %cst_19 [1] : vector<2x2xf32> to vector<2xf32>
      %24 = vector.shape_cast %23 : vector<2xf32> to vector<2x1xf32>
      %25 = vector.broadcast %24 : vector<2x1xf32> to vector<2x2xf32>
      %26 = arith.subf %22, %25 : vector<2x2xf32>
      %27 = math.exp %26 : vector<2x2xf32>
      %cst_20 = arith.constant dense<0.000000e+00> : vector<2xf32>
      %28 = vector.multi_reduction <add>, %27, %cst_20 [1] : vector<2x2xf32> to vector<2xf32>
      %29 = vector.shape_cast %28 : vector<2xf32> to vector<2x1xf32>
      %30 = math.log %29 : vector<2x1xf32>
      %31 = vector.broadcast %30 : vector<2x1xf32> to vector<2x2xf32>
      %32 = arith.subf %26, %31 : vector<2x2xf32>
      %c0_21 = arith.constant 0 : index
      %c0_22 = arith.constant 0 : index
      %33 = vector.load %arg6[%c0_21, %c0_22] : memref<2x2xf32, #tpu.memory_space<vmem>>, vector<2x2xf32>
      tpu.vector_store %arg6[%c0_21, %c0_22], %32 {strides = array<i32>} : memref<2x2xf32, #tpu.memory_space<vmem>>, vector<2x2xf32>,
    } else {
    }
    return
  }
  func.func @transform_0(%arg0: i32) -> (i32, i32) {
    %c0_i32 = arith.constant 0 : i32
    %c0_i32_0 = arith.constant 0 : i32
    return %c0_i32, %arg0 : i32, i32
  }
  func.func @transform_1(%arg0: i32) -> (i32, i32) {
    %c0_i32 = arith.constant 0 : i32
    %c0_i32_0 = arith.constant 0 : i32
    return %arg0, %c0_i32 : i32, i32
  }
  func.func @transform_2(%arg0: i32) -> (i32, i32) {
    %c0_i32 = arith.constant 0 : i32
    %c0_i32_0 = arith.constant 0 : i32
    %c0_i32_1 = arith.constant 0 : i32
    return %c0_i32, %c0_i32_0 : i32, i32
  }
  func.func @transform_3(%arg0: i32) -> (i32, i32) {
    %c0_i32 = arith.constant 0 : i32
    %c0_i32_0 = arith.constant 0 : i32
    %c0_i32_1 = arith.constant 0 : i32
    return %c0_i32, %c0_i32_0 : i32, i32
  }
  func.func @transform_4(%arg0: i32) -> (i32, i32) {
    %c0_i32 = arith.constant 0 : i32
    %c0_i32_0 = arith.constant 0 : i32
    %c0_i32_1 = arith.constant 0 : i32
    return %c0_i32, %c0_i32_0 : i32, i32
  }
  func.func @transform_5(%arg0: i32) -> (i32, i32) {
    %c0_i32 = arith.constant 0 : i32
    %c0_i32_0 = arith.constant 0 : i32
    %c0_i32_1 = arith.constant 0 : i32
    return %c0_i32, %c0_i32_0 : i32, i32
  }
}

</mosaic_0001>

<bundles_post_ra>
// kernel: simple_classifier_prepared.1
= control target key start
LH: loop header
LB: loop body
LE: loop exit
PB: predicated region body
PF: predicated region fallthrough
CT: control target
= control target key end

     0   :  { %10 = vsyncpa [#allocation4], 0  ;;  %s6521_s0 = inlined_call_operand.hbm [shape: f32[2,12288], index: 0, kind: input, shape index: {}]   ;;  %s6522_s1 = inlined_call_operand.hbm [shape: f32[12288,128], index: 1, kind: input, shape index: {}]   ;;  %s6523_s2 = inlined_call_operand.hbm [shape: f32[1,128], index: 2, kind: input, shape index: {}]   ;;  %s6524_s3 = inlined_call_operand.vmem [shape: f32[128,2], index: 3, kind: input, shape index: {}]   ;;  %s6525_s4 = inlined_call_operand.hbm [shape: f32[1,2], index: 4, kind: input, shape index: {}]   ;;  %s6526_s5 = inlined_call_operand.hbm [shape: f32[2,2], index: 5, kind: output, shape index: {}]  }
   0x1   :  { %12 = vsyncpa [#allocation4 + $0x1], 0 }
   0x2   :  { %13 = vsyncpa [#allocation7], 0 }
   0x3   :  { %15 = vsyncpa [#allocation7 + $0x1], 0 }
   0x4   :  { %16 = vsyncpa [#allocation10], 0 }
   0x5   :  { %17 = vsyncpa [#allocation5], 0  ;;  %s5289_s18 = smov 0   ;;  %s5291_s19 = smov 0  }
   0x6   :  { %s5293_s20 = smov 0   ;;  %s5295_s21 = smov 0  }
   0x7 LB: > { %s5308_s22 = sadd.s32 4294967295, %s5245_s21   ;;  %p43_p0 = scmp.ne.s32.totalorder %s5237_s19, %s5233_s18  ;;  %s5245_s21 = sphi %s5295_s21, %s6544_s21   ;;  %s5241_s20 = sphi %s5293_s20, %s6543_s20   ;;  %s5237_s19 = sphi %s5291_s19, %s6542_s19   ;;  %s5233_s18 = sphi %s5289_s18, %s6541_s18  }
   0x8   : > { %p6527_p1 = scmp.eq.s32.totalorder %s5308_s22, 0  ;;  %p3251_p2 = scmp.ge.s32.totalorder %s5245_s21, 1 }
   0x9   : > { %p164_p3 = scmp.lt.s32.totalorder %s5245_s21, 3  ;;  %s5247_s25 = smov [#allocation8]  }
   0xa   : > { %p5317_p5 = por %p6527_p1, %p43_p0  ;;  %s177_s26 = sshll.u32 %s5247_s25, 4  ;;  %s178_s26 = int_to_ptr.vmem [resolvable:$true] %s177_s26 }
   0xb   : > { %p5321_p6 = pnand %p3251_p2, %p164_p3  ;;  %s5248_s27 = smov [#allocation9]  }
   0xc   : > { %s6530_s23 = scalar_select %p5317_p5, 1, 0 }
   0xd   : > { %s6531_s24 = scalar_select %p5321_p6, 1, 0 }
   0xe   : > { %p4974_p7 = pneg %p5321_p6  ;;  %s191_s28 = sshll.u32 %s5248_s27, 4  ;;  %s5333_s28 = int_to_ptr.vmem [resolvable:$true] %s191_s28 }
   0xf   : > { %s5336_s30 = sadd.s32 1, %s5245_s21   ;;  %s5053_s9 = scalar_lea.hbm %s6523_s2, 16 }
  0x10   : > { %p5329_p8 = pnand %p4974_p7, %p6527_p1  ;;  %s27_s6 = ssub.s32 %s5245_s21, %s5336_s30 }
  0x11   : > { %p5054_p9 = scmp.ne.s32.totalorder %s6523_s2, %s5053_s9  ;;  %p5060_p13 = scmp.lt.u32.totalorder %s5053_s9, %s6523_s2 }
  0x12   : > { %p5055_p10 = pneg %p5329_p8 }
  0x14   : > { %p5056_p11 = pnand %p5055_p10, %p5054_p9 }
  0x16   : > { %p5057_p12 = pneg %p5056_p11 }
  0x18   : > { %p5062_p0 = pnand %p5060_p13, %p5057_p12 }
  0x1a   : > { %5065 = shalt.err (!%p5062_p0)
}
  0x1b   : > { %s5066_s14 = scalar_lea.vmem %s178_s26, 16  ;;  %s5073_s15 = scalar_lea.vmem %s178_s26, 32 }
  0x1c   : > { %p5067_p2 = scmp.ne.s32.totalorder %s178_s26, %s5066_s14  ;;  %p5074_p4 = scmp.lt.s32.totalorder %s178_s26, %s178_s26 }
  0x1d   : > { %p5075_p1 = scmp.lt.s32.totalorder %s5073_s15, %s5066_s14 }
  0x1e   : > { %p5069_p3 = pnand %p5067_p2, %p5055_p10 }
  0x1f   : > { %p5076_p5 = por %p5075_p1, %p5074_p4 }
  0x20   : > { %p5070_p7 = pneg %p5069_p3 }
  0x22   : > { %p5077_p6 = pnand %p5076_p5, %p5070_p7 }
  0x24   : > { %5080 = shalt.err (!%p5077_p6)
}
  0x25   : > { %4977 = dma.hbm_to_vmem [thread:$0]  (!%p5329_p8), %s6523_s2, 16, %s178_s26, [#allocation7]  }
  0x26   : > { %s5081_s27 = scalar_lea.hbm %s6525_s4, 16 }
  0x27   : > { %p5082_p9 = scmp.ne.s32.totalorder %s6525_s4, %s5081_s27  ;;  %p5088_p5 = scmp.lt.u32.totalorder %s5081_s27, %s6525_s4 }
  0x29   : > { %p5084_p1 = pnand %p5082_p9, %p5055_p10 }
  0x2b   : > { %p5085_p4 = pneg %p5084_p1 }
  0x2d   : > { %p5090_p6 = pnand %p5088_p5, %p5085_p4 }
  0x2f   : > { %5093 = shalt.err (!%p5090_p6)
}
  0x30   : > { %s5094_s26 = scalar_lea.vmem %s5333_s28, 16  ;;  %s5101_s11 = scalar_lea.vmem %s5333_s28, 32 }
  0x31   : > { %p5095_p11 = scmp.ne.s32.totalorder %s5333_s28, %s5094_s26  ;;  %p5102_p0 = scmp.lt.s32.totalorder %s5333_s28, %s5333_s28 }
  0x32   : > { %p5103_p2 = scmp.lt.s32.totalorder %s5101_s11, %s5094_s26 }
  0x33   : > { %p5097_p12 = pnand %p5095_p11, %p5055_p10 }
  0x34   : > { %p5104_p3 = por %p5103_p2, %p5102_p0 }
  0x35   : > { %p5098_p13 = pneg %p5097_p12 }
  0x37   : > { %p5105_p7 = pnand %p5104_p3, %p5098_p13 }
  0x39   : > { %5108 = shalt.err (!%p5105_p7)
}
  0x3a   : > { %4980 = dma.hbm_to_vmem [thread:$0]  (!%p5329_p8), %s6525_s4, 16, %s5333_s28, [#allocation10]  }
  0x3b   : > { %p28_p10 = scmp.eq.s32.totalorder %s27_s6, 0  ;;  %s30_s14 = sadd.s32 1, %s5241_s20 }
  0x3c   : > { %p37_p9 = scmp.ne.s32.totalorder %s5241_s20, %s5237_s19  ;;  %p38_p1 = scmp.eq.s32.totalorder %s5245_s21, 0 }
  0x3d   : > { %s5396_s29 = scalar_select %p28_p10, %s5241_s20, %s30_s14  }
  0x3e   : > { %p39_p4 = por %p38_p1, %p37_p9  ;;  %p4990_p5 = scmp.lt.s32.totalorder %s5245_s21, 2 }
  0x3f   : > { %s5400_s15 = sand.u32 1, %s5241_s20   ;;  %s3268_s16 = smul.u32 1536, %s5245_s21 }
  0x40   : > { %s4954_s17 = smul.u32 96, %s5400_s15  ;;  %p5409_p8 = pnand %p4990_p5, %p39_p4 }
  0x41   : > { %s5407_s28 = scalar_lea.hbm %s6521_s0, %s3268_s16  ;;  %s4955_s27 = smul.u32 6144, %s5400_s15 }
  0x42   : > { %s206_s7 = scalar_lea.vmem [#allocation3], %s4954_s17  ;;  %s203_s9 = scalar_lea.sflag [#allocation4], %s5400_s15 }
  0x43   : > { %s214_s8 = sshll.u32 %s206_s7, 4  ;;  %s5109_s10 = scalar_lea.hbm %s5407_s28, 1536  ;;  %s5414_s8 = int_to_ptr.vmem [resolvable:$true] %s214_s8 }
  0x44   : > { %p5110_p6 = scmp.ne.s32.totalorder %s5407_s28, %s5109_s10  ;;  %p5111_p11 = pneg %p5409_p8 }
  0x45   : > { %s5114_s12 = scalar_lea.hbm %s6521_s0, 3072  ;;  %p5115_p0 = scmp.lt.u32.totalorder %s5407_s28, %s6521_s0 }
  0x46   : > { %p5112_p12 = pnand %p5111_p11, %p5110_p6  ;;  %p5116_p2 = scmp.lt.u32.totalorder %s5114_s12, %s5109_s10 }
  0x47   : > { %p5118_p7 = scmp.lt.u32.totalorder %s5109_s10, %s5407_s28 }
  0x48   : > { %p5113_p13 = pneg %p5112_p12  ;;  %p5117_p3 = por %p5116_p2, %p5115_p0 }
  0x4a   : > { %p5119_p10 = por %p5118_p7, %p5117_p3 }
  0x4c   : > { %p5120_p9 = pnand %p5119_p10, %p5113_p13 }
  0x4e   : > { %5123 = shalt.err (!%p5120_p9)
}
  0x4f   : > { %s5124_s16 = scalar_lea.vmem %s5414_s8, 1536  ;;  %s5249_s17 = smov [#allocation3]  }
  0x50   : > { %p5125_p1 = scmp.ne.s32.totalorder %s5414_s8, %s5124_s16  ;;  %s5129_s18 = sshll.u32 %s5249_s17, 4  ;;  %s5130_s18 = int_to_ptr.vmem [resolvable:$false] %s5129_s18 }
  0x51   : > { %s5131_s25 = scalar_lea.vmem %s5130_s18, 3072  ;;  %p5132_p6 = scmp.lt.s32.totalorder %s5414_s8, %s5130_s18 }
  0x52   : > { %p5127_p4 = pnand %p5125_p1, %p5111_p11  ;;  %p5133_p12 = scmp.lt.s32.totalorder %s5131_s25, %s5124_s16 }
  0x54   : > { %p5128_p5 = pneg %p5127_p4  ;;  %p5134_p0 = por %p5133_p12, %p5132_p6 }
  0x56   : > { %p5135_p2 = pnand %p5134_p0, %p5128_p5 }
  0x58   : > { %5138 = shalt.err (!%p5135_p2)
}
  0x59   : > { %4984 = dma.hbm_to_vmem [thread:$0]  (!%p5409_p8), %s5407_s28, 1536, %s5414_s8, %s203_s9  }
  0x5a   : > { %s225_s7 = scalar_lea.vmem [#allocation6], %s4955_s27  ;;  %s221_s26 = sand.u32 1, %s5245_s21  }
  0x5b   : > { %s232_s10 = sshll.u32 %s225_s7, 4  ;;  %s3269_s11 = smul.u32 98304, %s5245_s21  ;;  %s5445_s10 = int_to_ptr.vmem [resolvable:$true] %s232_s10 }
  0x5c   : > { %s5453_s16 = scalar_lea.sflag [#allocation7], %s221_s26  ;;  %s5144_s21 = scalar_lea.hbm %s6522_s1, 196608 }
  0x5d   : > { %s5451_s14 = scalar_lea.hbm %s6522_s1, %s3269_s11 }
  0x5e   : > { %s5139_s17 = scalar_lea.hbm %s5451_s14, 98304  ;;  %p5145_p10 = scmp.lt.u32.totalorder %s5451_s14, %s6522_s1 }
  0x5f   : > { %p5140_p13 = scmp.ne.s32.totalorder %s5451_s14, %s5139_s17  ;;  %p5146_p9 = scmp.lt.u32.totalorder %s5144_s21, %s5139_s17 }
  0x60   : > { %p5148_p4 = scmp.lt.u32.totalorder %s5139_s17, %s5451_s14 }
  0x61   : > { %p5142_p3 = pnand %p5140_p13, %p5111_p11  ;;  %p5147_p1 = por %p5146_p9, %p5145_p10 }
  0x63   : > { %p5143_p7 = pneg %p5142_p3  ;;  %p5149_p5 = por %p5148_p4, %p5147_p1 }
  0x65   : > { %p5150_p6 = pnand %p5149_p5, %p5143_p7 }
  0x67   : > { %5153 = shalt.err (!%p5150_p6)
}
  0x68   : > { %s5154_s9 = scalar_lea.vmem %s5445_s10, 98304  ;;  %s5250_s18 = smov [#allocation6]  }
  0x69   : > { %p5155_p12 = scmp.ne.s32.totalorder %s5445_s10, %s5154_s9  ;;  %s5159_s25 = sshll.u32 %s5250_s18, 4  ;;  %s5160_s25 = int_to_ptr.vmem [resolvable:$false] %s5159_s25 }
  0x6a   : > { %s5161_s7 = scalar_lea.vmem %s5160_s25, 196608  ;;  %p5162_p13 = scmp.lt.s32.totalorder %s5445_s10, %s5160_s25 }
  0x6b   : > { %p5157_p0 = pnand %p5155_p12, %p5111_p11  ;;  %p5163_p3 = scmp.lt.s32.totalorder %s5161_s7, %s5154_s9 }
  0x6d   : > { %p5158_p2 = pneg %p5157_p0  ;;  %p5164_p10 = por %p5163_p3, %p5162_p13 }
  0x6f   : > { %p5165_p9 = pnand %p5164_p10, %p5158_p2 }
  0x71   : > { %5168 = shalt.err (!%p5165_p9)
}
  0x72   : > { %s5251_s26 = smov 128   ;;  %s5252_s11 = smov 8  }
  0x73   : > { %4987 = dma.hbm_to_vmem [thread:$0]  (!%p5409_p8), %s5451_s14, 98304, %s5445_s10, %s5453_s16, %s5251_s26, %s5251_s26, %s5252_s11  }
  0x74   : > { %p6534_p11 = scmp.ne.s32.totalorder %s6531_s24, 0 }
  0x75   : > { %s246_s12 = sand.u32 (!%p6534_p11), 1, %s5237_s19   ;;  %p6535_p7 = scmp.ne.s32.totalorder (!%p6534_p11), %s6530_s23, 0 }
  0x76   : > { %244 = sbr.rel (%p6534_p11) target bundleno = 1323 (0x52b), region = 40  ;;  %s247_s17 = scalar_lea.sflag (!%p6534_p11), [#allocation4], %s246_s12 }
  0x77   : > { %s4956_s13 = smul.u32 (!%p6534_p11), 96, %s246_s12 }
  0x79   : > { %s5482_s15 = scalar_lea.vmem (!%p6534_p11), [#allocation3], %s4956_s13 }
  0x7d   : > { %5212 = dma.done.wait (%p6535_p7), %s247_s17, 1536  }
  0x7e   : > { %5214 = vsyncadd (%p6535_p7), %s247_s17, 4294965760  ;;  %s255_s28 = sand.u32 1, %s5308_s22   ;;  %s4957_s6 = smul.u32 6144, %s246_s12 }
  0x7f   : > { %s256_s10 = scalar_lea.sflag [#allocation7], %s255_s28 }
  0x80   : > { %s5489_s14 = scalar_lea.vmem [#allocation6], %s4957_s6 }
  0x81   : > { %5216 = dma.done.wait (%p6535_p7), %s256_s10, 98304  }
  0x82   : > { %5218 = vsyncadd (%p6535_p7), %s256_s10, 4294868992  ;;  %p6536_p8 = scmp.eq.s32.totalorder %s5308_s22, 0 }
  0x84   : > { %5220 = dma.done.wait (%p6536_p8), [#allocation7], 16   ;;  %p6537_p1 = pmov %p6536_p8 }
  0x86   : > { %5222 = vsyncadd (%p6537_p1), [#allocation7], 4294967280  ;;  %p6538_p4 = pmov %p6537_p1 }
  0x87   : > { %p6539_p5 = pmov %p6537_p1 }
  0x88   : > { %5224 = dma.done.wait (%p6538_p4), [#allocation10], 16  }
  0x89   : > { %5226 = vsyncadd (%p6539_p5), [#allocation10], 4294967280  ;;  %p6540_p6 = scmp.ne.s32.totalorder %s5308_s22, 0 }
  0x8a   : > { %vm301_vm0 = vcmask (!%p6540_p6), 9216   ;;  %v5253_v0 = vmov (!%p6540_p6), 0.0  }
  0x8b   : > { %299 = sbr.rel (%p6540_p6) target bundleno = 146 (0x92), region = 60  ;;  %300 = vst [vmem:[#allocation2] sm:$0x3] (!%p6540_p6), %v5253_v0  ;;  %302 = vst.msk [vmem:[#allocation11] sm:$0x3] (!%p6540_p6), %vm301_vm0, %v5253_v0 }
  0x92 PF: > { %v332_v1 = vld [vmem:[%s5489_s14 + $0x80] sm:$0xff]  ;;  %v333_v2 = vld [vmem:[%s5489_s14 + $0x88] sm:$0xff]  ;;  %v334_v12 = vld [vmem:[%s5489_s14 + $0x90] sm:$0xff]  ;;  %v5254_v48 = vmov 1983009808   ;;  %v1100_v50 = vlaneseq  ;;  %p3261_p12 = scmp.ne.s32.totalorder %s5308_s22, 1 }
  0x93   : > { %v364_v3 = vld [vmem:[%s5489_s14 + $0x180] sm:$0xff]  ;;  %v4162_v4 = vpack.c.bf16 %v333_v2, %v332_v1  ;;  %v365_v5 = vld [vmem:[%s5489_s14 + $0x188] sm:$0xff]  ;;  %v335_v14 = vld [vmem:[%s5489_s14 + $0x98] sm:$0xff]  ;;  %v1098_v49 = vunpack.c.l.s4 %v5254_v48  ;;  %vm5256_vm1 = vmmov (!%p3261_p12), 0   ;;  %vm3137_vm2 = vcmask (!%p3261_p12), 9216  }
  0x94   : > { %v316_v6 = vld [vmem:[%s5489_s14] sm:$0xff]  ;;  %v317_v7 = vld [vmem:[%s5489_s14 + $0x8] sm:$0xff]  ;;  %v4194_v8 = vpack.c.bf16 %v365_v5, %v364_v3  ;;  %v366_v15 = vld [vmem:[%s5489_s14 + $0x190] sm:$0xff]  ;;  %v4166_v17 = vpack.c.bf16 %v335_v14, %v334_v12  ;;  %v1101_v1 = vshrl.u32 %v1100_v50, 7 }
  0x95   : > { %v4164_v9 = vpack.c.bf16 %v317_v7, %v316_v6  ;;  %v348_v10 = vld [vmem:[%s5489_s14 + $0x100] sm:$0xff]  ;;  %v349_v11 = vld [vmem:[%s5489_s14 + $0x108] sm:$0xff]  ;;  %4163 = vmatprep.subr.bf16.mxu0 %v4162_v4  ;;  %v367_v16 = vld [vmem:[%s5489_s14 + $0x198] sm:$0xff]  ;;  %v1099_v0 = vunpack.c.0.s8 %v1098_v49 }
  0x96   : > { %v4196_v13 = vpack.c.bf16 %v349_v11, %v348_v10  ;;  %4195 = vmatprep.subr.bf16.mxu1 %v4194_v8  ;;  %v4198_v18 = vpack.c.bf16 %v367_v16, %v366_v15  ;;  %v318_v19 = vld [vmem:[%s5489_s14 + $0x10] sm:$0xff]  ;;  %v319_v20 = vld [vmem:[%s5489_s14 + $0x18] sm:$0xff]  ;;  %v336_v24 = vld [vmem:[%s5489_s14 + $0xa0] sm:$0xff] }
  0x97   : > { %4165 = vmatpush3.bf16.msra.mxu0 %v4164_v9  ;;  %v350_v21 = vld [vmem:[%s5489_s14 + $0x110] sm:$0xff]  ;;  %v4168_v22 = vpack.c.bf16 %v319_v20, %v318_v19  ;;  %v351_v23 = vld [vmem:[%s5489_s14 + $0x118] sm:$0xff]  ;;  %v337_v25 = vld [vmem:[%s5489_s14 + $0xa8] sm:$0xff]  ;;  %v5555_v14 = vsub.s32 %v1099_v0, %v1101_v1 }
  0x98   : > { %4197 = vmatpush3.bf16.msra.mxu1 %v4196_v13  ;;  %4167 = vmatprep.subr.bf16.mxu0 %v4166_v17  ;;  %v4200_v26 = vpack.c.bf16 %v351_v23, %v350_v21  ;;  %v4170_v27 = vpack.c.bf16 %v337_v25, %v336_v24  ;;  %v368_v28 = vld [vmem:[%s5489_s14 + $0x1a0] sm:$0xff]  ;;  %v369_v29 = vld [vmem:[%s5489_s14 + $0x1a8] sm:$0xff]  ;;  %v338_v36 = vld [vmem:[%s5489_s14 + $0xb0] sm:$0xff] }
  0x99   : > { %4199 = vmatprep.subr.bf16.mxu1 %v4198_v18  ;;  %v320_v30 = vld [vmem:[%s5489_s14 + $0x20] sm:$0xff]  ;;  %v4202_v31 = vpack.c.bf16 %v369_v29, %v368_v28  ;;  %v321_v32 = vld [vmem:[%s5489_s14 + $0x28] sm:$0xff]  ;;  %v339_v37 = vld [vmem:[%s5489_s14 + $0xb8] sm:$0xff] }
  0x9a   : > { %v352_v33 = vld [vmem:[%s5489_s14 + $0x120] sm:$0xff]  ;;  %v353_v34 = vld [vmem:[%s5489_s14 + $0x128] sm:$0xff]  ;;  %v4172_v35 = vpack.c.bf16 %v321_v32, %v320_v30  ;;  %v370_v38 = vld [vmem:[%s5489_s14 + $0x1b0] sm:$0xff]  ;;  %v4174_v40 = vpack.c.bf16 %v339_v37, %v338_v36 }
  0x9b   : > { %4169 = vmatpush3.bf16.msra.mxu0 %v4168_v22  ;;  %v4204_v39 = vpack.c.bf16 %v353_v34, %v352_v33  ;;  %v371_v41 = vld [vmem:[%s5489_s14 + $0x1b8] sm:$0xff]  ;;  %v322_v42 = vld [vmem:[%s5489_s14 + $0x30] sm:$0xff]  ;;  %v340_v47 = vld [vmem:[%s5489_s14 + $0xc0] sm:$0xff] }
  0x9c   : > { %4201 = vmatpush3.bf16.msra.mxu1 %v4200_v26  ;;  %4171 = vmatprep.subr.bf16.mxu0 %v4170_v27  ;;  %v323_v43 = vld [vmem:[%s5489_s14 + $0x38] sm:$0xff]  ;;  %v4206_v44 = vpack.c.bf16 %v371_v41, %v370_v38  ;;  %v354_v45 = vld [vmem:[%s5489_s14 + $0x130] sm:$0xff]  ;;  %v341_v51 = vld [vmem:[%s5489_s14 + $0xc8] sm:$0xff] }
  0x9d   : > { %4203 = vmatprep.subr.bf16.mxu1 %v4202_v31  ;;  %v355_v46 = vld [vmem:[%s5489_s14 + $0x138] sm:$0xff]  ;;  %v372_v52 = vld [vmem:[%s5489_s14 + $0x1c0] sm:$0xff]  ;;  %v373_v53 = vld [vmem:[%s5489_s14 + $0x1c8] sm:$0xff]  ;;  %v4176_v54 = vpack.c.bf16 %v323_v43, %v322_v42  ;;  %v4178_v56 = vpack.c.bf16 %v341_v51, %v340_v47 }
  0x9e   : > { %v4208_v55 = vpack.c.bf16 %v355_v46, %v354_v45  ;;  %v324_v57 = vld [vmem:[%s5489_s14 + $0x40] sm:$0xff]  ;;  %v325_v58 = vld [vmem:[%s5489_s14 + $0x48] sm:$0xff]  ;;  %v4210_v60 = vpack.c.bf16 %v373_v53, %v372_v52  ;;  %v342_v62 = vld [vmem:[%s5489_s14 + $0xd0] sm:$0xff] }
  0x9f   : > { %4173 = vmatpush3.bf16.msra.mxu0 %v4172_v35  ;;  %v356_v59 = vld [vmem:[%s5489_s14 + $0x140] sm:$0xff]  ;;  %v357_v61 = vld [vmem:[%s5489_s14 + $0x148] sm:$0xff]  ;;  %v343_v63 = vld [vmem:[%s5489_s14 + $0xd8] sm:$0xff]  ;;  %v4180_v4 = vpack.c.bf16 %v325_v58, %v324_v57 }
  0xa0   : > { %4205 = vmatpush3.bf16.msra.mxu1 %v4204_v39  ;;  %4175 = vmatprep.subr.bf16.mxu0 %v4174_v40  ;;  %v374_v2 = vld [vmem:[%s5489_s14 + $0x1d0] sm:$0xff]  ;;  %v375_v3 = vld [vmem:[%s5489_s14 + $0x1d8] sm:$0xff]  ;;  %v4212_v5 = vpack.c.bf16 %v357_v61, %v356_v59  ;;  %v4182_v6 = vpack.c.bf16 %v343_v63, %v342_v62  ;;  %v344_v12 = vld [vmem:[%s5489_s14 + $0xe0] sm:$0xff] }
  0xa1   : > { %4207 = vmatprep.subr.bf16.mxu1 %v4206_v44  ;;  %v326_v7 = vld [vmem:[%s5489_s14 + $0x50] sm:$0xff]  ;;  %v327_v8 = vld [vmem:[%s5489_s14 + $0x58] sm:$0xff]  ;;  %v4214_v10 = vpack.c.bf16 %v375_v3, %v374_v2  ;;  %v345_v13 = vld [vmem:[%s5489_s14 + $0xe8] sm:$0xff] }
  0xa2   : > { %v358_v9 = vld [vmem:[%s5489_s14 + $0x150] sm:$0xff]  ;;  %v359_v11 = vld [vmem:[%s5489_s14 + $0x158] sm:$0xff]  ;;  %v376_v15 = vld [vmem:[%s5489_s14 + $0x1e0] sm:$0xff]  ;;  %v4184_v17 = vpack.c.bf16 %v327_v8, %v326_v7  ;;  %v4186_v20 = vpack.c.bf16 %v345_v13, %v344_v12 }
  0xa3   : > { %4177 = vmatpush3.bf16.msra.mxu0 %v4176_v54  ;;  %v377_v16 = vld [vmem:[%s5489_s14 + $0x1e8] sm:$0xff]  ;;  %v328_v18 = vld [vmem:[%s5489_s14 + $0x60] sm:$0xff]  ;;  %v4216_v19 = vpack.c.bf16 %v359_v11, %v358_v9  ;;  %v346_v26 = vld [vmem:[%s5489_s14 + $0xf0] sm:$0xff] }
  0xa4   : > { %4209 = vmatpush3.bf16.msra.mxu1 %v4208_v55  ;;  %4179 = vmatprep.subr.bf16.mxu0 %v4178_v56  ;;  %v329_v21 = vld [vmem:[%s5489_s14 + $0x68] sm:$0xff]  ;;  %v360_v22 = vld [vmem:[%s5489_s14 + $0x160] sm:$0xff]  ;;  %v4218_v24 = vpack.c.bf16 %v377_v16, %v376_v15  ;;  %v347_v27 = vld [vmem:[%s5489_s14 + $0xf8] sm:$0xff] }
  0xa5   : > { %4211 = vmatprep.subr.bf16.mxu1 %v4210_v60  ;;  %v304_v23 = vld [vmem:[%s5482_s15] sm:$0xff]  ;;  %v361_v25 = vld [vmem:[%s5489_s14 + $0x168] sm:$0xff]  ;;  %v378_v30 = vld [vmem:[%s5489_s14 + $0x1f0] sm:$0xff]  ;;  %v4188_v32 = vpack.c.bf16 %v329_v21, %v328_v18  ;;  %v4190_v36 = vpack.c.bf16 %v347_v27, %v346_v26 }
  0xa6   : > { %v1103_v28 = vrot.slane %v304_v23, %v5555_v14  ;;  %v1096_v29 = vcombine.high %v304_v23, %v304_v23  ;;  %v379_v31 = vld [vmem:[%s5489_s14 + $0x1f8] sm:$0xff]  ;;  %v4220_v35 = vpack.c.bf16 %v361_v25, %v360_v22  ;;  %v330_v37 = vld [vmem:[%s5489_s14 + $0x70] sm:$0xff]  ;;  %v396_v43 = vld [vmem:[%s5489_s14 + $0x280] sm:$0xff] }
  0xa7   : > { %4181 = vmatpush3.bf16.msra.mxu0 %v4180_v4  ;;  %v331_v38 = vld [vmem:[%s5489_s14 + $0x78] sm:$0xff]  ;;  %v362_v39 = vld [vmem:[%s5489_s14 + $0x170] sm:$0xff]  ;;  %v4222_v40 = vpack.c.bf16 %v379_v31, %v378_v30  ;;  %v397_v44 = vld [vmem:[%s5489_s14 + $0x288] sm:$0xff] }
  0xa8   : > { %4213 = vmatpush3.bf16.msra.mxu1 %v4212_v5  ;;  %4183 = vmatprep.subr.bf16.mxu0 %v4182_v6  ;;  %v1111_v33 = vcombine.high %v1103_v28, %v1103_v28  ;;  %v1110_v34 = vrot.slane %v1096_v29, %v5555_v14  ;;  %v363_v41 = vld [vmem:[%s5489_s14 + $0x178] sm:$0xff]  ;;  %v428_v45 = vld [vmem:[%s5489_s14 + $0x380] sm:$0xff]  ;;  %v429_v46 = vld [vmem:[%s5489_s14 + $0x388] sm:$0xff]  ;;  %v4192_v47 = vpack.c.bf16 %v331_v38, %v330_v37 }
  0xa9   : > { %4215 = vmatprep.subr.bf16.mxu1 %v4214_v10  ;;  %v4224_v48 = vpack.c.bf16 %v363_v41, %v362_v39  ;;  %v4226_v49 = vpack.c.bf16 %v397_v44, %v396_v43  ;;  %v380_v50 = vld [vmem:[%s5489_s14 + $0x200] sm:$0xff]  ;;  %v381_v51 = vld [vmem:[%s5489_s14 + $0x208] sm:$0xff]  ;;  %v4258_v53 = vpack.c.bf16 %v429_v46, %v428_v45  ;;  %v398_v55 = vld [vmem:[%s5489_s14 + $0x290] sm:$0xff] }
  0xaa   : > { %1412 = vmatprep.mubr.f32.mxu0 %v1111_v33  ;;  %v1112_v42 = vcombine.high %v1110_v34, %v1110_v34  ;;  %v412_v52 = vld [vmem:[%s5489_s14 + $0x300] sm:$0xff]  ;;  %v413_v54 = vld [vmem:[%s5489_s14 + $0x308] sm:$0xff]  ;;  %v399_v56 = vld [vmem:[%s5489_s14 + $0x298] sm:$0xff]  ;;  %v4228_v59 = vpack.c.bf16 %v381_v51, %v380_v50 }
  0xab   : > { %4185 = vmatpush3.bf16.msra.mxu0 %v4184_v17  ;;  %v430_v57 = vld [vmem:[%s5489_s14 + $0x390] sm:$0xff]  ;;  %v431_v58 = vld [vmem:[%s5489_s14 + $0x398] sm:$0xff]  ;;  %v4260_v60 = vpack.c.bf16 %v413_v54, %v412_v52  ;;  %v4230_v61 = vpack.c.bf16 %v399_v56, %v398_v55  ;;  %v400_v3 = vld [vmem:[%s5489_s14 + $0x2a0] sm:$0xff] }
  0xac   : > { %4217 = vmatpush3.bf16.msra.mxu1 %v4216_v19  ;;  %4187 = vmatprep.subr.bf16.mxu0 %v4186_v20  ;;  %v382_v62 = vld [vmem:[%s5489_s14 + $0x210] sm:$0xff]  ;;  %v383_v63 = vld [vmem:[%s5489_s14 + $0x218] sm:$0xff]  ;;  %v4262_v1 = vpack.c.bf16 %v431_v58, %v430_v57  ;;  %v401_v4 = vld [vmem:[%s5489_s14 + $0x2a8] sm:$0xff] }
  0xad   : > { %4219 = vmatprep.subr.bf16.mxu1 %v4218_v24  ;;  %1482 = vmatprep.mubr.f32.mxu1 %v1112_v42  ;;  %v414_v0 = vld [vmem:[%s5489_s14 + $0x310] sm:$0xff]  ;;  %v415_v2 = vld [vmem:[%s5489_s14 + $0x318] sm:$0xff]  ;;  %v432_v5 = vld [vmem:[%s5489_s14 + $0x3a0] sm:$0xff]  ;;  %v4232_v7 = vpack.c.bf16 %v383_v63, %v382_v62  ;;  %v4234_v9 = vpack.c.bf16 %v401_v4, %v400_v3 }
  0xae   : > { %v433_v6 = vld [vmem:[%s5489_s14 + $0x3a8] sm:$0xff]  ;;  %v4264_v8 = vpack.c.bf16 %v415_v2, %v414_v0  ;;  %v384_v10 = vld [vmem:[%s5489_s14 + $0x220] sm:$0xff]  ;;  %v402_v16 = vld [vmem:[%s5489_s14 + $0x2b0] sm:$0xff] }
  0xaf   : > { %4189 = vmatpush3.bf16.msra.mxu0 %v4188_v32  ;;  %v385_v11 = vld [vmem:[%s5489_s14 + $0x228] sm:$0xff]  ;;  %v416_v12 = vld [vmem:[%s5489_s14 + $0x320] sm:$0xff]  ;;  %v4266_v13 = vpack.c.bf16 %v433_v6, %v432_v5  ;;  %v403_v17 = vld [vmem:[%s5489_s14 + $0x2b8] sm:$0xff] }
  0xb0   : > { %4221 = vmatpush3.bf16.msra.mxu1 %v4220_v35  ;;  %4191 = vmatprep.subr.bf16.mxu0 %v4190_v36  ;;  %v417_v15 = vld [vmem:[%s5489_s14 + $0x328] sm:$0xff]  ;;  %v434_v18 = vld [vmem:[%s5489_s14 + $0x3b0] sm:$0xff]  ;;  %v435_v19 = vld [vmem:[%s5489_s14 + $0x3b8] sm:$0xff]  ;;  %v4236_v20 = vpack.c.bf16 %v385_v11, %v384_v10  ;;  %v4238_v22 = vpack.c.bf16 %v403_v17, %v402_v16 }
  0xb1   : > { %4223 = vmatprep.subr.bf16.mxu1 %v4222_v40  ;;  %v4268_v21 = vpack.c.bf16 %v417_v15, %v416_v12  ;;  %v386_v23 = vld [vmem:[%s5489_s14 + $0x230] sm:$0xff]  ;;  %v387_v24 = vld [vmem:[%s5489_s14 + $0x238] sm:$0xff]  ;;  %v4270_v26 = vpack.c.bf16 %v435_v19, %v434_v18  ;;  %v405_v29 = vld [vmem:[%s5489_s14 + $0x2c8] sm:$0xff] }
  0xb2   : > { %v418_v25 = vld [vmem:[%s5489_s14 + $0x330] sm:$0xff]  ;;  %v419_v27 = vld [vmem:[%s5489_s14 + $0x338] sm:$0xff]  ;;  %v436_v30 = vld [vmem:[%s5489_s14 + $0x3c0] sm:$0xff]  ;;  %v4240_v33 = vpack.c.bf16 %v387_v24, %v386_v23 }
  0xb3   : > { %4193 = vmatpush3.bf16.msra.mxu0 %v4192_v47  ;;  %v437_v31 = vld [vmem:[%s5489_s14 + $0x3c8] sm:$0xff]  ;;  %v4272_v36 = vpack.c.bf16 %v419_v27, %v418_v25  ;;  %v388_v38 = vld [vmem:[%s5489_s14 + $0x240] sm:$0xff]  ;;  %v406_v43 = vld [vmem:[%s5489_s14 + $0x2d0] sm:$0xff] }
  0xb4   : > { %4225 = vmatpush3.bf16.msra.mxu1 %v4224_v48  ;;  %4227 = vmatprep.subr.bf16.mxu0 %v4226_v49  ;;  %v305_v32 = vld [vmem:[%s5482_s15 + $0x8] sm:$0xff]  ;;  %v420_v40 = vld [vmem:[%s5489_s14 + $0x340] sm:$0xff]  ;;  %v4274_v41 = vpack.c.bf16 %v437_v31, %v436_v30  ;;  %v407_v44 = vld [vmem:[%s5489_s14 + $0x2d8] sm:$0xff] }
  0xb5   : > { %4259 = vmatprep.subr.bf16.mxu1 %v4258_v53  ;;  %v1113_v35 = vcombine.high %v305_v32, %v305_v32  ;;  %v389_v39 = vld [vmem:[%s5489_s14 + $0x248] sm:$0xff]  ;;  %v438_v47 = vld [vmem:[%s5489_s14 + $0x3d0] sm:$0xff]  ;;  %v439_v48 = vld [vmem:[%s5489_s14 + $0x3d8] sm:$0xff]  ;;  %v4246_v52 = vpack.c.bf16 %v407_v44, %v406_v43 }
  0xb6   : > { %1413 = vmatmul.mubr.f32.vlgmr.msra.gmra.mrb[0].mxu0 %v1103_v28  ;;  %v404_v28 = vld [vmem:[%s5489_s14 + $0x2c0] sm:$0xff]  ;;  %v421_v42 = vld [vmem:[%s5489_s14 + $0x348] sm:$0xff]  ;;  %v4244_v49 = vpack.c.bf16 %v389_v39, %v388_v38  ;;  %v390_v53 = vld [vmem:[%s5489_s14 + $0x250] sm:$0xff]  ;;  %v4278_v56 = vpack.c.bf16 %v439_v48, %v438_v47 }
  0xb7   : > { %1483 = vmatmul.mubr.f32.vlgmr.msra.gmra.mrb[0].mxu1 %v1110_v34  ;;  %4229 = vmatpush3.bf16.msra.mxu0 %v4228_v59  ;;  %v5612_v34 = vrot.slane %v305_v32, %v5555_v14  ;;  %v4242_v37 = vpack.c.bf16 %v405_v29, %v404_v28  ;;  %v5623_v46 = vrot.slane %v1113_v35, %v5555_v14  ;;  %v391_v54 = vld [vmem:[%s5489_s14 + $0x258] sm:$0xff]  ;;  %v422_v55 = vld [vmem:[%s5489_s14 + $0x350] sm:$0xff]  ;;  %v408_v58 = vld [vmem:[%s5489_s14 + $0x2e0] sm:$0xff] }
  0xb8   : > { %4261 = vmatpush3.bf16.msra.mxu1 %v4260_v60  ;;  %4231 = vmatprep.subr.bf16.mxu0 %v4230_v61  ;;  %v4276_v51 = vpack.c.bf16 %v421_v42, %v420_v40  ;;  %v423_v57 = vld [vmem:[%s5489_s14 + $0x358] sm:$0xff]  ;;  %v409_v59 = vld [vmem:[%s5489_s14 + $0x2e8] sm:$0xff]  ;;  %v440_v60 = vld [vmem:[%s5489_s14 + $0x3e0] sm:$0xff]  ;;  %v4248_v62 = vpack.c.bf16 %v391_v54, %v390_v53 }
  0xb9   : > { %4263 = vmatprep.subr.bf16.mxu1 %v4262_v1  ;;  %v1128_v45 = vcombine.high %v5612_v34, %v5612_v34  ;;  %v1129_v50 = vcombine.high %v5623_v46, %v5623_v46  ;;  %v441_v61 = vld [vmem:[%s5489_s14 + $0x3e8] sm:$0xff]  ;;  %v4280_v63 = vpack.c.bf16 %v423_v57, %v422_v55  ;;  %v4250_v0 = vpack.c.bf16 %v409_v59, %v408_v58  ;;  %v392_v1 = vld [vmem:[%s5489_s14 + $0x260] sm:$0xff]  ;;  %v410_v6 = vld [vmem:[%s5489_s14 + $0x2f0] sm:$0xff] }
  0xba   : > { %v393_v2 = vld [vmem:[%s5489_s14 + $0x268] sm:$0xff]  ;;  %v424_v3 = vld [vmem:[%s5489_s14 + $0x360] sm:$0xff]  ;;  %v4282_v4 = vpack.c.bf16 %v441_v61, %v440_v60  ;;  %v395_v15 = vld [vmem:[%s5489_s14 + $0x278] sm:$0xff] }
  0xbb   : > { %4233 = vmatpush3.bf16.msra.mxu0 %v4232_v7  ;;  %1552 = vmatprep.mubr.f32.mxu0 %v1128_v45  ;;  %v425_v5 = vld [vmem:[%s5489_s14 + $0x368] sm:$0xff]  ;;  %v411_v7 = vld [vmem:[%s5489_s14 + $0x2f8] sm:$0xff]  ;;  %v4252_v10 = vpack.c.bf16 %v393_v2, %v392_v1  ;;  %v426_v16 = vld [vmem:[%s5489_s14 + $0x370] sm:$0xff] }
  0xbc   : > { %4265 = vmatpush3.bf16.msra.mxu1 %v4264_v8  ;;  %4235 = vmatprep.subr.bf16.mxu0 %v4234_v9  ;;  %v442_v8 = vld [vmem:[%s5489_s14 + $0x3f0] sm:$0xff]  ;;  %v443_v9 = vld [vmem:[%s5489_s14 + $0x3f8] sm:$0xff]  ;;  %v4284_v11 = vpack.c.bf16 %v425_v5, %v424_v3  ;;  %v4254_v12 = vpack.c.bf16 %v411_v7, %v410_v6  ;;  %v460_v19 = vld [vmem:[%s5489_s14 + $0x480] sm:$0xff] }
  0xbd   : > { %4267 = vmatprep.subr.bf16.mxu1 %v4266_v13  ;;  %1622 = vmatprep.mubr.f32.mxu1 %v1129_v50  ;;  %v394_v13 = vld [vmem:[%s5489_s14 + $0x270] sm:$0xff]  ;;  %v4286_v17 = vpack.c.bf16 %v443_v9, %v442_v8  ;;  %v427_v18 = vld [vmem:[%s5489_s14 + $0x378] sm:$0xff]  ;;  %v444_v24 = vld [vmem:[%s5489_s14 + $0x400] sm:$0xff] }
  0xbe   : > { %v4256_v23 = vpack.c.bf16 %v395_v15, %v394_v13  ;;  %v4288_v25 = vpack.c.bf16 %v427_v18, %v426_v16  ;;  %v445_v27 = vld [vmem:[%s5489_s14 + $0x408] sm:$0xff]  ;;  %v476_v28 = vld [vmem:[%s5489_s14 + $0x500] sm:$0xff]  ;;  %v462_v31 = vld [vmem:[%s5489_s14 + $0x490] sm:$0xff] }
  0xbf   : > { %4237 = vmatpush3.bf16.msra.mxu0 %v4236_v20  ;;  %v461_v20 = vld [vmem:[%s5489_s14 + $0x488] sm:$0xff]  ;;  %v463_v32 = vld [vmem:[%s5489_s14 + $0x498] sm:$0xff]  ;;  %v306_v38 = vld [vmem:[%s5482_s15 + $0x10] sm:$0xff] }
  0xc0   : > { %4269 = vmatpush3.bf16.msra.mxu1 %v4268_v21  ;;  %4239 = vmatprep.subr.bf16.mxu0 %v4238_v22  ;;  %v492_v21 = vld [vmem:[%s5489_s14 + $0x580] sm:$0xff]  ;;  %v493_v22 = vld [vmem:[%s5489_s14 + $0x588] sm:$0xff]  ;;  %v495_v35 = vld [vmem:[%s5489_s14 + $0x598] sm:$0xff]  ;;  %v4294_v39 = vpack.c.bf16 %v463_v32, %v462_v31  ;;  %v5666_v43 = vrot.slane %v306_v38, %v5555_v14  ;;  %v1130_v44 = vcombine.high %v306_v38, %v306_v38 }
  0xc1   : > { %4271 = vmatprep.subr.bf16.mxu1 %v4270_v26  ;;  %v4290_v26 = vpack.c.bf16 %v461_v20, %v460_v19  ;;  %v477_v29 = vld [vmem:[%s5489_s14 + $0x508] sm:$0xff]  ;;  %v4322_v30 = vpack.c.bf16 %v493_v22, %v492_v21  ;;  %v446_v40 = vld [vmem:[%s5489_s14 + $0x410] sm:$0xff]  ;;  %v479_v47 = vld [vmem:[%s5489_s14 + $0x518] sm:$0xff] }
  0xc2   : > { %v478_v42 = vld [vmem:[%s5489_s14 + $0x510] sm:$0xff]  ;;  %v464_v48 = vld [vmem:[%s5489_s14 + $0x4a0] sm:$0xff]  ;;  %v5677_v53 = vrot.slane %v1130_v44, %v5555_v14  ;;  %v449_v57 = vld [vmem:[%s5489_s14 + $0x428] sm:$0xff] }
  0xc3   : > { %4241 = vmatpush3.bf16.msra.mxu0 %v4240_v33  ;;  %v494_v33 = vld [vmem:[%s5489_s14 + $0x590] sm:$0xff]  ;;  %v496_v50 = vld [vmem:[%s5489_s14 + $0x5a0] sm:$0xff]  ;;  %v481_v61 = vld [vmem:[%s5489_s14 + $0x528] sm:$0xff] }
  0xc4   : > { %4273 = vmatpush3.bf16.msra.mxu1 %v4272_v36  ;;  %4243 = vmatprep.subr.bf16.mxu0 %v4242_v37  ;;  %v4292_v36 = vpack.c.bf16 %v445_v27, %v444_v24  ;;  %v4324_v37 = vpack.c.bf16 %v477_v29, %v476_v28  ;;  %v4326_v45 = vpack.c.bf16 %v495_v35, %v494_v33  ;;  %v480_v58 = vld [vmem:[%s5489_s14 + $0x520] sm:$0xff]  ;;  %v451_v5 = vld [vmem:[%s5489_s14 + $0x438] sm:$0xff]  ;;  %v482_v6 = vld [vmem:[%s5489_s14 + $0x530] sm:$0xff] }
  0xc5   : > { %4275 = vmatprep.subr.bf16.mxu1 %v4274_v41  ;;  %v447_v41 = vld [vmem:[%s5489_s14 + $0x418] sm:$0xff]  ;;  %v1146_v59 = vcombine.high %v5677_v53, %v5677_v53  ;;  %v4332_v2 = vpack.c.bf16 %v481_v61, %v480_v58  ;;  %v468_v9 = vld [vmem:[%s5489_s14 + $0x4c0] sm:$0xff]  ;;  %v453_v18 = vld [vmem:[%s5489_s14 + $0x448] sm:$0xff] }
  0xc6   : > { %v4296_v54 = vpack.c.bf16 %v447_v41, %v446_v40  ;;  %v483_v8 = vld [vmem:[%s5489_s14 + $0x538] sm:$0xff]  ;;  %v484_v19 = vld [vmem:[%s5489_s14 + $0x540] sm:$0xff]  ;;  %v485_v21 = vld [vmem:[%s5489_s14 + $0x548] sm:$0xff] }
  0xc7   : > { %4245 = vmatpush3.bf16.msra.mxu0 %v4244_v49  ;;  %v465_v49 = vld [vmem:[%s5489_s14 + $0x4a8] sm:$0xff]  ;;  %v4336_v15 = vpack.c.bf16 %v483_v8, %v482_v6  ;;  %v470_v22 = vld [vmem:[%s5489_s14 + $0x4d0] sm:$0xff]  ;;  %v4340_v27 = vpack.c.bf16 %v485_v21, %v484_v19  ;;  %v487_v33 = vld [vmem:[%s5489_s14 + $0x558] sm:$0xff] }
  0xc8   : > { %4277 = vmatpush3.bf16.msra.mxu1 %v4276_v51  ;;  %4247 = vmatprep.subr.bf16.mxu0 %v4246_v52  ;;  %v497_v51 = vld [vmem:[%s5489_s14 + $0x5a8] sm:$0xff]  ;;  %v1145_v52 = vcombine.high %v5666_v43, %v5666_v43  ;;  %v4298_v55 = vpack.c.bf16 %v465_v49, %v464_v48  ;;  %v502_v24 = vld [vmem:[%s5489_s14 + $0x5d0] sm:$0xff]  ;;  %v472_v35 = vld [vmem:[%s5489_s14 + $0x4e0] sm:$0xff] }
  0xc9   : > { %4279 = vmatprep.subr.bf16.mxu1 %v4278_v56  ;;  %v448_v56 = vld [vmem:[%s5489_s14 + $0x420] sm:$0xff]  ;;  %v4330_v60 = vpack.c.bf16 %v497_v51, %v496_v50  ;;  %v454_v29 = vld [vmem:[%s5489_s14 + $0x450] sm:$0xff]  ;;  %v505_v38 = vld [vmem:[%s5489_s14 + $0x5e8] sm:$0xff] }
  0xca   : > { %v4300_v1 = vpack.c.bf16 %v449_v57, %v448_v56  ;;  %v486_v31 = vld [vmem:[%s5489_s14 + $0x550] sm:$0xff]  ;;  %v457_v44 = vld [vmem:[%s5489_s14 + $0x468] sm:$0xff]  ;;  %v475_v50 = vld [vmem:[%s5489_s14 + $0x4f8] sm:$0xff] }
  0xcb   : > { %4249 = vmatpush3.bf16.msra.mxu0 %v4248_v62  ;;  %v467_v62 = vld [vmem:[%s5489_s14 + $0x4b8] sm:$0xff]  ;;  %v4344_v40 = vpack.c.bf16 %v487_v33, %v486_v31  ;;  %v489_v48 = vld [vmem:[%s5489_s14 + $0x568] sm:$0xff]  ;;  %v474_v49 = vld [vmem:[%s5489_s14 + $0x4f0] sm:$0xff] }
  0xcc   : > { %4281 = vmatpush3.bf16.msra.mxu1 %v4280_v63  ;;  %4251 = vmatprep.subr.bf16.mxu0 %v4250_v0  ;;  %v498_v63 = vld [vmem:[%s5489_s14 + $0x5b0] sm:$0xff]  ;;  %v499_v0 = vld [vmem:[%s5489_s14 + $0x5b8] sm:$0xff]  ;;  %v4318_v56 = vpack.c.bf16 %v475_v50, %v474_v49  ;;  %v509_v6 = vld [vmem:[%s5489_s14 + $0x608] sm:$0xff] }
  0xcd   : > { %4283 = vmatprep.subr.bf16.mxu1 %v4282_v4  ;;  %v450_v4 = vld [vmem:[%s5489_s14 + $0x430] sm:$0xff]  ;;  %v4334_v7 = vpack.c.bf16 %v499_v0, %v498_v63  ;;  %v459_v58 = vld [vmem:[%s5489_s14 + $0x478] sm:$0xff]  ;;  %v556_v63 = vld [vmem:[%s5489_s14 + $0x780] sm:$0xff] }
  0xce   : > { %v4304_v13 = vpack.c.bf16 %v451_v5, %v450_v4  ;;  %v506_v51 = vld [vmem:[%s5489_s14 + $0x5f0] sm:$0xff]  ;;  %v491_v61 = vld [vmem:[%s5489_s14 + $0x578] sm:$0xff]  ;;  %v557_v0 = vld [vmem:[%s5489_s14 + $0x788] sm:$0xff] }
  0xcf   : > { %4253 = vmatpush3.bf16.msra.mxu0 %v4252_v10  ;;  %v469_v10 = vld [vmem:[%s5489_s14 + $0x4c8] sm:$0xff]  ;;  %v458_v57 = vld [vmem:[%s5489_s14 + $0x470] sm:$0xff]  ;;  %v508_v5 = vld [vmem:[%s5489_s14 + $0x600] sm:$0xff]  ;;  %v4386_v8 = vpack.c.bf16 %v557_v0, %v556_v63 }
  0xd0   : > { %4285 = vmatpush3.bf16.msra.mxu1 %v4284_v11  ;;  %4255 = vmatprep.subr.bf16.mxu0 %v4254_v12  ;;  %v500_v11 = vld [vmem:[%s5489_s14 + $0x5c0] sm:$0xff]  ;;  %v501_v12 = vld [vmem:[%s5489_s14 + $0x5c8] sm:$0xff]  ;;  %v4306_v16 = vpack.c.bf16 %v469_v10, %v468_v9  ;;  %v526_v10 = vld [vmem:[%s5489_s14 + $0x690] sm:$0xff] }
  0xd1   : > { %4287 = vmatprep.subr.bf16.mxu1 %v4286_v17  ;;  %v452_v17 = vld [vmem:[%s5489_s14 + $0x440] sm:$0xff]  ;;  %v4338_v20 = vpack.c.bf16 %v501_v12, %v500_v11  ;;  %v541_v9 = vld [vmem:[%s5489_s14 + $0x708] sm:$0xff]  ;;  %v527_v11 = vld [vmem:[%s5489_s14 + $0x698] sm:$0xff] }
  0xd2   : > { %v4358_v19 = vpack.c.bf16 %v527_v11, %v526_v10  ;;  %v511_v21 = vld [vmem:[%s5489_s14 + $0x618] sm:$0xff]  ;;  %v546_v49 = vld [vmem:[%s5489_s14 + $0x730] sm:$0xff]  ;;  %v536_v11 = vld [vmem:[%s5489_s14 + $0x6e0] sm:$0xff] }
  0xd3   : > { %4257 = vmatpush3.bf16.msra.mxu0 %v4256_v23  ;;  %v471_v23 = vld [vmem:[%s5489_s14 + $0x4d8] sm:$0xff]  ;;  %v534_v63 = vld [vmem:[%s5489_s14 + $0x6d0] sm:$0xff] }
  0xd4   : > { %4289 = vmatpush3.bf16.msra.mxu1 %v4288_v25  ;;  %4291 = vmatprep.subr.bf16.mxu0 %v4290_v26  ;;  %v503_v25 = vld [vmem:[%s5489_s14 + $0x5d8] sm:$0xff]  ;;  %v4308_v26 = vpack.c.bf16 %v453_v18, %v452_v17  ;;  %v4310_v28 = vpack.c.bf16 %v471_v23, %v470_v22  ;;  %v4356_v17 = vpack.c.bf16 %v509_v6, %v508_v5  ;;  %v542_v22 = vld [vmem:[%s5489_s14 + $0x710] sm:$0xff] }
  0xd5   : > { %4323 = vmatprep.subr.bf16.mxu1 %v4322_v30  ;;  %v455_v30 = vld [vmem:[%s5489_s14 + $0x458] sm:$0xff]  ;;  %v4342_v32 = vpack.c.bf16 %v503_v25, %v502_v24  ;;  %v528_v25 = vld [vmem:[%s5489_s14 + $0x6a0] sm:$0xff]  ;;  %v518_v6 = vld [vmem:[%s5489_s14 + $0x650] sm:$0xff] }
  0xd6   : > { %1553 = vmatmul.mubr.f32.vlgmr.msra.gmra.mrb[2].mxu0 %v5612_v34  ;;  %v4328_v34 = vpack.c.bf16 %v479_v47, %v478_v42  ;;  %v456_v42 = vld [vmem:[%s5489_s14 + $0x460] sm:$0xff]  ;;  %v543_v24 = vld [vmem:[%s5489_s14 + $0x718] sm:$0xff] }
  0xd7   : > { %4293 = vmatpush3.bf16.msra.mxu0 %v4292_v36  ;;  %1623 = vmatmul.mubr.f32.vlgmr.msra.gmra.mrb[2].mxu1 %v5623_v46  ;;  %v466_v46 = vld [vmem:[%s5489_s14 + $0x4b0] sm:$0xff]  ;;  %v473_v36 = vld [vmem:[%s5489_s14 + $0x4e8] sm:$0xff]  ;;  %v535_v0 = vld [vmem:[%s5489_s14 + $0x6d8] sm:$0xff] }
  0xd8   : > { %4325 = vmatpush3.bf16.msra.mxu1 %v4324_v37  ;;  %4295 = vmatprep.subr.bf16.mxu0 %v4294_v39  ;;  %v4302_v3 = vpack.c.bf16 %v467_v62, %v466_v46  ;;  %v504_v37 = vld [vmem:[%s5489_s14 + $0x5e0] sm:$0xff]  ;;  %v4312_v39 = vpack.c.bf16 %v455_v30, %v454_v29  ;;  %v4314_v41 = vpack.c.bf16 %v473_v36, %v472_v35  ;;  %v525_v62 = vld [vmem:[%s5489_s14 + $0x688] sm:$0xff]  ;;  %v551_v10 = vld [vmem:[%s5489_s14 + $0x758] sm:$0xff] }
  0xd9   : > { %4327 = vmatprep.subr.bf16.mxu1 %v4326_v45  ;;  %1692 = vmatprep.mubr.f32.mxu0 %v1145_v52  ;;  %v488_v45 = vld [vmem:[%s5489_s14 + $0x560] sm:$0xff]  ;;  %v4346_v47 = vpack.c.bf16 %v505_v38, %v504_v37  ;;  %v507_v52 = vld [vmem:[%s5489_s14 + $0x5f8] sm:$0xff]  ;;  %v561_v29 = vld [vmem:[%s5489_s14 + $0x7a8] sm:$0xff]  ;;  %v4374_v5 = vpack.c.bf16 %v535_v0, %v534_v63 }
  0xda   : > { %1762 = vmatprep.mubr.f32.mxu1 %v1146_v59  ;;  %v490_v59 = vld [vmem:[%s5489_s14 + $0x570] sm:$0xff]  ;;  %v524_v46 = vld [vmem:[%s5489_s14 + $0x680] sm:$0xff]  ;;  %v545_v38 = vld [vmem:[%s5489_s14 + $0x728] sm:$0xff] }
  0xdb   : > { %4297 = vmatpush3.bf16.msra.mxu0 %v4296_v54  ;;  %v4316_v54 = vpack.c.bf16 %v457_v44, %v456_v42  ;;  %v4354_v4 = vpack.c.bf16 %v525_v62, %v524_v46  ;;  %v512_v35 = vld [vmem:[%s5489_s14 + $0x620] sm:$0xff]  ;;  %v549_v62 = vld [vmem:[%s5489_s14 + $0x748] sm:$0xff]  ;;  %v606_v63 = vld [vmem:[%s5489_s14 + $0x910] sm:$0xff] }
  0xdc   : > { %4329 = vmatpush3.bf16.msra.mxu1 %v4328_v34  ;;  %4299 = vmatprep.subr.bf16.mxu0 %v4298_v55  ;;  %v307_v34 = vld [vmem:[%s5482_s15 + $0x18] sm:$0xff]  ;;  %v4348_v55 = vpack.c.bf16 %v489_v48, %v488_v45  ;;  %v544_v36 = vld [vmem:[%s5489_s14 + $0x720] sm:$0xff] }
  0xdd   : > { %4331 = vmatprep.subr.bf16.mxu1 %v4330_v60  ;;  %v4350_v60 = vpack.c.bf16 %v507_v52, %v506_v51  ;;  %v5738_v12 = vrot.slane %v307_v34, %v5555_v14  ;;  %v4396_v44 = vpack.c.bf16 %v545_v38, %v544_v36  ;;  %v515_v48 = vld [vmem:[%s5489_s14 + $0x638] sm:$0xff]  ;;  %v532_v52 = vld [vmem:[%s5489_s14 + $0x6c0] sm:$0xff]  ;;  %v554_v36 = vld [vmem:[%s5489_s14 + $0x770] sm:$0xff] }
  0xde   : > { %v547_v51 = vld [vmem:[%s5489_s14 + $0x738] sm:$0xff] }
  0xdf   : > { %4301 = vmatpush3.bf16.msra.mxu0 %v4300_v1  ;;  %v1147_v1 = vcombine.high %v307_v34, %v307_v34  ;;  %v564_v34 = vld [vmem:[%s5489_s14 + $0x7c0] sm:$0xff]  ;;  %v555_v38 = vld [vmem:[%s5489_s14 + $0x778] sm:$0xff] }
  0xe0   : > { %4333 = vmatpush3.bf16.msra.mxu1 %v4332_v2  ;;  %4303 = vmatprep.subr.bf16.mxu0 %v4302_v3  ;;  %v4320_v2 = vpack.c.bf16 %v459_v58, %v458_v57  ;;  %v4352_v3 = vpack.c.bf16 %v491_v61, %v490_v59  ;;  %v4400_v57 = vpack.c.bf16 %v547_v51, %v546_v49  ;;  %v516_v59 = vld [vmem:[%s5489_s14 + $0x640] sm:$0xff]  ;;  %v573_v49 = vld [vmem:[%s5489_s14 + $0x808] sm:$0xff] }
  0xe1   : > { %4335 = vmatprep.subr.bf16.mxu1 %v4334_v7  ;;  %v540_v7 = vld [vmem:[%s5489_s14 + $0x700] sm:$0xff] }
  0xe2   : > { %v4388_v18 = vpack.c.bf16 %v541_v9, %v540_v7  ;;  %v548_v61 = vld [vmem:[%s5489_s14 + $0x740] sm:$0xff]  ;;  %v519_v7 = vld [vmem:[%s5489_s14 + $0x658] sm:$0xff] }
  0xe3   : > { %4305 = vmatpush3.bf16.msra.mxu0 %v4304_v13  ;;  %v558_v13 = vld [vmem:[%s5489_s14 + $0x790] sm:$0xff] }
  0xe4   : > { %4337 = vmatpush3.bf16.msra.mxu1 %v4336_v15  ;;  %4307 = vmatprep.subr.bf16.mxu0 %v4306_v16  ;;  %v559_v15 = vld [vmem:[%s5489_s14 + $0x798] sm:$0xff]  ;;  %v5743_v16 = vrot.slane %v1147_v1, %v5555_v14  ;;  %v566_v1 = vld [vmem:[%s5489_s14 + $0x7d0] sm:$0xff] }
  0xe5   : > { %4339 = vmatprep.subr.bf16.mxu1 %v4338_v20  ;;  %v510_v20 = vld [vmem:[%s5489_s14 + $0x610] sm:$0xff]  ;;  %v4390_v23 = vpack.c.bf16 %v559_v15, %v558_v13  ;;  %v537_v13 = vld [vmem:[%s5489_s14 + $0x6e8] sm:$0xff]  ;;  %v568_v15 = vld [vmem:[%s5489_s14 + $0x7e0] sm:$0xff] }
  0xe6   : > { %v1163_v30 = vcombine.high %v5743_v16, %v5743_v16  ;;  %v4360_v31 = vpack.c.bf16 %v511_v21, %v510_v20  ;;  %v4378_v20 = vpack.c.bf16 %v537_v13, %v536_v11  ;;  %v520_v21 = vld [vmem:[%s5489_s14 + $0x660] sm:$0xff] }
  0xe7   : > { %4309 = vmatpush3.bf16.msra.mxu0 %v4308_v26  ;;  %v529_v26 = vld [vmem:[%s5489_s14 + $0x6a8] sm:$0xff]  ;;  %v576_v11 = vld [vmem:[%s5489_s14 + $0x820] sm:$0xff] }
  0xe8   : > { %4341 = vmatpush3.bf16.msra.mxu1 %v4340_v27  ;;  %4311 = vmatprep.subr.bf16.mxu0 %v4310_v28  ;;  %v1162_v27 = vcombine.high %v5738_v12, %v5738_v12  ;;  %v560_v28 = vld [vmem:[%s5489_s14 + $0x7a0] sm:$0xff]  ;;  %v4362_v33 = vpack.c.bf16 %v529_v26, %v528_v25  ;;  %v553_v25 = vld [vmem:[%s5489_s14 + $0x768] sm:$0xff]  ;;  %v538_v26 = vld [vmem:[%s5489_s14 + $0x6f0] sm:$0xff] }
  0xe9   : > { %4343 = vmatprep.subr.bf16.mxu1 %v4342_v32  ;;  %v4392_v32 = vpack.c.bf16 %v543_v24, %v542_v22  ;;  %v4394_v37 = vpack.c.bf16 %v561_v29, %v560_v28  ;;  %v521_v22 = vld [vmem:[%s5489_s14 + $0x668] sm:$0xff]  ;;  %v570_v28 = vld [vmem:[%s5489_s14 + $0x7f0] sm:$0xff]  ;;  %v571_v29 = vld [vmem:[%s5489_s14 + $0x7f8] sm:$0xff] }
  0xea   : > { %v608_v13 = vld [vmem:[%s5489_s14 + $0x920] sm:$0xff] }
  0xeb   : > { %4313 = vmatpush3.bf16.msra.mxu0 %v4312_v39  ;;  %v530_v39 = vld [vmem:[%s5489_s14 + $0x6b0] sm:$0xff] }
  0xec   : > { %4345 = vmatpush3.bf16.msra.mxu1 %v4344_v40  ;;  %4315 = vmatprep.subr.bf16.mxu0 %v4314_v41  ;;  %v531_v40 = vld [vmem:[%s5489_s14 + $0x6b8] sm:$0xff] }
  0xed   : > { %4347 = vmatprep.subr.bf16.mxu1 %v4346_v47  ;;  %v563_v41 = vld [vmem:[%s5489_s14 + $0x7b8] sm:$0xff]  ;;  %v4366_v45 = vpack.c.bf16 %v531_v40, %v530_v39  ;;  %v514_v47 = vld [vmem:[%s5489_s14 + $0x630] sm:$0xff]  ;;  %v588_v39 = vld [vmem:[%s5489_s14 + $0x880] sm:$0xff] }
  0xee   : > { %v589_v40 = vld [vmem:[%s5489_s14 + $0x888] sm:$0xff] }
  0xef   : > { %4317 = vmatpush3.bf16.msra.mxu0 %v4316_v54  ;;  %v533_v54 = vld [vmem:[%s5489_s14 + $0x6c8] sm:$0xff] }
  0xf0   : > { %4349 = vmatpush3.bf16.msra.mxu1 %v4348_v55  ;;  %4319 = vmatprep.subr.bf16.mxu0 %v4318_v56  ;;  %v565_v55 = vld [vmem:[%s5489_s14 + $0x7c8] sm:$0xff]  ;;  %v4368_v56 = vpack.c.bf16 %v515_v48, %v514_v47  ;;  %v4370_v58 = vpack.c.bf16 %v533_v54, %v532_v52  ;;  %v4418_v47 = vpack.c.bf16 %v589_v40, %v588_v39  ;;  %v572_v48 = vld [vmem:[%s5489_s14 + $0x800] sm:$0xff]  ;;  %v590_v54 = vld [vmem:[%s5489_s14 + $0x890] sm:$0xff] }
  0xf1   : > { %4351 = vmatprep.subr.bf16.mxu1 %v4350_v60  ;;  %v517_v60 = vld [vmem:[%s5489_s14 + $0x648] sm:$0xff]  ;;  %v4402_v46 = vpack.c.bf16 %v565_v55, %v564_v34  ;;  %v591_v34 = vld [vmem:[%s5489_s14 + $0x898] sm:$0xff] }
  0xf2   : > { %v605_v52 = vld [vmem:[%s5489_s14 + $0x908] sm:$0xff] }
  0xf3   : > { %4321 = vmatpush3.bf16.msra.mxu0 %v4320_v2  ;;  %v567_v2 = vld [vmem:[%s5489_s14 + $0x7d8] sm:$0xff]  ;;  %v613_v40 = vld [vmem:[%s5489_s14 + $0x948] sm:$0xff] }
  0xf4   : > { %4353 = vmatpush3.bf16.msra.mxu1 %v4352_v3  ;;  %4355 = vmatprep.subr.bf16.mxu0 %v4354_v4  ;;  %v4372_v3 = vpack.c.bf16 %v517_v60, %v516_v59  ;;  %v4404_v4 = vpack.c.bf16 %v549_v62, %v548_v61  ;;  %v4406_v9 = vpack.c.bf16 %v567_v2, %v566_v1  ;;  %v575_v62 = vld [vmem:[%s5489_s14 + $0x818] sm:$0xff]  ;;  %v592_v2 = vld [vmem:[%s5489_s14 + $0x8a0] sm:$0xff] }
  0xf5   : > { %4387 = vmatprep.subr.bf16.mxu1 %v4386_v8  ;;  %v550_v8 = vld [vmem:[%s5489_s14 + $0x750] sm:$0xff]  ;;  %v4420_v59 = vpack.c.bf16 %v573_v49, %v572_v48  ;;  %v4422_v61 = vpack.c.bf16 %v591_v34, %v590_v54  ;;  %v607_v1 = vld [vmem:[%s5489_s14 + $0x918] sm:$0xff]  ;;  %v600_v34 = vld [vmem:[%s5489_s14 + $0x8e0] sm:$0xff] }
  0xf6   : > { %1693 = vmatmul.mubr.f32.vlgmr.msra.gmra.mrb[4].mxu0 %v5666_v43  ;;  %v513_v43 = vld [vmem:[%s5489_s14 + $0x628] sm:$0xff]  ;;  %v582_v49 = vld [vmem:[%s5489_s14 + $0x850] sm:$0xff]  ;;  %v615_v54 = vld [vmem:[%s5489_s14 + $0x958] sm:$0xff] }
  0xf7   : > { %4357 = vmatpush3.bf16.msra.mxu0 %v4356_v17  ;;  %1763 = vmatmul.mubr.f32.vlgmr.msra.gmra.mrb[4].mxu1 %v5677_v53  ;;  %v562_v53 = vld [vmem:[%s5489_s14 + $0x7b0] sm:$0xff]  ;;  %v4364_v42 = vpack.c.bf16 %v513_v43, %v512_v35  ;;  %v569_v17 = vld [vmem:[%s5489_s14 + $0x7e8] sm:$0xff]  ;;  %v523_v43 = vld [vmem:[%s5489_s14 + $0x678] sm:$0xff] }
  0xf8   : > { %4389 = vmatpush3.bf16.msra.mxu1 %v4388_v18  ;;  %4359 = vmatprep.subr.bf16.mxu0 %v4358_v19  ;;  %v4398_v50 = vpack.c.bf16 %v563_v41, %v562_v53  ;;  %v4376_v18 = vpack.c.bf16 %v519_v7, %v518_v6  ;;  %v4408_v19 = vpack.c.bf16 %v551_v10, %v550_v8  ;;  %v522_v35 = vld [vmem:[%s5489_s14 + $0x670] sm:$0xff]  ;;  %v620_v53 = vld [vmem:[%s5489_s14 + $0x980] sm:$0xff]  ;;  %v621_v41 = vld [vmem:[%s5489_s14 + $0x988] sm:$0xff] }
  0xf9   : > { %4391 = vmatprep.subr.bf16.mxu1 %v4390_v23  ;;  %1832 = vmatprep.mubr.f32.mxu0 %v1162_v27  ;;  %v552_v23 = vld [vmem:[%s5489_s14 + $0x760] sm:$0xff]  ;;  %v4410_v24 = vpack.c.bf16 %v569_v17, %v568_v15  ;;  %v539_v27 = vld [vmem:[%s5489_s14 + $0x6f8] sm:$0xff]  ;;  %v4450_v51 = vpack.c.bf16 %v621_v41, %v620_v53  ;;  %v625_v6 = vld [vmem:[%s5489_s14 + $0x9a8] sm:$0xff] }
  0xfa   : > { %1902 = vmatprep.mubr.f32.mxu1 %v1163_v30  ;;  %v4380_v30 = vpack.c.bf16 %v521_v22, %v520_v21  ;;  %v609_v17 = vld [vmem:[%s5489_s14 + $0x928] sm:$0xff]  ;;  %v598_v53 = vld [vmem:[%s5489_s14 + $0x8d0] sm:$0xff]  ;;  %v599_v41 = vld [vmem:[%s5489_s14 + $0x8d8] sm:$0xff] }
  0xfb   : > { %4361 = vmatpush3.bf16.msra.mxu0 %v4360_v31  ;;  %v308_v31 = vld [vmem:[%s5482_s15 + $0x20] sm:$0xff]  ;;  %v4460_v22 = vpack.c.bf16 %v609_v17, %v608_v13  ;;  %v4438_v48 = vpack.c.bf16 %v599_v41, %v598_v53  ;;  %v618_v13 = vld [vmem:[%s5489_s14 + $0x970] sm:$0xff]  ;;  %v619_v17 = vld [vmem:[%s5489_s14 + $0x978] sm:$0xff] }
  0xfc   : > { %4393 = vmatpush3.bf16.msra.mxu1 %v4392_v32  ;;  %4363 = vmatprep.subr.bf16.mxu0 %v4362_v33  ;;  %v4412_v32 = vpack.c.bf16 %v553_v25, %v552_v23  ;;  %v4382_v33 = vpack.c.bf16 %v539_v27, %v538_v26  ;;  %v5815_v55 = vrot.slane %v308_v31, %v5555_v14  ;;  %v579_v25 = vld [vmem:[%s5489_s14 + $0x838] sm:$0xff]  ;;  %v610_v26 = vld [vmem:[%s5489_s14 + $0x930] sm:$0xff] }
  0xfd   : > { %4395 = vmatprep.subr.bf16.mxu1 %v4394_v37  ;;  %v4414_v37 = vpack.c.bf16 %v571_v29, %v570_v28  ;;  %v611_v28 = vld [vmem:[%s5489_s14 + $0x938] sm:$0xff]  ;;  %v596_v29 = vld [vmem:[%s5489_s14 + $0x8c0] sm:$0xff]  ;;  %v670_v53 = vld [vmem:[%s5489_s14 + $0xb10] sm:$0xff] }
  0xff   : > { %4365 = vmatpush3.bf16.msra.mxu0 %v4364_v42  ;;  %v1164_v42 = vcombine.high %v308_v31, %v308_v31  ;;  %v628_v31 = vld [vmem:[%s5489_s14 + $0x9c0] sm:$0xff] }
 0x100   : > { %4397 = vmatpush3.bf16.msra.mxu1 %v4396_v44  ;;  %4367 = vmatprep.subr.bf16.mxu0 %v4366_v45  ;;  %v4384_v44 = vpack.c.bf16 %v523_v43, %v522_v35  ;;  %v4416_v45 = vpack.c.bf16 %v555_v38, %v554_v36  ;;  %v4464_v35 = vpack.c.bf16 %v611_v28, %v610_v26  ;;  %v580_v36 = vld [vmem:[%s5489_s14 + $0x840] sm:$0xff]  ;;  %v637_v26 = vld [vmem:[%s5489_s14 + $0xa08] sm:$0xff] }
 0x101   : > { %4399 = vmatprep.subr.bf16.mxu1 %v4398_v50  ;;  %v604_v50 = vld [vmem:[%s5489_s14 + $0x900] sm:$0xff] }
 0x102   : > { %v4452_v60 = vpack.c.bf16 %v605_v52, %v604_v50  ;;  %v612_v38 = vld [vmem:[%s5489_s14 + $0x940] sm:$0xff]  ;;  %v583_v50 = vld [vmem:[%s5489_s14 + $0x858] sm:$0xff] }
 0x103   : > { %4369 = vmatpush3.bf16.msra.mxu0 %v4368_v56  ;;  %v622_v56 = vld [vmem:[%s5489_s14 + $0x990] sm:$0xff] }
 0x104   : > { %4401 = vmatpush3.bf16.msra.mxu1 %v4400_v57  ;;  %4371 = vmatprep.subr.bf16.mxu0 %v4370_v58  ;;  %v623_v57 = vld [vmem:[%s5489_s14 + $0x998] sm:$0xff]  ;;  %v5820_v58 = vrot.slane %v1164_v42, %v5555_v14  ;;  %v630_v42 = vld [vmem:[%s5489_s14 + $0x9d0] sm:$0xff] }
 0x105   : > { %4403 = vmatprep.subr.bf16.mxu1 %v4402_v46  ;;  %v574_v46 = vld [vmem:[%s5489_s14 + $0x810] sm:$0xff]  ;;  %v4454_v0 = vpack.c.bf16 %v623_v57, %v622_v56  ;;  %v601_v56 = vld [vmem:[%s5489_s14 + $0x8e8] sm:$0xff]  ;;  %v632_v57 = vld [vmem:[%s5489_s14 + $0x9e0] sm:$0xff] }
 0x106   : > { %v1180_v7 = vcombine.high %v5820_v58, %v5820_v58  ;;  %v4424_v8 = vpack.c.bf16 %v575_v62, %v574_v46  ;;  %v4442_v46 = vpack.c.bf16 %v601_v56, %v600_v34  ;;  %v584_v62 = vld [vmem:[%s5489_s14 + $0x860] sm:$0xff] }
 0x107   : > { %4373 = vmatpush3.bf16.msra.mxu0 %v4372_v3  ;;  %v593_v3 = vld [vmem:[%s5489_s14 + $0x8a8] sm:$0xff]  ;;  %v640_v34 = vld [vmem:[%s5489_s14 + $0xa20] sm:$0xff] }
 0x108   : > { %4405 = vmatpush3.bf16.msra.mxu1 %v4404_v4  ;;  %4375 = vmatprep.subr.bf16.mxu0 %v4374_v5  ;;  %v1179_v4 = vcombine.high %v5815_v55, %v5815_v55  ;;  %v624_v5 = vld [vmem:[%s5489_s14 + $0x9a0] sm:$0xff]  ;;  %v4426_v10 = vpack.c.bf16 %v593_v3, %v592_v2  ;;  %v617_v2 = vld [vmem:[%s5489_s14 + $0x968] sm:$0xff]  ;;  %v602_v3 = vld [vmem:[%s5489_s14 + $0x8f0] sm:$0xff] }
 0x109   : > { %4407 = vmatprep.subr.bf16.mxu1 %v4406_v9  ;;  %v4456_v9 = vpack.c.bf16 %v607_v1, %v606_v63  ;;  %v4458_v15 = vpack.c.bf16 %v625_v6, %v624_v5  ;;  %v585_v63 = vld [vmem:[%s5489_s14 + $0x868] sm:$0xff]  ;;  %v634_v5 = vld [vmem:[%s5489_s14 + $0x9f0] sm:$0xff]  ;;  %v635_v6 = vld [vmem:[%s5489_s14 + $0x9f8] sm:$0xff] }
 0x10a   : > { %v672_v56 = vld [vmem:[%s5489_s14 + $0xb20] sm:$0xff] }
 0x10b   : > { %4377 = vmatpush3.bf16.msra.mxu0 %v4376_v18  ;;  %v594_v18 = vld [vmem:[%s5489_s14 + $0x8b0] sm:$0xff] }
 0x10c   : > { %4409 = vmatpush3.bf16.msra.mxu1 %v4408_v19  ;;  %4379 = vmatprep.subr.bf16.mxu0 %v4378_v20  ;;  %v595_v19 = vld [vmem:[%s5489_s14 + $0x8b8] sm:$0xff] }
 0x10d   : > { %4411 = vmatprep.subr.bf16.mxu1 %v4410_v24  ;;  %v627_v20 = vld [vmem:[%s5489_s14 + $0x9b8] sm:$0xff]  ;;  %v4430_v23 = vpack.c.bf16 %v595_v19, %v594_v18  ;;  %v578_v24 = vld [vmem:[%s5489_s14 + $0x830] sm:$0xff]  ;;  %v652_v18 = vld [vmem:[%s5489_s14 + $0xa80] sm:$0xff] }
 0x10e   : > { %v653_v19 = vld [vmem:[%s5489_s14 + $0xa88] sm:$0xff] }
 0x10f   : > { %4381 = vmatpush3.bf16.msra.mxu0 %v4380_v30  ;;  %v597_v30 = vld [vmem:[%s5489_s14 + $0x8c8] sm:$0xff] }
 0x110   : > { %4413 = vmatpush3.bf16.msra.mxu1 %v4412_v32  ;;  %4383 = vmatprep.subr.bf16.mxu0 %v4382_v33  ;;  %v629_v32 = vld [vmem:[%s5489_s14 + $0x9c8] sm:$0xff]  ;;  %v4432_v33 = vpack.c.bf16 %v579_v25, %v578_v24  ;;  %v4434_v43 = vpack.c.bf16 %v597_v30, %v596_v29  ;;  %v4482_v24 = vpack.c.bf16 %v653_v19, %v652_v18  ;;  %v636_v25 = vld [vmem:[%s5489_s14 + $0xa00] sm:$0xff]  ;;  %v654_v30 = vld [vmem:[%s5489_s14 + $0xa90] sm:$0xff] }
 0x111   : > { %4415 = vmatprep.subr.bf16.mxu1 %v4414_v37  ;;  %v581_v37 = vld [vmem:[%s5489_s14 + $0x848] sm:$0xff]  ;;  %v4466_v39 = vpack.c.bf16 %v629_v32, %v628_v31  ;;  %v655_v31 = vld [vmem:[%s5489_s14 + $0xa98] sm:$0xff] }
 0x112   : > { %v669_v29 = vld [vmem:[%s5489_s14 + $0xb08] sm:$0xff] }
 0x113   : > { %4385 = vmatpush3.bf16.msra.mxu0 %v4384_v44  ;;  %v631_v44 = vld [vmem:[%s5489_s14 + $0x9d8] sm:$0xff]  ;;  %v677_v19 = vld [vmem:[%s5489_s14 + $0xb48] sm:$0xff] }
 0x114   : > { %4417 = vmatpush3.bf16.msra.mxu1 %v4416_v45  ;;  %4419 = vmatprep.subr.bf16.mxu0 %v4418_v47  ;;  %v4436_v45 = vpack.c.bf16 %v581_v37, %v580_v36  ;;  %v4468_v47 = vpack.c.bf16 %v613_v40, %v612_v38  ;;  %v4470_v52 = vpack.c.bf16 %v631_v44, %v630_v42  ;;  %v639_v40 = vld [vmem:[%s5489_s14 + $0xa18] sm:$0xff]  ;;  %v656_v44 = vld [vmem:[%s5489_s14 + $0xaa0] sm:$0xff] }
 0x115   : > { %4451 = vmatprep.subr.bf16.mxu1 %v4450_v51  ;;  %v614_v51 = vld [vmem:[%s5489_s14 + $0x950] sm:$0xff]  ;;  %v4484_v36 = vpack.c.bf16 %v637_v26, %v636_v25  ;;  %v4486_v38 = vpack.c.bf16 %v655_v31, %v654_v30  ;;  %v671_v42 = vld [vmem:[%s5489_s14 + $0xb18] sm:$0xff]  ;;  %v664_v31 = vld [vmem:[%s5489_s14 + $0xae0] sm:$0xff] }
 0x116   : > { %1833 = vmatmul.mubr.f32.vlgmr.msra.gmra.mrb[6].mxu0 %v5738_v12  ;;  %v577_v12 = vld [vmem:[%s5489_s14 + $0x828] sm:$0xff]  ;;  %v646_v26 = vld [vmem:[%s5489_s14 + $0xa50] sm:$0xff]  ;;  %v679_v30 = vld [vmem:[%s5489_s14 + $0xb58] sm:$0xff] }
 0x117   : > { %4421 = vmatpush3.bf16.msra.mxu0 %v4420_v59  ;;  %1903 = vmatmul.mubr.f32.vlgmr.msra.gmra.mrb[6].mxu1 %v5743_v16  ;;  %v626_v16 = vld [vmem:[%s5489_s14 + $0x9b0] sm:$0xff]  ;;  %v4428_v21 = vpack.c.bf16 %v577_v12, %v576_v11  ;;  %v633_v59 = vld [vmem:[%s5489_s14 + $0x9e8] sm:$0xff]  ;;  %v587_v12 = vld [vmem:[%s5489_s14 + $0x878] sm:$0xff] }
 0x118   : > { %4453 = vmatpush3.bf16.msra.mxu1 %v4452_v60  ;;  %4423 = vmatprep.subr.bf16.mxu0 %v4422_v61  ;;  %v4462_v27 = vpack.c.bf16 %v627_v20, %v626_v16  ;;  %v4440_v60 = vpack.c.bf16 %v583_v50, %v582_v49  ;;  %v4472_v61 = vpack.c.bf16 %v615_v54, %v614_v51  ;;  %v586_v11 = vld [vmem:[%s5489_s14 + $0x870] sm:$0xff]  ;;  %v684_v16 = vld [vmem:[%s5489_s14 + $0xb80] sm:$0xff]  ;;  %v685_v20 = vld [vmem:[%s5489_s14 + $0xb88] sm:$0xff] }
 0x119   : > { %4455 = vmatprep.subr.bf16.mxu1 %v4454_v0  ;;  %1972 = vmatprep.mubr.f32.mxu0 %v1179_v4  ;;  %v616_v0 = vld [vmem:[%s5489_s14 + $0x960] sm:$0xff]  ;;  %v4474_v1 = vpack.c.bf16 %v633_v59, %v632_v57  ;;  %v603_v4 = vld [vmem:[%s5489_s14 + $0x8f8] sm:$0xff]  ;;  %v4514_v28 = vpack.c.bf16 %v685_v20, %v684_v16  ;;  %v689_v49 = vld [vmem:[%s5489_s14 + $0xba8] sm:$0xff] }
 0x11a   : > { %2042 = vmatprep.mubr.f32.mxu1 %v1180_v7  ;;  %v4444_v7 = vpack.c.bf16 %v585_v63, %v584_v62  ;;  %v673_v59 = vld [vmem:[%s5489_s14 + $0xb28] sm:$0xff]  ;;  %v662_v16 = vld [vmem:[%s5489_s14 + $0xad0] sm:$0xff]  ;;  %v663_v20 = vld [vmem:[%s5489_s14 + $0xad8] sm:$0xff] }
 0x11b   : > { %4425 = vmatpush3.bf16.msra.mxu0 %v4424_v8  ;;  %v309_v8 = vld [vmem:[%s5482_s15 + $0x28] sm:$0xff]  ;;  %v4524_v63 = vpack.c.bf16 %v673_v59, %v672_v56  ;;  %v4502_v25 = vpack.c.bf16 %v663_v20, %v662_v16  ;;  %v682_v56 = vld [vmem:[%s5489_s14 + $0xb70] sm:$0xff]  ;;  %v683_v59 = vld [vmem:[%s5489_s14 + $0xb78] sm:$0xff] }
 0x11c   : > { %4457 = vmatpush3.bf16.msra.mxu1 %v4456_v9  ;;  %4427 = vmatprep.subr.bf16.mxu0 %v4426_v10  ;;  %v4476_v9 = vpack.c.bf16 %v617_v2, %v616_v0  ;;  %v4446_v10 = vpack.c.bf16 %v603_v4, %v602_v3  ;;  %v5892_v32 = vrot.slane %v309_v8, %v5555_v14  ;;  %v643_v2 = vld [vmem:[%s5489_s14 + $0xa38] sm:$0xff]  ;;  %v674_v3 = vld [vmem:[%s5489_s14 + $0xb30] sm:$0xff] }
 0x11d   : > { %4459 = vmatprep.subr.bf16.mxu1 %v4458_v15  ;;  %v4478_v15 = vpack.c.bf16 %v635_v6, %v634_v5  ;;  %v675_v5 = vld [vmem:[%s5489_s14 + $0xb38] sm:$0xff]  ;;  %v660_v6 = vld [vmem:[%s5489_s14 + $0xac0] sm:$0xff]  ;;  %v734_v16 = vld [vmem:[%s5489_s14 + $0xd10] sm:$0xff] }
 0x11f   : > { %4429 = vmatpush3.bf16.msra.mxu0 %v4428_v21  ;;  %v1181_v21 = vcombine.high %v309_v8, %v309_v8  ;;  %v692_v8 = vld [vmem:[%s5489_s14 + $0xbc0] sm:$0xff] }
 0x120   : > { %4461 = vmatpush3.bf16.msra.mxu1 %v4460_v22  ;;  %4431 = vmatprep.subr.bf16.mxu0 %v4430_v23  ;;  %v4448_v22 = vpack.c.bf16 %v587_v12, %v586_v11  ;;  %v4480_v23 = vpack.c.bf16 %v619_v17, %v618_v13  ;;  %v4528_v11 = vpack.c.bf16 %v675_v5, %v674_v3  ;;  %v644_v13 = vld [vmem:[%s5489_s14 + $0xa40] sm:$0xff]  ;;  %v701_v3 = vld [vmem:[%s5489_s14 + $0xc08] sm:$0xff] }
 0x121   : > { %4463 = vmatprep.subr.bf16.mxu1 %v4462_v27  ;;  %v668_v27 = vld [vmem:[%s5489_s14 + $0xb00] sm:$0xff] }
 0x122   : > { %v4516_v37 = vpack.c.bf16 %v669_v29, %v668_v27  ;;  %v676_v17 = vld [vmem:[%s5489_s14 + $0xb40] sm:$0xff]  ;;  %v647_v27 = vld [vmem:[%s5489_s14 + $0xa58] sm:$0xff] }
 0x123   : > { %4433 = vmatpush3.bf16.msra.mxu0 %v4432_v33  ;;  %v686_v33 = vld [vmem:[%s5489_s14 + $0xb90] sm:$0xff] }
 0x124   : > { %4465 = vmatpush3.bf16.msra.mxu1 %v4464_v35  ;;  %4435 = vmatprep.subr.bf16.mxu0 %v4434_v43  ;;  %v687_v35 = vld [vmem:[%s5489_s14 + $0xb98] sm:$0xff]  ;;  %v5897_v43 = vrot.slane %v1181_v21, %v5555_v14  ;;  %v694_v21 = vld [vmem:[%s5489_s14 + $0xbd0] sm:$0xff] }
 0x125   : > { %4467 = vmatprep.subr.bf16.mxu1 %v4466_v39  ;;  %v638_v39 = vld [vmem:[%s5489_s14 + $0xa10] sm:$0xff]  ;;  %v4518_v41 = vpack.c.bf16 %v687_v35, %v686_v33  ;;  %v665_v33 = vld [vmem:[%s5489_s14 + $0xae8] sm:$0xff]  ;;  %v696_v35 = vld [vmem:[%s5489_s14 + $0xbe0] sm:$0xff] }
 0x126   : > { %v1197_v50 = vcombine.high %v5897_v43, %v5897_v43  ;;  %v4488_v51 = vpack.c.bf16 %v639_v40, %v638_v39  ;;  %v4506_v39 = vpack.c.bf16 %v665_v33, %v664_v31  ;;  %v648_v40 = vld [vmem:[%s5489_s14 + $0xa60] sm:$0xff] }
 0x127   : > { %4437 = vmatpush3.bf16.msra.mxu0 %v4436_v45  ;;  %v657_v45 = vld [vmem:[%s5489_s14 + $0xaa8] sm:$0xff]  ;;  %v704_v31 = vld [vmem:[%s5489_s14 + $0xc20] sm:$0xff] }
 0x128   : > { %4469 = vmatpush3.bf16.msra.mxu1 %v4468_v47  ;;  %4439 = vmatprep.subr.bf16.mxu0 %v4438_v48  ;;  %v1196_v47 = vcombine.high %v5892_v32, %v5892_v32  ;;  %v688_v48 = vld [vmem:[%s5489_s14 + $0xba0] sm:$0xff]  ;;  %v4490_v54 = vpack.c.bf16 %v657_v45, %v656_v44  ;;  %v681_v44 = vld [vmem:[%s5489_s14 + $0xb68] sm:$0xff]  ;;  %v666_v45 = vld [vmem:[%s5489_s14 + $0xaf0] sm:$0xff] }
 0x129   : > { %4471 = vmatprep.subr.bf16.mxu1 %v4470_v52  ;;  %v4520_v52 = vpack.c.bf16 %v671_v42, %v670_v53  ;;  %v4522_v57 = vpack.c.bf16 %v689_v49, %v688_v48  ;;  %v649_v53 = vld [vmem:[%s5489_s14 + $0xa68] sm:$0xff]  ;;  %v698_v48 = vld [vmem:[%s5489_s14 + $0xbf0] sm:$0xff]  ;;  %v699_v49 = vld [vmem:[%s5489_s14 + $0xbf8] sm:$0xff] }
 0x12a   : > { %v736_v33 = vld [vmem:[%s5489_s14 + $0xd20] sm:$0xff] }
 0x12b   : > { %4441 = vmatpush3.bf16.msra.mxu0 %v4440_v60  ;;  %v658_v60 = vld [vmem:[%s5489_s14 + $0xab0] sm:$0xff] }
 0x12c   : > { %4473 = vmatpush3.bf16.msra.mxu1 %v4472_v61  ;;  %4443 = vmatprep.subr.bf16.mxu0 %v4442_v46  ;;  %v659_v61 = vld [vmem:[%s5489_s14 + $0xab8] sm:$0xff] }
 0x12d   : > { %4475 = vmatprep.subr.bf16.mxu1 %v4474_v1  ;;  %v691_v46 = vld [vmem:[%s5489_s14 + $0xbb8] sm:$0xff]  ;;  %v4494_v0 = vpack.c.bf16 %v659_v61, %v658_v60  ;;  %v642_v1 = vld [vmem:[%s5489_s14 + $0xa30] sm:$0xff]  ;;  %v716_v60 = vld [vmem:[%s5489_s14 + $0xc80] sm:$0xff] }
 0x12e   : > { %v717_v61 = vld [vmem:[%s5489_s14 + $0xc88] sm:$0xff] }
 0x12f   : > { %4445 = vmatpush3.bf16.msra.mxu0 %v4444_v7  ;;  %v661_v7 = vld [vmem:[%s5489_s14 + $0xac8] sm:$0xff] }
 0x130   : > { %4477 = vmatpush3.bf16.msra.mxu1 %v4476_v9  ;;  %4447 = vmatprep.subr.bf16.mxu0 %v4446_v10  ;;  %v693_v9 = vld [vmem:[%s5489_s14 + $0xbc8] sm:$0xff]  ;;  %v4496_v10 = vpack.c.bf16 %v643_v2, %v642_v1  ;;  %v4498_v12 = vpack.c.bf16 %v661_v7, %v660_v6  ;;  %v4546_v1 = vpack.c.bf16 %v717_v61, %v716_v60  ;;  %v700_v2 = vld [vmem:[%s5489_s14 + $0xc00] sm:$0xff]  ;;  %v718_v7 = vld [vmem:[%s5489_s14 + $0xc90] sm:$0xff] }
 0x131   : > { %4479 = vmatprep.subr.bf16.mxu1 %v4478_v15  ;;  %v645_v15 = vld [vmem:[%s5489_s14 + $0xa48] sm:$0xff]  ;;  %v4530_v18 = vpack.c.bf16 %v693_v9, %v692_v8  ;;  %v719_v8 = vld [vmem:[%s5489_s14 + $0xc98] sm:$0xff] }
 0x132   : > { %v733_v6 = vld [vmem:[%s5489_s14 + $0xd08] sm:$0xff] }
 0x133   : > { %4449 = vmatpush3.bf16.msra.mxu0 %v4448_v22  ;;  %v695_v22 = vld [vmem:[%s5489_s14 + $0xbd8] sm:$0xff]  ;;  %v741_v61 = vld [vmem:[%s5489_s14 + $0xd48] sm:$0xff] }
 0x134   : > { %4481 = vmatpush3.bf16.msra.mxu1 %v4480_v23  ;;  %4483 = vmatprep.subr.bf16.mxu0 %v4482_v24  ;;  %v4500_v23 = vpack.c.bf16 %v645_v15, %v644_v13  ;;  %v4532_v24 = vpack.c.bf16 %v677_v19, %v676_v17  ;;  %v4534_v29 = vpack.c.bf16 %v695_v22, %v694_v21  ;;  %v703_v19 = vld [vmem:[%s5489_s14 + $0xc18] sm:$0xff]  ;;  %v720_v22 = vld [vmem:[%s5489_s14 + $0xca0] sm:$0xff] }
 0x135   : > { %4515 = vmatprep.subr.bf16.mxu1 %v4514_v28  ;;  %v678_v28 = vld [vmem:[%s5489_s14 + $0xb50] sm:$0xff]  ;;  %v4548_v13 = vpack.c.bf16 %v701_v3, %v700_v2  ;;  %v4550_v17 = vpack.c.bf16 %v719_v8, %v718_v7  ;;  %v735_v21 = vld [vmem:[%s5489_s14 + $0xd18] sm:$0xff]  ;;  %v728_v8 = vld [vmem:[%s5489_s14 + $0xce0] sm:$0xff] }
 0x136   : > { %1973 = vmatmul.mubr.f32.vlgmr.msra.gmra.mrb[8].mxu0 %v5815_v55  ;;  %v641_v55 = vld [vmem:[%s5489_s14 + $0xa28] sm:$0xff]  ;;  %v710_v3 = vld [vmem:[%s5489_s14 + $0xc50] sm:$0xff]  ;;  %v743_v7 = vld [vmem:[%s5489_s14 + $0xd58] sm:$0xff] }
 0x137   : > { %4485 = vmatpush3.bf16.msra.mxu0 %v4484_v36  ;;  %2043 = vmatmul.mubr.f32.vlgmr.msra.gmra.mrb[8].mxu1 %v5820_v58  ;;  %v690_v58 = vld [vmem:[%s5489_s14 + $0xbb0] sm:$0xff]  ;;  %v4492_v62 = vpack.c.bf16 %v641_v55, %v640_v34  ;;  %v697_v36 = vld [vmem:[%s5489_s14 + $0xbe8] sm:$0xff]  ;;  %v651_v55 = vld [vmem:[%s5489_s14 + $0xa78] sm:$0xff] }
 0x138   : > { %4517 = vmatpush3.bf16.msra.mxu1 %v4516_v37  ;;  %4487 = vmatprep.subr.bf16.mxu0 %v4486_v38  ;;  %v4526_v4 = vpack.c.bf16 %v691_v46, %v690_v58  ;;  %v4504_v37 = vpack.c.bf16 %v647_v27, %v646_v26  ;;  %v4536_v38 = vpack.c.bf16 %v679_v30, %v678_v28  ;;  %v650_v34 = vld [vmem:[%s5489_s14 + $0xa70] sm:$0xff]  ;;  %v748_v58 = vld [vmem:[%s5489_s14 + $0xd80] sm:$0xff]  ;;  %v749_v46 = vld [vmem:[%s5489_s14 + $0xd88] sm:$0xff] }
 0x139   : > { %4519 = vmatprep.subr.bf16.mxu1 %v4518_v41  ;;  %2112 = vmatprep.mubr.f32.mxu0 %v1196_v47  ;;  %v680_v41 = vld [vmem:[%s5489_s14 + $0xb60] sm:$0xff]  ;;  %v4538_v42 = vpack.c.bf16 %v697_v36, %v696_v35  ;;  %v667_v47 = vld [vmem:[%s5489_s14 + $0xaf8] sm:$0xff]  ;;  %v4578_v5 = vpack.c.bf16 %v749_v46, %v748_v58  ;;  %v753_v26 = vld [vmem:[%s5489_s14 + $0xda8] sm:$0xff] }
 0x13a   : > { %2182 = vmatprep.mubr.f32.mxu1 %v1197_v50  ;;  %v4508_v50 = vpack.c.bf16 %v649_v53, %v648_v40  ;;  %v737_v36 = vld [vmem:[%s5489_s14 + $0xd28] sm:$0xff]  ;;  %v726_v58 = vld [vmem:[%s5489_s14 + $0xcd0] sm:$0xff]  ;;  %v727_v46 = vld [vmem:[%s5489_s14 + $0xcd8] sm:$0xff] }
 0x13b   : > { %4489 = vmatpush3.bf16.msra.mxu0 %v4488_v51  ;;  %v310_v51 = vld [vmem:[%s5482_s15 + $0x30] sm:$0xff]  ;;  %v4588_v53 = vpack.c.bf16 %v737_v36, %v736_v33  ;;  %v4566_v2 = vpack.c.bf16 %v727_v46, %v726_v58  ;;  %v747_v36 = vld [vmem:[%s5489_s14 + $0xd78] sm:$0xff] }
 0x13c   : > { %4521 = vmatpush3.bf16.msra.mxu1 %v4520_v52  ;;  %4491 = vmatprep.subr.bf16.mxu0 %v4490_v54  ;;  %v4540_v52 = vpack.c.bf16 %v681_v44, %v680_v41  ;;  %v4510_v54 = vpack.c.bf16 %v667_v47, %v666_v45  ;;  %v5969_v9 = vrot.slane %v310_v51, %v5555_v14  ;;  %v707_v44 = vld [vmem:[%s5489_s14 + $0xc38] sm:$0xff]  ;;  %v738_v45 = vld [vmem:[%s5489_s14 + $0xd30] sm:$0xff] }
 0x13d   : > { %4523 = vmatprep.subr.bf16.mxu1 %v4522_v57  ;;  %v4542_v57 = vpack.c.bf16 %v699_v49, %v698_v48  ;;  %v739_v48 = vld [vmem:[%s5489_s14 + $0xd38] sm:$0xff]  ;;  %v724_v49 = vld [vmem:[%s5489_s14 + $0xcc0] sm:$0xff]  ;;  %v746_v33 = vld [vmem:[%s5489_s14 + $0xd70] sm:$0xff] }
 0x13e   : > { %v798_v58 = vld [vmem:[%s5489_s14 + $0xf10] sm:$0xff] }
 0x13f   : > { %4493 = vmatpush3.bf16.msra.mxu0 %v4492_v62  ;;  %v1198_v62 = vcombine.high %v310_v51, %v310_v51  ;;  %v756_v51 = vld [vmem:[%s5489_s14 + $0xdc0] sm:$0xff] }
 0x140   : > { %4525 = vmatpush3.bf16.msra.mxu1 %v4524_v63  ;;  %4495 = vmatprep.subr.bf16.mxu0 %v4494_v0  ;;  %v4512_v63 = vpack.c.bf16 %v651_v55, %v650_v34  ;;  %v4544_v0 = vpack.c.bf16 %v683_v59, %v682_v56  ;;  %v4592_v34 = vpack.c.bf16 %v739_v48, %v738_v45  ;;  %v708_v56 = vld [vmem:[%s5489_s14 + $0xc40] sm:$0xff]  ;;  %v765_v45 = vld [vmem:[%s5489_s14 + $0xe08] sm:$0xff] }
 0x141   : > { %4527 = vmatprep.subr.bf16.mxu1 %v4526_v4  ;;  %v732_v4 = vld [vmem:[%s5489_s14 + $0xd00] sm:$0xff] }
 0x142   : > { %v4580_v15 = vpack.c.bf16 %v733_v6, %v732_v4  ;;  %v740_v59 = vld [vmem:[%s5489_s14 + $0xd40] sm:$0xff]  ;;  %v711_v4 = vld [vmem:[%s5489_s14 + $0xc58] sm:$0xff] }
 0x143   : > { %4497 = vmatpush3.bf16.msra.mxu0 %v4496_v10  ;;  %v750_v10 = vld [vmem:[%s5489_s14 + $0xd90] sm:$0xff] }
 0x144   : > { %4529 = vmatpush3.bf16.msra.mxu1 %v4528_v11  ;;  %4499 = vmatprep.subr.bf16.mxu0 %v4498_v12  ;;  %v751_v11 = vld [vmem:[%s5489_s14 + $0xd98] sm:$0xff]  ;;  %v5974_v12 = vrot.slane %v1198_v62, %v5555_v14  ;;  %v758_v62 = vld [vmem:[%s5489_s14 + $0xdd0] sm:$0xff] }
 0x145   : > { %4531 = vmatprep.subr.bf16.mxu1 %v4530_v18  ;;  %v702_v18 = vld [vmem:[%s5489_s14 + $0xc10] sm:$0xff]  ;;  %v4582_v20 = vpack.c.bf16 %v751_v11, %v750_v10  ;;  %v729_v10 = vld [vmem:[%s5489_s14 + $0xce8] sm:$0xff]  ;;  %v760_v11 = vld [vmem:[%s5489_s14 + $0xde0] sm:$0xff] }
 0x146   : > { %v1214_v27 = vcombine.high %v5974_v12, %v5974_v12  ;;  %v4552_v28 = vpack.c.bf16 %v703_v19, %v702_v18  ;;  %v4570_v18 = vpack.c.bf16 %v729_v10, %v728_v8  ;;  %v712_v19 = vld [vmem:[%s5489_s14 + $0xc60] sm:$0xff] }
 0x147   : > { %4501 = vmatpush3.bf16.msra.mxu0 %v4500_v23  ;;  %v721_v23 = vld [vmem:[%s5489_s14 + $0xca8] sm:$0xff]  ;;  %v768_v8 = vld [vmem:[%s5489_s14 + $0xe20] sm:$0xff] }
 0x148   : > { %4533 = vmatpush3.bf16.msra.mxu1 %v4532_v24  ;;  %4503 = vmatprep.subr.bf16.mxu0 %v4502_v25  ;;  %v1213_v24 = vcombine.high %v5969_v9, %v5969_v9  ;;  %v752_v25 = vld [vmem:[%s5489_s14 + $0xda0] sm:$0xff]  ;;  %v4554_v30 = vpack.c.bf16 %v721_v23, %v720_v22  ;;  %v745_v22 = vld [vmem:[%s5489_s14 + $0xd68] sm:$0xff]  ;;  %v730_v23 = vld [vmem:[%s5489_s14 + $0xcf0] sm:$0xff] }
 0x149   : > { %4535 = vmatprep.subr.bf16.mxu1 %v4534_v29  ;;  %v4584_v29 = vpack.c.bf16 %v735_v21, %v734_v16  ;;  %v4586_v35 = vpack.c.bf16 %v753_v26, %v752_v25  ;;  %v713_v16 = vld [vmem:[%s5489_s14 + $0xc68] sm:$0xff]  ;;  %v762_v25 = vld [vmem:[%s5489_s14 + $0xdf0] sm:$0xff]  ;;  %v763_v26 = vld [vmem:[%s5489_s14 + $0xdf8] sm:$0xff] }
 0x14a   : > { %v800_v10 = vld [vmem:[%s5489_s14 + $0xf20] sm:$0xff] }
 0x14b   : > { %4505 = vmatpush3.bf16.msra.mxu0 %v4504_v37  ;;  %v722_v37 = vld [vmem:[%s5489_s14 + $0xcb0] sm:$0xff] }
 0x14c   : > { %4537 = vmatpush3.bf16.msra.mxu1 %v4536_v38  ;;  %4507 = vmatprep.subr.bf16.mxu0 %v4506_v39  ;;  %v723_v38 = vld [vmem:[%s5489_s14 + $0xcb8] sm:$0xff] }
 0x14d   : > { %4539 = vmatprep.subr.bf16.mxu1 %v4538_v42  ;;  %v755_v39 = vld [vmem:[%s5489_s14 + $0xdb8] sm:$0xff]  ;;  %v4558_v41 = vpack.c.bf16 %v723_v38, %v722_v37  ;;  %v706_v42 = vld [vmem:[%s5489_s14 + $0xc30] sm:$0xff]  ;;  %v780_v37 = vld [vmem:[%s5489_s14 + $0xe80] sm:$0xff] }
 0x14e   : > { %v781_v38 = vld [vmem:[%s5489_s14 + $0xe88] sm:$0xff] }
 0x14f   : > { %4509 = vmatpush3.bf16.msra.mxu0 %v4508_v50  ;;  %v725_v50 = vld [vmem:[%s5489_s14 + $0xcc8] sm:$0xff] }
 0x150   : > { %4541 = vmatpush3.bf16.msra.mxu1 %v4540_v52  ;;  %4511 = vmatprep.subr.bf16.mxu0 %v4510_v54  ;;  %v757_v52 = vld [vmem:[%s5489_s14 + $0xdc8] sm:$0xff]  ;;  %v4560_v54 = vpack.c.bf16 %v707_v44, %v706_v42  ;;  %v4562_v55 = vpack.c.bf16 %v725_v50, %v724_v49  ;;  %v4610_v42 = vpack.c.bf16 %v781_v38, %v780_v37  ;;  %v764_v44 = vld [vmem:[%s5489_s14 + $0xe00] sm:$0xff]  ;;  %v782_v50 = vld [vmem:[%s5489_s14 + $0xe90] sm:$0xff] }
 0x151   : > { %4543 = vmatprep.subr.bf16.mxu1 %v4542_v57  ;;  %v709_v57 = vld [vmem:[%s5489_s14 + $0xc48] sm:$0xff]  ;;  %v4594_v60 = vpack.c.bf16 %v757_v52, %v756_v51  ;;  %v783_v51 = vld [vmem:[%s5489_s14 + $0xe98] sm:$0xff] }
 0x152   : > { %v797_v49 = vld [vmem:[%s5489_s14 + $0xf08] sm:$0xff] }
 0x153   : > { %4513 = vmatpush3.bf16.msra.mxu0 %v4512_v63  ;;  %v759_v63 = vld [vmem:[%s5489_s14 + $0xdd8] sm:$0xff]  ;;  %v805_v38 = vld [vmem:[%s5489_s14 + $0xf48] sm:$0xff] }
 0x154   : > { %4545 = vmatpush3.bf16.msra.mxu1 %v4544_v0  ;;  %4547 = vmatprep.subr.bf16.mxu0 %v4546_v1  ;;  %v4564_v0 = vpack.c.bf16 %v709_v57, %v708_v56  ;;  %v4596_v1 = vpack.c.bf16 %v741_v61, %v740_v59  ;;  %v4598_v6 = vpack.c.bf16 %v759_v63, %v758_v62  ;;  %v767_v61 = vld [vmem:[%s5489_s14 + $0xe18] sm:$0xff]  ;;  %v784_v63 = vld [vmem:[%s5489_s14 + $0xea0] sm:$0xff] }
 0x155   : > { %4579 = vmatprep.subr.bf16.mxu1 %v4578_v5  ;;  %v742_v5 = vld [vmem:[%s5489_s14 + $0xd50] sm:$0xff]  ;;  %v4612_v56 = vpack.c.bf16 %v765_v45, %v764_v44  ;;  %v4614_v59 = vpack.c.bf16 %v783_v51, %v782_v50  ;;  %v799_v62 = vld [vmem:[%s5489_s14 + $0xf18] sm:$0xff]  ;;  %v792_v51 = vld [vmem:[%s5489_s14 + $0xee0] sm:$0xff] }
 0x156   : > { %2113 = vmatmul.mubr.f32.vlgmr.msra.gmra.mrb[10].mxu0 %v5892_v32  ;;  %v705_v32 = vld [vmem:[%s5489_s14 + $0xc28] sm:$0xff]  ;;  %v774_v45 = vld [vmem:[%s5489_s14 + $0xe50] sm:$0xff]  ;;  %v807_v50 = vld [vmem:[%s5489_s14 + $0xf58] sm:$0xff] }
 0x157   : > { %4549 = vmatpush3.bf16.msra.mxu0 %v4548_v13  ;;  %2183 = vmatmul.mubr.f32.vlgmr.msra.gmra.mrb[10].mxu1 %v5897_v43  ;;  %v754_v43 = vld [vmem:[%s5489_s14 + $0xdb0] sm:$0xff]  ;;  %v4556_v40 = vpack.c.bf16 %v705_v32, %v704_v31  ;;  %v761_v13 = vld [vmem:[%s5489_s14 + $0xde8] sm:$0xff]  ;;  %v715_v32 = vld [vmem:[%s5489_s14 + $0xc78] sm:$0xff] }
 0x158   : > { %4581 = vmatpush3.bf16.msra.mxu1 %v4580_v15  ;;  %4551 = vmatprep.subr.bf16.mxu0 %v4550_v17  ;;  %v4590_v47 = vpack.c.bf16 %v755_v39, %v754_v43  ;;  %v4568_v15 = vpack.c.bf16 %v711_v4, %v710_v3  ;;  %v4600_v17 = vpack.c.bf16 %v743_v7, %v742_v5  ;;  %v714_v31 = vld [vmem:[%s5489_s14 + $0xc70] sm:$0xff]  ;;  %v812_v43 = vld [vmem:[%s5489_s14 + $0xf80] sm:$0xff]  ;;  %v813_v39 = vld [vmem:[%s5489_s14 + $0xf88] sm:$0xff] }
 0x159   : > { %4583 = vmatprep.subr.bf16.mxu1 %v4582_v20  ;;  %2252 = vmatprep.mubr.f32.mxu0 %v1213_v24  ;;  %v744_v20 = vld [vmem:[%s5489_s14 + $0xd60] sm:$0xff]  ;;  %v4602_v21 = vpack.c.bf16 %v761_v13, %v760_v11  ;;  %v731_v24 = vld [vmem:[%s5489_s14 + $0xcf8] sm:$0xff]  ;;  %v4642_v48 = vpack.c.bf16 %v813_v39, %v812_v43  ;;  %v817_v3 = vld [vmem:[%s5489_s14 + $0xfa8] sm:$0xff] }
 0x15a   : > { %2322 = vmatprep.mubr.f32.mxu1 %v1214_v27  ;;  %v4572_v27 = vpack.c.bf16 %v713_v16, %v712_v19  ;;  %v801_v13 = vld [vmem:[%s5489_s14 + $0xf28] sm:$0xff]  ;;  %v790_v43 = vld [vmem:[%s5489_s14 + $0xed0] sm:$0xff]  ;;  %v791_v39 = vld [vmem:[%s5489_s14 + $0xed8] sm:$0xff] }
 0x15b   : > { %4553 = vmatpush3.bf16.msra.mxu0 %v4552_v28  ;;  %v311_v28 = vld [vmem:[%s5482_s15 + $0x38] sm:$0xff]  ;;  %v4652_v16 = vpack.c.bf16 %v801_v13, %v800_v10  ;;  %v4630_v44 = vpack.c.bf16 %v791_v39, %v790_v43  ;;  %v312_v10 = vld [vmem:[%s5482_s15 + $0x40] sm:$0xff] }
 0x15c   : > { %4585 = vmatpush3.bf16.msra.mxu1 %v4584_v29  ;;  %4555 = vmatprep.subr.bf16.mxu0 %v4554_v30  ;;  %v4604_v29 = vpack.c.bf16 %v745_v22, %v744_v20  ;;  %v4574_v30 = vpack.c.bf16 %v731_v24, %v730_v23  ;;  %v6046_v52 = vrot.slane %v311_v28, %v5555_v14  ;;  %v771_v22 = vld [vmem:[%s5489_s14 + $0xe38] sm:$0xff]  ;;  %v802_v23 = vld [vmem:[%s5489_s14 + $0xf30] sm:$0xff] }
 0x15d   : > { %4587 = vmatprep.subr.bf16.mxu1 %v4586_v35  ;;  %v4606_v35 = vpack.c.bf16 %v763_v26, %v762_v25  ;;  %v803_v25 = vld [vmem:[%s5489_s14 + $0xf38] sm:$0xff]  ;;  %v788_v26 = vld [vmem:[%s5489_s14 + $0xec0] sm:$0xff] }
 0x15e   : > { %v879_v43 = vld [vmem:[%s5489_s14 + $0x1198] sm:$0xff] }
 0x15f   : > { %4557 = vmatpush3.bf16.msra.mxu0 %v4556_v40  ;;  %v1215_v40 = vcombine.high %v311_v28, %v311_v28  ;;  %v820_v28 = vld [vmem:[%s5489_s14 + $0xfc0] sm:$0xff] }
 0x160   : > { %4589 = vmatpush3.bf16.msra.mxu1 %v4588_v53  ;;  %4559 = vmatprep.subr.bf16.mxu0 %v4558_v41  ;;  %v4576_v53 = vpack.c.bf16 %v715_v32, %v714_v31  ;;  %v4608_v41 = vpack.c.bf16 %v747_v36, %v746_v33  ;;  %v4656_v31 = vpack.c.bf16 %v803_v25, %v802_v23  ;;  %v772_v33 = vld [vmem:[%s5489_s14 + $0xe40] sm:$0xff] }
 0x161   : > { %4591 = vmatprep.subr.bf16.mxu1 %v4590_v47  ;;  %v796_v47 = vld [vmem:[%s5489_s14 + $0xf00] sm:$0xff]  ;;  %v1232_v25 = vcombine.high %v312_v10, %v312_v10 }
 0x162   : > { %v4644_v57 = vpack.c.bf16 %v797_v49, %v796_v47  ;;  %v804_v36 = vld [vmem:[%s5489_s14 + $0xf40] sm:$0xff]  ;;  %v775_v47 = vld [vmem:[%s5489_s14 + $0xe58] sm:$0xff] }
 0x163   : > { %4561 = vmatpush3.bf16.msra.mxu0 %v4560_v54  ;;  %v814_v54 = vld [vmem:[%s5489_s14 + $0xf90] sm:$0xff]  ;;  %v876_v23 = vld [vmem:[%s5489_s14 + $0x1180] sm:$0xff]  ;;  %v6130_v39 = vrot.slane %v1232_v25, %v5555_v14  ;;  %v855_v25 = vld [vmem:[%s5489_s14 + $0x10d8] sm:$0xff] }
 0x164   : > { %4593 = vmatpush3.bf16.msra.mxu1 %v4592_v34  ;;  %4563 = vmatprep.subr.bf16.mxu0 %v4562_v55  ;;  %v815_v34 = vld [vmem:[%s5489_s14 + $0xf98] sm:$0xff]  ;;  %v6051_v55 = vrot.slane %v1215_v40, %v5555_v14  ;;  %v822_v40 = vld [vmem:[%s5489_s14 + $0xfd0] sm:$0xff] }
 0x165   : > { %4595 = vmatprep.subr.bf16.mxu1 %v4594_v60  ;;  %v766_v60 = vld [vmem:[%s5489_s14 + $0xe10] sm:$0xff]  ;;  %v4646_v46 = vpack.c.bf16 %v815_v34, %v814_v54  ;;  %v793_v54 = vld [vmem:[%s5489_s14 + $0xee8] sm:$0xff]  ;;  %v824_v34 = vld [vmem:[%s5489_s14 + $0xfe0] sm:$0xff] }
 0x166   : > { %v1231_v4 = vcombine.high %v6051_v55, %v6051_v55  ;;  %v4616_v5 = vpack.c.bf16 %v767_v61, %v766_v60  ;;  %v4634_v60 = vpack.c.bf16 %v793_v54, %v792_v51  ;;  %v776_v61 = vld [vmem:[%s5489_s14 + $0xe60] sm:$0xff] }
 0x167   : > { %4565 = vmatpush3.bf16.msra.mxu0 %v4564_v0  ;;  %v785_v0 = vld [vmem:[%s5489_s14 + $0xea8] sm:$0xff]  ;;  %v880_v54 = vld [vmem:[%s5489_s14 + $0x11a0] sm:$0xff] }
 0x168   : > { %4597 = vmatpush3.bf16.msra.mxu1 %v4596_v1  ;;  %4567 = vmatprep.subr.bf16.mxu0 %v4566_v2  ;;  %v1230_v1 = vcombine.high %v6046_v52, %v6046_v52  ;;  %v816_v2 = vld [vmem:[%s5489_s14 + $0xfa0] sm:$0xff]  ;;  %v4618_v7 = vpack.c.bf16 %v785_v0, %v784_v63  ;;  %v809_v0 = vld [vmem:[%s5489_s14 + $0xf68] sm:$0xff] }
 0x169   : > { %4599 = vmatprep.subr.bf16.mxu1 %v4598_v6  ;;  %v4648_v6 = vpack.c.bf16 %v799_v62, %v798_v58  ;;  %v4650_v11 = vpack.c.bf16 %v817_v3, %v816_v2  ;;  %v777_v58 = vld [vmem:[%s5489_s14 + $0xe68] sm:$0xff]  ;;  %v795_v2 = vld [vmem:[%s5489_s14 + $0xef8] sm:$0xff] }
 0x16b   : > { %4569 = vmatpush3.bf16.msra.mxu0 %v4568_v15  ;;  %v786_v15 = vld [vmem:[%s5489_s14 + $0xeb0] sm:$0xff] }
 0x16c   : > { %4601 = vmatpush3.bf16.msra.mxu1 %v4600_v17  ;;  %4571 = vmatprep.subr.bf16.mxu0 %v4570_v18  ;;  %v787_v17 = vld [vmem:[%s5489_s14 + $0xeb8] sm:$0xff] }
 0x16d   : > { %4603 = vmatprep.subr.bf16.mxu1 %v4602_v21  ;;  %v819_v18 = vld [vmem:[%s5489_s14 + $0xfb8] sm:$0xff]  ;;  %v4622_v20 = vpack.c.bf16 %v787_v17, %v786_v15  ;;  %v770_v21 = vld [vmem:[%s5489_s14 + $0xe30] sm:$0xff] }
 0x16e   : > { %v778_v17 = vld [vmem:[%s5489_s14 + $0xe70] sm:$0xff] }
 0x16f   : > { %4573 = vmatpush3.bf16.msra.mxu0 %v4572_v27  ;;  %v789_v27 = vld [vmem:[%s5489_s14 + $0xec8] sm:$0xff] }
 0x170   : > { %4605 = vmatpush3.bf16.msra.mxu1 %v4604_v29  ;;  %4575 = vmatprep.subr.bf16.mxu0 %v4574_v30  ;;  %v821_v29 = vld [vmem:[%s5489_s14 + $0xfc8] sm:$0xff]  ;;  %v4624_v30 = vpack.c.bf16 %v771_v22, %v770_v21  ;;  %v4626_v32 = vpack.c.bf16 %v789_v27, %v788_v26 }
 0x171   : > { %4607 = vmatprep.subr.bf16.mxu1 %v4606_v35  ;;  %v773_v35 = vld [vmem:[%s5489_s14 + $0xe48] sm:$0xff]  ;;  %v4658_v37 = vpack.c.bf16 %v821_v29, %v820_v28  ;;  %v828_v29 = vld [vmem:[%s5489_s14 + $0x1000] sm:$0xff] }
 0x172   : > { %v845_v21 = vld [vmem:[%s5489_s14 + $0x1088] sm:$0xff] }
 0x173   : > { %4577 = vmatpush3.bf16.msra.mxu0 %v4576_v53  ;;  %v823_v53 = vld [vmem:[%s5489_s14 + $0xfd8] sm:$0xff] }
 0x174   : > { %4609 = vmatpush3.bf16.msra.mxu1 %v4608_v41  ;;  %4611 = vmatprep.subr.bf16.mxu0 %v4610_v42  ;;  %v4628_v41 = vpack.c.bf16 %v773_v35, %v772_v33  ;;  %v4660_v42 = vpack.c.bf16 %v805_v38, %v804_v36  ;;  %v4662_v49 = vpack.c.bf16 %v823_v53, %v822_v40  ;;  %v861_v33 = vld [vmem:[%s5489_s14 + $0x1108] sm:$0xff]  ;;  %v846_v35 = vld [vmem:[%s5489_s14 + $0x1090] sm:$0xff]  ;;  %v847_v36 = vld [vmem:[%s5489_s14 + $0x1098] sm:$0xff] }
 0x175   : > { %4643 = vmatprep.subr.bf16.mxu1 %v4642_v48  ;;  %v806_v48 = vld [vmem:[%s5489_s14 + $0xf50] sm:$0xff] }
 0x176   : > { %2253 = vmatmul.mubr.f32.vlgmr.msra.gmra.mrb[12].mxu0 %v5969_v9  ;;  %v769_v9 = vld [vmem:[%s5489_s14 + $0xe28] sm:$0xff]  ;;  %v878_v38 = vld [vmem:[%s5489_s14 + $0x1190] sm:$0xff] }
 0x177   : > { %4613 = vmatpush3.bf16.msra.mxu0 %v4612_v56  ;;  %2323 = vmatmul.mubr.f32.vlgmr.msra.gmra.mrb[12].mxu1 %v5974_v12  ;;  %v818_v12 = vld [vmem:[%s5489_s14 + $0xfb0] sm:$0xff]  ;;  %v4620_v19 = vpack.c.bf16 %v769_v9, %v768_v8  ;;  %v825_v56 = vld [vmem:[%s5489_s14 + $0xfe8] sm:$0xff]  ;;  %v4636_v9 = vpack.c.bf16 %v777_v58, %v776_v61  ;;  %v832_v61 = vld [vmem:[%s5489_s14 + $0x1020] sm:$0xff] }
 0x178   : > { %4645 = vmatpush3.bf16.msra.mxu1 %v4644_v57  ;;  %4615 = vmatprep.subr.bf16.mxu0 %v4614_v59  ;;  %v4654_v24 = vpack.c.bf16 %v819_v18, %v818_v12  ;;  %v4632_v57 = vpack.c.bf16 %v775_v47, %v774_v45  ;;  %v4664_v59 = vpack.c.bf16 %v807_v50, %v806_v48  ;;  %v779_v12 = vld [vmem:[%s5489_s14 + $0xe78] sm:$0xff]  ;;  %v810_v18 = vld [vmem:[%s5489_s14 + $0xf70] sm:$0xff]  ;;  %v849_v50 = vld [vmem:[%s5489_s14 + $0x10a8] sm:$0xff] }
 0x179   : > { %4647 = vmatprep.subr.bf16.mxu1 %v4646_v46  ;;  %2392 = vmatprep.mubr.f32.mxu0 %v1230_v1  ;;  %v808_v46 = vld [vmem:[%s5489_s14 + $0xf60] sm:$0xff]  ;;  %v4666_v63 = vpack.c.bf16 %v825_v56, %v824_v34  ;;  %v794_v1 = vld [vmem:[%s5489_s14 + $0xef0] sm:$0xff]  ;;  %v4640_v26 = vpack.c.bf16 %v779_v12, %v778_v17  ;;  %v4710_v47 = vpack.c.bf16 %v879_v43, %v878_v38  ;;  %v863_v48 = vld [vmem:[%s5489_s14 + $0x1118] sm:$0xff] }
 0x17a   : > { %2462 = vmatprep.mubr.f32.mxu1 %v1231_v4  ;;  %v4668_v13 = vpack.c.bf16 %v809_v0, %v808_v46  ;;  %v4638_v15 = vpack.c.bf16 %v795_v2, %v794_v1  ;;  %v862_v45 = vld [vmem:[%s5489_s14 + $0x1110] sm:$0xff]  ;;  %v881_v34 = vld [vmem:[%s5489_s14 + $0x11a8] sm:$0xff]  ;;  %v1248_v56 = vcombine.high %v6130_v39, %v6130_v39  ;;  %v864_v58 = vld [vmem:[%s5489_s14 + $0x1120] sm:$0xff] }
 0x17b   : > { %4617 = vmatpush3.bf16.msra.mxu0 %v4616_v5  ;;  %v826_v5 = vld [vmem:[%s5489_s14 + $0xff0] sm:$0xff]  ;;  %v4714_v46 = vpack.c.bf16 %v881_v34, %v880_v54  ;;  %v851_v0 = vld [vmem:[%s5489_s14 + $0x10b8] sm:$0xff]  ;;  %v856_v38 = vld [vmem:[%s5489_s14 + $0x10e0] sm:$0xff] }
 0x17c   : > { %4649 = vmatpush3.bf16.msra.mxu1 %v4648_v6  ;;  %4619 = vmatprep.subr.bf16.mxu0 %v4618_v7  ;;  %v827_v6 = vld [vmem:[%s5489_s14 + $0xff8] sm:$0xff]  ;;  %v857_v43 = vld [vmem:[%s5489_s14 + $0x10e8] sm:$0xff]  ;;  %v858_v54 = vld [vmem:[%s5489_s14 + $0x10f0] sm:$0xff] }
 0x17d   : > { %4651 = vmatprep.subr.bf16.mxu1 %v4650_v11  ;;  %v883_v1 = vld [vmem:[%s5489_s14 + $0x11b8] sm:$0xff] }
 0x17e   : > { %v859_v34 = vld [vmem:[%s5489_s14 + $0x10f8] sm:$0xff] }
 0x17f   : > { %4621 = vmatpush3.bf16.msra.mxu0 %v4620_v19  ;;  %v4670_v19 = vpack.c.bf16 %v827_v6, %v826_v5  ;;  %v834_v5 = vld [vmem:[%s5489_s14 + $0x1030] sm:$0xff]  ;;  %v835_v6 = vld [vmem:[%s5489_s14 + $0x1038] sm:$0xff] }
 0x180   : > { %4653 = vmatpush3.bf16.msra.mxu1 %v4652_v16  ;;  %4623 = vmatprep.subr.bf16.mxu0 %v4622_v20  ;;  %v811_v16 = vld [vmem:[%s5489_s14 + $0xf78] sm:$0xff]  ;;  %v844_v20 = vld [vmem:[%s5489_s14 + $0x1080] sm:$0xff]  ;;  %v4688_v17 = vpack.c.bf16 %v835_v6, %v834_v5 }
 0x181   : > { %4655 = vmatprep.subr.bf16.mxu1 %v4654_v24  ;;  %v877_v24 = vld [vmem:[%s5489_s14 + $0x1188] sm:$0xff]  ;;  %v4672_v27 = vpack.c.bf16 %v811_v16, %v810_v18  ;;  %v4674_v28 = vpack.c.bf16 %v845_v21, %v844_v20  ;;  %v868_v20 = vld [vmem:[%s5489_s14 + $0x1140] sm:$0xff]  ;;  %v875_v5 = vld [vmem:[%s5489_s14 + $0x1178] sm:$0xff] }
 0x182   : > { %v837_v16 = vld [vmem:[%s5489_s14 + $0x1048] sm:$0xff]  ;;  %v908_v6 = vld [vmem:[%s5489_s14 + $0x1280] sm:$0xff] }
 0x183   : > { %4625 = vmatpush3.bf16.msra.mxu0 %v4624_v30  ;;  %v829_v30 = vld [vmem:[%s5489_s14 + $0x1008] sm:$0xff] }
 0x184   : > { %4657 = vmatpush3.bf16.msra.mxu1 %v4656_v31  ;;  %4627 = vmatprep.subr.bf16.mxu0 %v4626_v32  ;;  %v860_v31 = vld [vmem:[%s5489_s14 + $0x1100] sm:$0xff]  ;;  %v4706_v32 = vpack.c.bf16 %v877_v24, %v876_v23  ;;  %v4676_v40 = vpack.c.bf16 %v829_v30, %v828_v29  ;;  %v869_v23 = vld [vmem:[%s5489_s14 + $0x1148] sm:$0xff]  ;;  %v854_v24 = vld [vmem:[%s5489_s14 + $0x10d0] sm:$0xff] }
 0x185   : > { %4659 = vmatprep.subr.bf16.mxu1 %v4658_v37  ;;  %v6125_v37 = vrot.slane %v312_v10, %v5555_v14  ;;  %v4708_v53 = vpack.c.bf16 %v861_v33, %v860_v31  ;;  %v852_v10 = vld [vmem:[%s5489_s14 + $0x10c0] sm:$0xff]  ;;  %v4724_v29 = vpack.c.bf16 %v869_v23, %v868_v20  ;;  %v4694_v30 = vpack.c.bf16 %v855_v25, %v854_v24  ;;  %v838_v31 = vld [vmem:[%s5489_s14 + $0x1050] sm:$0xff]  ;;  %v943_v25 = vld [vmem:[%s5489_s14 + $0x1398] sm:$0xff] }
 0x186   : > { %v870_v33 = vld [vmem:[%s5489_s14 + $0x1150] sm:$0xff] }
 0x187   : > { %4629 = vmatpush3.bf16.msra.mxu0 %v4628_v41  ;;  %v4678_v41 = vpack.c.bf16 %v847_v36, %v846_v35  ;;  %v1247_v51 = vcombine.high %v6125_v37, %v6125_v37  ;;  %v871_v36 = vld [vmem:[%s5489_s14 + $0x1158] sm:$0xff]  ;;  %v910_v20 = vld [vmem:[%s5489_s14 + $0x1290] sm:$0xff] }
 0x188   : > { %4661 = vmatpush3.bf16.msra.mxu1 %v4660_v42  ;;  %4631 = vmatprep.subr.bf16.mxu0 %v4630_v44  ;;  %v830_v42 = vld [vmem:[%s5489_s14 + $0x1010] sm:$0xff]  ;;  %v831_v44 = vld [vmem:[%s5489_s14 + $0x1018] sm:$0xff] }
 0x189   : > { %v3302_v62 = vpop.f32.mrb[0].mxu0  ;;  %4663 = vmatprep.subr.bf16.mxu1 %v4662_v49  ;;  %v848_v49 = vld [vmem:[%s5489_s14 + $0x10a0] sm:$0xff]  ;;  %v942_v24 = vld [vmem:[%s5489_s14 + $0x1390] sm:$0xff] }
 0x18a   : > { %v3337_v3 = vpop.f32.mrb[0].mxu1  ;;  %v3303_v4 = vpop.f32.mrb[1].mxu0 }
 0x18b   : > { %v3304_v7 = vadd.f32 %v3303_v4, %v3302_v62  ;;  %v3338_v8 = vpop.f32.mrb[1].mxu1  ;;  %4633 = vmatpush3.bf16.msra.mxu0 %v4632_v57  ;;  %v4680_v57 = vpack.c.bf16 %v831_v44, %v830_v42  ;;  %v865_v62 = vld [vmem:[%s5489_s14 + $0x1128] sm:$0xff]  ;;  %v4728_v42 = vpack.c.bf16 %v871_v36, %v870_v33  ;;  %v4698_v44 = vpack.c.bf16 %v857_v43, %v856_v38  ;;  %v912_v36 = vld [vmem:[%s5489_s14 + $0x12a0] sm:$0xff] }
 0x18c   : > { %v3339_v11 = vadd.f32 %v3338_v8, %v3337_v3  ;;  %4665 = vmatpush3.bf16.msra.mxu1 %v4664_v59  ;;  %4635 = vmatprep.subr.bf16.mxu0 %v4634_v60  ;;  %v4712_v59 = vpack.c.bf16 %v863_v48, %v862_v45  ;;  %v4682_v60 = vpack.c.bf16 %v849_v50, %v848_v49  ;;  %v840_v45 = vld [vmem:[%s5489_s14 + $0x1060] sm:$0xff]  ;;  %v913_v38 = vld [vmem:[%s5489_s14 + $0x12a8] sm:$0xff] }
 0x18d   : > { %4667 = vmatprep.subr.bf16.mxu1 %v4666_v63  ;;  %v850_v63 = vld [vmem:[%s5489_s14 + $0x10b0] sm:$0xff]  ;;  %v4716_v3 = vpack.c.bf16 %v865_v62, %v864_v58  ;;  %v872_v48 = vld [vmem:[%s5489_s14 + $0x1160] sm:$0xff]  ;;  %v4774_v33 = vpack.c.bf16 %v943_v25, %v942_v24  ;;  %v921_v25 = vld [vmem:[%s5489_s14 + $0x12e8] sm:$0xff] }
 0x18e   : > { %v6114_v22 = vadd.f32 %v3339_v11, %v3304_v7  ;;  %v4686_v4 = vpack.c.bf16 %v851_v0, %v850_v63  ;;  %v866_v7 = vld [vmem:[%s5489_s14 + $0x1130] sm:$0xff]  ;;  %v853_v11 = vld [vmem:[%s5489_s14 + $0x10c8] sm:$0xff]  ;;  %v4702_v0 = vpack.c.bf16 %v859_v34, %v858_v54  ;;  %v915_v54 = vld [vmem:[%s5489_s14 + $0x12b8] sm:$0xff] }
 0x18f   : > { %4637 = vmatpush3.bf16.msra.mxu0 %v4636_v9  ;;  %v867_v9 = vld [vmem:[%s5489_s14 + $0x1138] sm:$0xff]  ;;  %v4690_v18 = vpack.c.bf16 %v853_v11, %v852_v10  ;;  %v920_v24 = vld [vmem:[%s5489_s14 + $0x12e0] sm:$0xff] }
 0x190   : > { %4669 = vmatpush3.bf16.msra.mxu1 %v4668_v13  ;;  %4639 = vmatprep.subr.bf16.mxu0 %v4638_v15  ;;  %v884_v13 = vld [vmem:[%s5489_s14 + $0x11c0] sm:$0xff]  ;;  %v885_v15 = vld [vmem:[%s5489_s14 + $0x11c8] sm:$0xff]  ;;  %v4720_v12 = vpack.c.bf16 %v867_v9, %v866_v7  ;;  %v947_v34 = vld [vmem:[%s5489_s14 + $0x13b8] sm:$0xff] }
 0x191   : > { %4671 = vmatprep.subr.bf16.mxu1 %v4670_v19  ;;  %v836_v19 = vld [vmem:[%s5489_s14 + $0x1040] sm:$0xff]  ;;  %v4722_v21 = vpack.c.bf16 %v885_v15, %v884_v13  ;;  %v909_v7 = vld [vmem:[%s5489_s14 + $0x1288] sm:$0xff] }
 0x192   : > { %v941_v9 = vld [vmem:[%s5489_s14 + $0x1388] sm:$0xff]  ;;  %v4738_v15 = vpack.c.bf16 %v909_v7, %v908_v6  ;;  %v932_v6 = vld [vmem:[%s5489_s14 + $0x1340] sm:$0xff] }
 0x193   : > { %4641 = vmatpush3.bf16.msra.mxu0 %v4640_v26  ;;  %v886_v26 = vld [vmem:[%s5489_s14 + $0x11d0] sm:$0xff] }
 0x194   : > { %4673 = vmatpush3.bf16.msra.mxu1 %v4672_v27  ;;  %4675 = vmatprep.subr.bf16.mxu0 %v4674_v28  ;;  %v887_v27 = vld [vmem:[%s5489_s14 + $0x11d8] sm:$0xff]  ;;  %v4692_v28 = vpack.c.bf16 %v837_v16, %v836_v19  ;;  %v925_v16 = vld [vmem:[%s5489_s14 + $0x1308] sm:$0xff] }
 0x195   : > { %4707 = vmatprep.subr.bf16.mxu1 %v4706_v32  ;;  %v839_v32 = vld [vmem:[%s5489_s14 + $0x1058] sm:$0xff]  ;;  %v4726_v35 = vpack.c.bf16 %v887_v27, %v886_v26 }
 0x196   : > { %2393 = vmatmul.mubr.f32.vlgmr.msra.gmra.mrb[14].mxu0 %v6046_v52  ;;  %v833_v52 = vld [vmem:[%s5489_s14 + $0x1028] sm:$0xff] }
 0x197   : > { %4677 = vmatpush3.bf16.msra.mxu0 %v4676_v40  ;;  %2463 = vmatmul.mubr.f32.vlgmr.msra.gmra.mrb[14].mxu1 %v6051_v55  ;;  %v882_v55 = vld [vmem:[%s5489_s14 + $0x11b0] sm:$0xff]  ;;  %v4684_v2 = vpack.c.bf16 %v833_v52, %v832_v61  ;;  %v888_v40 = vld [vmem:[%s5489_s14 + $0x11e0] sm:$0xff] }
 0x198   : > { %4709 = vmatpush3.bf16.msra.mxu1 %v4708_v53  ;;  %4679 = vmatprep.subr.bf16.mxu0 %v4678_v41  ;;  %v4718_v8 = vpack.c.bf16 %v883_v1, %v882_v55  ;;  %v889_v53 = vld [vmem:[%s5489_s14 + $0x11e8] sm:$0xff]  ;;  %v4696_v41 = vpack.c.bf16 %v839_v32, %v838_v31  ;;  %v842_v55 = vld [vmem:[%s5489_s14 + $0x1070] sm:$0xff]  ;;  %v843_v1 = vld [vmem:[%s5489_s14 + $0x1078] sm:$0xff] }
 0x199   : > { %4711 = vmatprep.subr.bf16.mxu1 %v4710_v47  ;;  %2532 = vmatprep.mubr.f32.mxu0 %v1247_v51  ;;  %v841_v47 = vld [vmem:[%s5489_s14 + $0x1068] sm:$0xff]  ;;  %v4730_v50 = vpack.c.bf16 %v889_v53, %v888_v40  ;;  %v895_v31 = vld [vmem:[%s5489_s14 + $0x1218] sm:$0xff]  ;;  %v926_v32 = vld [vmem:[%s5489_s14 + $0x1310] sm:$0xff] }
 0x19a   : > { %2602 = vmatprep.mubr.f32.mxu1 %v1248_v56  ;;  %v873_v51 = vld [vmem:[%s5489_s14 + $0x1168] sm:$0xff]  ;;  %v4700_v58 = vpack.c.bf16 %v841_v47, %v840_v45  ;;  %v944_v40 = vld [vmem:[%s5489_s14 + $0x13a0] sm:$0xff]  ;;  %v4746_v45 = vpack.c.bf16 %v913_v38, %v912_v36 }
 0x19b   : > { %4681 = vmatpush3.bf16.msra.mxu0 %v4680_v57  ;;  %v4732_v63 = vpack.c.bf16 %v873_v51, %v872_v48  ;;  %v945_v53 = vld [vmem:[%s5489_s14 + $0x13a8] sm:$0xff]  ;;  %v896_v47 = vld [vmem:[%s5489_s14 + $0x1220] sm:$0xff]  ;;  %v914_v51 = vld [vmem:[%s5489_s14 + $0x12b0] sm:$0xff] }
 0x19c   : > { %4713 = vmatpush3.bf16.msra.mxu1 %v4712_v59  ;;  %4683 = vmatprep.subr.bf16.mxu0 %v4682_v60  ;;  %v890_v59 = vld [vmem:[%s5489_s14 + $0x11f0] sm:$0xff]  ;;  %v891_v60 = vld [vmem:[%s5489_s14 + $0x11f8] sm:$0xff]  ;;  %v928_v48 = vld [vmem:[%s5489_s14 + $0x1320] sm:$0xff] }
 0x19d   : > { %4715 = vmatprep.subr.bf16.mxu1 %v4714_v46  ;;  %v313_v46 = vld [vmem:[%s5482_s15 + $0x48] sm:$0xff] }
 0x19e   : > { %v1249_v10 = vcombine.high %v313_v46, %v313_v46  ;;  %v6205_v23 = vrot.slane %v313_v46, %v5555_v14  ;;  %v931_v46 = vld [vmem:[%s5489_s14 + $0x1338] sm:$0xff] }
 0x19f   : > { %4685 = vmatpush3.bf16.msra.mxu0 %v4684_v2  ;;  %v874_v2 = vld [vmem:[%s5489_s14 + $0x1170] sm:$0xff] }
 0x1a0   : > { %4717 = vmatpush3.bf16.msra.mxu1 %v4716_v3  ;;  %4687 = vmatprep.subr.bf16.mxu0 %v4686_v4  ;;  %v4734_v4 = vpack.c.bf16 %v891_v60, %v890_v59  ;;  %v4736_v13 = vpack.c.bf16 %v875_v5, %v874_v2  ;;  %v6210_v26 = vrot.slane %v1249_v10, %v5555_v14  ;;  %v898_v60 = vld [vmem:[%s5489_s14 + $0x1230] sm:$0xff]  ;;  %v901_v5 = vld [vmem:[%s5489_s14 + $0x1248] sm:$0xff]  ;;  %v919_v10 = vld [vmem:[%s5489_s14 + $0x12d8] sm:$0xff] }
 0x1a1   : > { %4719 = vmatprep.subr.bf16.mxu1 %v4718_v8  ;;  %v940_v8 = vld [vmem:[%s5489_s14 + $0x1380] sm:$0xff]  ;;  %v1264_v43 = vcombine.high %v6205_v23, %v6205_v23  ;;  %v4750_v59 = vpack.c.bf16 %v915_v54, %v914_v51 }
 0x1a2   : > { %v4770_v19 = vpack.c.bf16 %v941_v9, %v940_v8  ;;  %v933_v8 = vld [vmem:[%s5489_s14 + $0x1348] sm:$0xff]  ;;  %v918_v9 = vld [vmem:[%s5489_s14 + $0x12d0] sm:$0xff] }
 0x1a3   : > { %4689 = vmatpush3.bf16.msra.mxu0 %v4688_v17  ;;  %v892_v17 = vld [vmem:[%s5489_s14 + $0x1200] sm:$0xff] }
 0x1a4   : > { %4721 = vmatpush3.bf16.msra.mxu1 %v4720_v12  ;;  %4691 = vmatprep.subr.bf16.mxu0 %v4690_v18  ;;  %v893_v12 = vld [vmem:[%s5489_s14 + $0x1208] sm:$0xff]  ;;  %v924_v18 = vld [vmem:[%s5489_s14 + $0x1300] sm:$0xff] }
 0x1a5   : > { %4723 = vmatprep.subr.bf16.mxu1 %v4722_v21  ;;  %v911_v21 = vld [vmem:[%s5489_s14 + $0x1298] sm:$0xff]  ;;  %v4740_v27 = vpack.c.bf16 %v893_v12, %v892_v17  ;;  %v4788_v17 = vpack.c.bf16 %v933_v8, %v932_v6  ;;  %v4758_v12 = vpack.c.bf16 %v919_v10, %v918_v9  ;;  %v974_v6 = vld [vmem:[%s5489_s14 + $0x1490] sm:$0xff] }
 0x1a6   : > { %v1006_v9 = vld [vmem:[%s5489_s14 + $0x1590] sm:$0xff]  ;;  %v1007_v10 = vld [vmem:[%s5489_s14 + $0x1598] sm:$0xff] }
 0x1a7   : > { %4693 = vmatpush3.bf16.msra.mxu0 %v4692_v28  ;;  %v4772_v28 = vpack.c.bf16 %v925_v16, %v924_v18  ;;  %v902_v18 = vld [vmem:[%s5489_s14 + $0x1250] sm:$0xff] }
 0x1a8   : > { %4725 = vmatpush3.bf16.msra.mxu1 %v4724_v29  ;;  %4695 = vmatprep.subr.bf16.mxu0 %v4694_v30  ;;  %v4742_v29 = vpack.c.bf16 %v911_v21, %v910_v20  ;;  %v894_v30 = vld [vmem:[%s5489_s14 + $0x1210] sm:$0xff]  ;;  %v935_v21 = vld [vmem:[%s5489_s14 + $0x1358] sm:$0xff] }
 0x1a9   : > { %v3372_v49 = vpop.f32.mrb[2].mxu0  ;;  %4727 = vmatprep.subr.bf16.mxu1 %v4726_v35  ;;  %v927_v35 = vld [vmem:[%s5489_s14 + $0x1318] sm:$0xff]  ;;  %v934_v16 = vld [vmem:[%s5489_s14 + $0x1350] sm:$0xff] }
 0x1aa   : > { %v3373_v56 = vpop.f32.mrb[3].mxu0  ;;  %v3407_v57 = vpop.f32.mrb[2].mxu1 }
 0x1ab   : > { %v3374_v61 = vadd.f32 %v3373_v56, %v3372_v49  ;;  %4697 = vmatpush3.bf16.msra.mxu0 %v4696_v41  ;;  %v3408_v52 = vpop.f32.mrb[3].mxu1  ;;  %v1265_v41 = vcombine.high %v6210_v26, %v6210_v26  ;;  %v4778_v49 = vpack.c.bf16 %v945_v53, %v944_v40  ;;  %v922_v40 = vld [vmem:[%s5489_s14 + $0x12f0] sm:$0xff]  ;;  %v923_v53 = vld [vmem:[%s5489_s14 + $0x12f8] sm:$0xff] }
 0x1ac   : > { %v3409_v62 = vadd.f32 %v3408_v52, %v3407_v57  ;;  %4729 = vmatpush3.bf16.msra.mxu1 %v4728_v42  ;;  %4699 = vmatprep.subr.bf16.mxu0 %v4698_v44  ;;  %v4744_v42 = vpack.c.bf16 %v895_v31, %v894_v30  ;;  %v4776_v44 = vpack.c.bf16 %v927_v35, %v926_v32  ;;  %v930_v52 = vld [vmem:[%s5489_s14 + $0x1330] sm:$0xff]  ;;  %v904_v32 = vld [vmem:[%s5489_s14 + $0x1260] sm:$0xff] }
 0x1ad   : > { %v1555_v3 = vadd.f32 %v3374_v61, %v6114_v22  ;;  %4731 = vmatprep.subr.bf16.mxu1 %v4730_v50  ;;  %v4704_v22 = vpack.c.bf16 %v843_v1, %v842_v55  ;;  %v929_v50 = vld [vmem:[%s5489_s14 + $0x1328] sm:$0xff]  ;;  %v899_v61 = vld [vmem:[%s5489_s14 + $0x1238] sm:$0xff]  ;;  %v4784_v2 = vpack.c.bf16 %v931_v46, %v930_v52  ;;  %v4792_v30 = vpack.c.bf16 %v935_v21, %v934_v16  ;;  %v936_v35 = vld [vmem:[%s5489_s14 + $0x1360] sm:$0xff] }
 0x1ae   : > { %v4780_v57 = vpack.c.bf16 %v929_v50, %v928_v48  ;;  %v949_v55 = vld [vmem:[%s5489_s14 + $0x13c8] sm:$0xff]  ;;  %v4752_v1 = vpack.c.bf16 %v899_v61, %v898_v60  ;;  %v4762_v31 = vpack.c.bf16 %v921_v25, %v920_v24  ;;  %v4766_v54 = vpack.c.bf16 %v923_v53, %v922_v40  ;;  %v939_v60 = vld [vmem:[%s5489_s14 + $0x1378] sm:$0xff]  ;;  %v972_v61 = vld [vmem:[%s5489_s14 + $0x1480] sm:$0xff] }
 0x1af   : > { %v6196_v11 = vadd.f32 %v3409_v62, %v1555_v3  ;;  %4701 = vmatpush3.bf16.msra.mxu0 %v4700_v58  ;;  %v916_v62 = vld [vmem:[%s5489_s14 + $0x12c0] sm:$0xff]  ;;  %v973_v52 = vld [vmem:[%s5489_s14 + $0x1488] sm:$0xff]  ;;  %v4838_v16 = vpack.c.bf16 %v1007_v10, %v1006_v9  ;;  %v979_v40 = vld [vmem:[%s5489_s14 + $0x14b8] sm:$0xff] }
 0x1b0   : > { %4733 = vmatpush3.bf16.msra.mxu1 %v4732_v63  ;;  %4703 = vmatprep.subr.bf16.mxu0 %v4702_v0  ;;  %v917_v63 = vld [vmem:[%s5489_s14 + $0x12c8] sm:$0xff]  ;;  %v948_v0 = vld [vmem:[%s5489_s14 + $0x13c0] sm:$0xff]  ;;  %v1011_v53 = vld [vmem:[%s5489_s14 + $0x15b8] sm:$0xff] }
 0x1b1   : > { %4735 = vmatprep.subr.bf16.mxu1 %v4734_v4  ;;  %v4754_v3 = vpack.c.bf16 %v917_v63, %v916_v62  ;;  %v900_v4 = vld [vmem:[%s5489_s14 + $0x1240] sm:$0xff]  ;;  %v4786_v7 = vpack.c.bf16 %v949_v55, %v948_v0  ;;  %v1005_v46 = vld [vmem:[%s5489_s14 + $0x1588] sm:$0xff]  ;;  %v4802_v55 = vpack.c.bf16 %v973_v52, %v972_v61 }
 0x1b2   : > { %v976_v21 = vld [vmem:[%s5489_s14 + $0x14a0] sm:$0xff]  ;;  %v977_v24 = vld [vmem:[%s5489_s14 + $0x14a8] sm:$0xff] }
 0x1b3   : > { %4705 = vmatpush3.bf16.msra.mxu0 %v4704_v22  ;;  %v950_v22 = vld [vmem:[%s5489_s14 + $0x13d0] sm:$0xff]  ;;  %v996_v61 = vld [vmem:[%s5489_s14 + $0x1540] sm:$0xff]  ;;  %v985_v10 = vld [vmem:[%s5489_s14 + $0x14e8] sm:$0xff] }
 0x1b4   : > { %4737 = vmatpush3.bf16.msra.mxu1 %v4736_v13  ;;  %4739 = vmatprep.subr.bf16.mxu0 %v4738_v15  ;;  %v951_v13 = vld [vmem:[%s5489_s14 + $0x13d8] sm:$0xff]  ;;  %v4756_v15 = vpack.c.bf16 %v901_v5, %v900_v4  ;;  %v989_v5 = vld [vmem:[%s5489_s14 + $0x1508] sm:$0xff]  ;;  %v984_v9 = vld [vmem:[%s5489_s14 + $0x14e0] sm:$0xff] }
 0x1b5   : > { %4771 = vmatprep.subr.bf16.mxu1 %v4770_v19  ;;  %v903_v19 = vld [vmem:[%s5489_s14 + $0x1258] sm:$0xff]  ;;  %v4790_v20 = vpack.c.bf16 %v951_v13, %v950_v22 }
 0x1b6   : > { %2533 = vmatmul.mubr.f32.vlgmr.msra.gmra.mrb[16].mxu0 %v6125_v37  ;;  %v897_v37 = vld [vmem:[%s5489_s14 + $0x1228] sm:$0xff] }
 0x1b7   : > { %4741 = vmatpush3.bf16.msra.mxu0 %v4740_v27  ;;  %2603 = vmatmul.mubr.f32.vlgmr.msra.gmra.mrb[16].mxu1 %v6130_v39  ;;  %v946_v39 = vld [vmem:[%s5489_s14 + $0x13b0] sm:$0xff]  ;;  %v4748_v56 = vpack.c.bf16 %v897_v37, %v896_v47  ;;  %v952_v27 = vld [vmem:[%s5489_s14 + $0x13e0] sm:$0xff] }
 0x1b8   : > { %4773 = vmatpush3.bf16.msra.mxu1 %v4772_v28  ;;  %4743 = vmatprep.subr.bf16.mxu0 %v4742_v29  ;;  %v4782_v58 = vpack.c.bf16 %v947_v34, %v946_v39  ;;  %v953_v28 = vld [vmem:[%s5489_s14 + $0x13e8] sm:$0xff]  ;;  %v4760_v29 = vpack.c.bf16 %v903_v19, %v902_v18  ;;  %v906_v39 = vld [vmem:[%s5489_s14 + $0x1270] sm:$0xff]  ;;  %v907_v34 = vld [vmem:[%s5489_s14 + $0x1278] sm:$0xff] }
 0x1b9   : > { %4775 = vmatprep.subr.bf16.mxu1 %v4774_v33  ;;  %2672 = vmatprep.mubr.f32.mxu0 %v1264_v43  ;;  %v905_v33 = vld [vmem:[%s5489_s14 + $0x1268] sm:$0xff]  ;;  %v4794_v38 = vpack.c.bf16 %v953_v28, %v952_v27  ;;  %v959_v18 = vld [vmem:[%s5489_s14 + $0x1418] sm:$0xff]  ;;  %v990_v19 = vld [vmem:[%s5489_s14 + $0x1510] sm:$0xff] }
 0x1ba   : > { %2742 = vmatprep.mubr.f32.mxu1 %v1265_v41  ;;  %v937_v43 = vld [vmem:[%s5489_s14 + $0x1368] sm:$0xff]  ;;  %v4764_v48 = vpack.c.bf16 %v905_v33, %v904_v32  ;;  %v1008_v27 = vld [vmem:[%s5489_s14 + $0x15a0] sm:$0xff]  ;;  %v4810_v32 = vpack.c.bf16 %v977_v24, %v976_v21 }
 0x1bb   : > { %4745 = vmatpush3.bf16.msra.mxu0 %v4744_v42  ;;  %v4796_v51 = vpack.c.bf16 %v937_v43, %v936_v35  ;;  %v1009_v28 = vld [vmem:[%s5489_s14 + $0x15a8] sm:$0xff]  ;;  %v960_v33 = vld [vmem:[%s5489_s14 + $0x1420] sm:$0xff]  ;;  %v978_v43 = vld [vmem:[%s5489_s14 + $0x14b0] sm:$0xff] }
 0x1bc   : > { %4777 = vmatpush3.bf16.msra.mxu1 %v4776_v44  ;;  %4747 = vmatprep.subr.bf16.mxu0 %v4746_v45  ;;  %v954_v44 = vld [vmem:[%s5489_s14 + $0x13f0] sm:$0xff]  ;;  %v955_v45 = vld [vmem:[%s5489_s14 + $0x13f8] sm:$0xff]  ;;  %v992_v35 = vld [vmem:[%s5489_s14 + $0x1520] sm:$0xff] }
 0x1bd   : > { %4779 = vmatprep.subr.bf16.mxu1 %v4778_v49  ;;  %v314_v49 = vld [vmem:[%s5482_s15 + $0x50] sm:$0xff] }
 0x1be   : > { %v1266_v62 = vcombine.high %v314_v49, %v314_v49  ;;  %v6285_v8 = vrot.slane %v314_v49, %v5555_v14  ;;  %v995_v49 = vld [vmem:[%s5489_s14 + $0x1538] sm:$0xff] }
 0x1bf   : > { %4749 = vmatpush3.bf16.msra.mxu0 %v4748_v56  ;;  %v938_v56 = vld [vmem:[%s5489_s14 + $0x1370] sm:$0xff] }
 0x1c0   : > { %4781 = vmatpush3.bf16.msra.mxu1 %v4780_v57  ;;  %4751 = vmatprep.subr.bf16.mxu0 %v4750_v59  ;;  %v4798_v59 = vpack.c.bf16 %v955_v45, %v954_v44  ;;  %v4800_v0 = vpack.c.bf16 %v939_v60, %v938_v56  ;;  %v6290_v22 = vrot.slane %v1266_v62, %v5555_v14  ;;  %v962_v45 = vld [vmem:[%s5489_s14 + $0x1430] sm:$0xff]  ;;  %v965_v60 = vld [vmem:[%s5489_s14 + $0x1448] sm:$0xff]  ;;  %v983_v62 = vld [vmem:[%s5489_s14 + $0x14d8] sm:$0xff] }
 0x1c1   : > { %4783 = vmatprep.subr.bf16.mxu1 %v4782_v58  ;;  %v1004_v58 = vld [vmem:[%s5489_s14 + $0x1580] sm:$0xff]  ;;  %v1281_v25 = vcombine.high %v6285_v8, %v6285_v8  ;;  %v4814_v44 = vpack.c.bf16 %v979_v40, %v978_v43 }
 0x1c2   : > { %v4834_v4 = vpack.c.bf16 %v1005_v46, %v1004_v58  ;;  %v997_v58 = vld [vmem:[%s5489_s14 + $0x1548] sm:$0xff]  ;;  %v982_v46 = vld [vmem:[%s5489_s14 + $0x14d0] sm:$0xff] }
 0x1c3   : > { %4753 = vmatpush3.bf16.msra.mxu0 %v4752_v1  ;;  %v956_v1 = vld [vmem:[%s5489_s14 + $0x1400] sm:$0xff] }
 0x1c4   : > { %4785 = vmatpush3.bf16.msra.mxu1 %v4784_v2  ;;  %4755 = vmatprep.subr.bf16.mxu0 %v4754_v3  ;;  %v957_v2 = vld [vmem:[%s5489_s14 + $0x1408] sm:$0xff]  ;;  %v988_v3 = vld [vmem:[%s5489_s14 + $0x1500] sm:$0xff] }
 0x1c5   : > { %4787 = vmatprep.subr.bf16.mxu1 %v4786_v7  ;;  %v975_v7 = vld [vmem:[%s5489_s14 + $0x1498] sm:$0xff]  ;;  %v4804_v13 = vpack.c.bf16 %v957_v2, %v956_v1  ;;  %v4852_v1 = vpack.c.bf16 %v997_v58, %v996_v61  ;;  %v4822_v2 = vpack.c.bf16 %v983_v62, %v982_v46  ;;  %v1038_v61 = vld [vmem:[%s5489_s14 + $0x1690] sm:$0xff] }
 0x1c6   : > { %v1070_v46 = vld [vmem:[%s5489_s14 + $0x1790] sm:$0xff]  ;;  %v1071_v62 = vld [vmem:[%s5489_s14 + $0x1798] sm:$0xff] }
 0x1c7   : > { %4757 = vmatpush3.bf16.msra.mxu0 %v4756_v15  ;;  %v4836_v15 = vpack.c.bf16 %v989_v5, %v988_v3  ;;  %v966_v3 = vld [vmem:[%s5489_s14 + $0x1450] sm:$0xff] }
 0x1c8   : > { %4789 = vmatpush3.bf16.msra.mxu1 %v4788_v17  ;;  %4759 = vmatprep.subr.bf16.mxu0 %v4758_v12  ;;  %v4806_v17 = vpack.c.bf16 %v975_v7, %v974_v6  ;;  %v958_v12 = vld [vmem:[%s5489_s14 + $0x1410] sm:$0xff]  ;;  %v999_v7 = vld [vmem:[%s5489_s14 + $0x1558] sm:$0xff] }
 0x1c9   : > { %v3442_v36 = vpop.f32.mrb[4].mxu0  ;;  %4791 = vmatprep.subr.bf16.mxu1 %v4790_v20  ;;  %v991_v20 = vld [vmem:[%s5489_s14 + $0x1518] sm:$0xff]  ;;  %v998_v5 = vld [vmem:[%s5489_s14 + $0x1550] sm:$0xff] }
 0x1ca   : > { %v3443_v41 = vpop.f32.mrb[5].mxu0  ;;  %v3477_v42 = vpop.f32.mrb[4].mxu1 }
 0x1cb   : > { %v3444_v47 = vadd.f32 %v3443_v41, %v3442_v36  ;;  %4761 = vmatpush3.bf16.msra.mxu0 %v4760_v29  ;;  %v3478_v37 = vpop.f32.mrb[5].mxu1  ;;  %v1282_v29 = vcombine.high %v6290_v22, %v6290_v22  ;;  %v4842_v36 = vpack.c.bf16 %v1009_v28, %v1008_v27  ;;  %v986_v27 = vld [vmem:[%s5489_s14 + $0x14f0] sm:$0xff]  ;;  %v987_v28 = vld [vmem:[%s5489_s14 + $0x14f8] sm:$0xff] }
 0x1cc   : > { %v3479_v50 = vadd.f32 %v3478_v37, %v3477_v42  ;;  %4793 = vmatpush3.bf16.msra.mxu1 %v4792_v30  ;;  %4763 = vmatprep.subr.bf16.mxu0 %v4762_v31  ;;  %v4808_v30 = vpack.c.bf16 %v959_v18, %v958_v12  ;;  %v4840_v31 = vpack.c.bf16 %v991_v20, %v990_v19  ;;  %v994_v37 = vld [vmem:[%s5489_s14 + $0x1530] sm:$0xff]  ;;  %v968_v19 = vld [vmem:[%s5489_s14 + $0x1460] sm:$0xff] }
 0x1cd   : > { %v1695_v57 = vadd.f32 %v3444_v47, %v6196_v11  ;;  %4795 = vmatprep.subr.bf16.mxu1 %v4794_v38  ;;  %v4768_v11 = vpack.c.bf16 %v907_v34, %v906_v39  ;;  %v993_v38 = vld [vmem:[%s5489_s14 + $0x1528] sm:$0xff]  ;;  %v963_v47 = vld [vmem:[%s5489_s14 + $0x1438] sm:$0xff]  ;;  %v4848_v56 = vpack.c.bf16 %v995_v49, %v994_v37  ;;  %v4856_v12 = vpack.c.bf16 %v999_v7, %v998_v5  ;;  %v1000_v20 = vld [vmem:[%s5489_s14 + $0x1560] sm:$0xff] }
 0x1ce   : > { %v4844_v42 = vpack.c.bf16 %v993_v38, %v992_v35  ;;  %v1013_v39 = vld [vmem:[%s5489_s14 + $0x15c8] sm:$0xff]  ;;  %v4816_v34 = vpack.c.bf16 %v963_v47, %v962_v45  ;;  %v4826_v18 = vpack.c.bf16 %v985_v10, %v984_v9  ;;  %v4830_v40 = vpack.c.bf16 %v987_v28, %v986_v27  ;;  %v1003_v45 = vld [vmem:[%s5489_s14 + $0x1578] sm:$0xff]  ;;  %v1036_v47 = vld [vmem:[%s5489_s14 + $0x1680] sm:$0xff] }
 0x1cf   : > { %v6276_v63 = vadd.f32 %v3479_v50, %v1695_v57  ;;  %4765 = vmatpush3.bf16.msra.mxu0 %v4764_v48  ;;  %v980_v50 = vld [vmem:[%s5489_s14 + $0x14c0] sm:$0xff]  ;;  %v1037_v37 = vld [vmem:[%s5489_s14 + $0x1688] sm:$0xff]  ;;  %v4902_v5 = vpack.c.bf16 %v1071_v62, %v1070_v46  ;;  %v1075_v27 = vld [vmem:[%s5489_s14 + $0x17b8] sm:$0xff] }
 0x1d0   : > { %4797 = vmatpush3.bf16.msra.mxu1 %v4796_v51  ;;  %4767 = vmatprep.subr.bf16.mxu0 %v4766_v54  ;;  %v981_v51 = vld [vmem:[%s5489_s14 + $0x14c8] sm:$0xff]  ;;  %v1012_v54 = vld [vmem:[%s5489_s14 + $0x15c0] sm:$0xff] }
 0x1d1   : > { %4799 = vmatprep.subr.bf16.mxu1 %v4798_v59  ;;  %v4818_v57 = vpack.c.bf16 %v981_v51, %v980_v50  ;;  %v964_v59 = vld [vmem:[%s5489_s14 + $0x1440] sm:$0xff]  ;;  %v4850_v52 = vpack.c.bf16 %v1013_v39, %v1012_v54  ;;  %v1069_v49 = vld [vmem:[%s5489_s14 + $0x1788] sm:$0xff]  ;;  %v4866_v39 = vpack.c.bf16 %v1037_v37, %v1036_v47 }
 0x1d2   : > { %v1040_v7 = vld [vmem:[%s5489_s14 + $0x16a0] sm:$0xff]  ;;  %v1061_v37 = vld [vmem:[%s5489_s14 + $0x1748] sm:$0xff] }
 0x1d3   : > { %4769 = vmatpush3.bf16.msra.mxu0 %v4768_v11  ;;  %v1014_v11 = vld [vmem:[%s5489_s14 + $0x15d0] sm:$0xff]  ;;  %v1072_v10 = vld [vmem:[%s5489_s14 + $0x17a0] sm:$0xff]  ;;  %v1049_v46 = vld [vmem:[%s5489_s14 + $0x16e8] sm:$0xff] }
 0x1d4   : > { %4801 = vmatpush3.bf16.msra.mxu1 %v4800_v0  ;;  %4803 = vmatprep.subr.bf16.mxu0 %v4802_v55  ;;  %v1015_v0 = vld [vmem:[%s5489_s14 + $0x15d8] sm:$0xff]  ;;  %v4820_v55 = vpack.c.bf16 %v965_v60, %v964_v59  ;;  %v1053_v60 = vld [vmem:[%s5489_s14 + $0x1708] sm:$0xff]  ;;  %v1080_v62 = vld [vmem:[%s5489_s14 + $0x17e0] sm:$0xff] }
 0x1d5   : > { %4835 = vmatprep.subr.bf16.mxu1 %v4834_v4  ;;  %v967_v4 = vld [vmem:[%s5489_s14 + $0x1458] sm:$0xff]  ;;  %v4854_v6 = vpack.c.bf16 %v1015_v0, %v1014_v11 }
 0x1d6   : > { %2673 = vmatmul.mubr.f32.vlgmr.msra.gmra.mrb[18].mxu0 %v6205_v23  ;;  %v961_v23 = vld [vmem:[%s5489_s14 + $0x1428] sm:$0xff] }
 0x1d7   : > { %4805 = vmatpush3.bf16.msra.mxu0 %v4804_v13  ;;  %2743 = vmatmul.mubr.f32.vlgmr.msra.gmra.mrb[18].mxu1 %v6210_v26  ;;  %v1010_v26 = vld [vmem:[%s5489_s14 + $0x15b0] sm:$0xff]  ;;  %v4812_v41 = vpack.c.bf16 %v961_v23, %v960_v33  ;;  %v1016_v13 = vld [vmem:[%s5489_s14 + $0x15e0] sm:$0xff] }
 0x1d8   : > { %4837 = vmatpush3.bf16.msra.mxu1 %v4836_v15  ;;  %4807 = vmatprep.subr.bf16.mxu0 %v4806_v17  ;;  %v4846_v48 = vpack.c.bf16 %v1011_v53, %v1010_v26  ;;  %v1017_v15 = vld [vmem:[%s5489_s14 + $0x15e8] sm:$0xff]  ;;  %v4824_v17 = vpack.c.bf16 %v967_v4, %v966_v3  ;;  %v970_v26 = vld [vmem:[%s5489_s14 + $0x1470] sm:$0xff]  ;;  %v971_v53 = vld [vmem:[%s5489_s14 + $0x1478] sm:$0xff] }
 0x1d9   : > { %4839 = vmatprep.subr.bf16.mxu1 %v4838_v16  ;;  %2812 = vmatprep.mubr.f32.mxu0 %v1281_v25  ;;  %v969_v16 = vld [vmem:[%s5489_s14 + $0x1468] sm:$0xff]  ;;  %v4858_v24 = vpack.c.bf16 %v1017_v15, %v1016_v13  ;;  %v1023_v3 = vld [vmem:[%s5489_s14 + $0x1618] sm:$0xff]  ;;  %v1054_v4 = vld [vmem:[%s5489_s14 + $0x1710] sm:$0xff] }
 0x1da   : > { %2882 = vmatprep.mubr.f32.mxu1 %v1282_v29  ;;  %v1001_v25 = vld [vmem:[%s5489_s14 + $0x1568] sm:$0xff]  ;;  %v4828_v35 = vpack.c.bf16 %v969_v16, %v968_v19  ;;  %v1024_v19 = vld [vmem:[%s5489_s14 + $0x1620] sm:$0xff] }
 0x1db   : > { %4809 = vmatpush3.bf16.msra.mxu0 %v4808_v30  ;;  %v4860_v43 = vpack.c.bf16 %v1001_v25, %v1000_v20  ;;  %v1073_v13 = vld [vmem:[%s5489_s14 + $0x17a8] sm:$0xff]  ;;  %v1056_v16 = vld [vmem:[%s5489_s14 + $0x1720] sm:$0xff]  ;;  %v1043_v25 = vld [vmem:[%s5489_s14 + $0x16b8] sm:$0xff] }
 0x1dc   : > { %4841 = vmatpush3.bf16.msra.mxu1 %v4840_v31  ;;  %4811 = vmatprep.subr.bf16.mxu0 %v4810_v32  ;;  %v1018_v31 = vld [vmem:[%s5489_s14 + $0x15f0] sm:$0xff]  ;;  %v1019_v32 = vld [vmem:[%s5489_s14 + $0x15f8] sm:$0xff]  ;;  %v4906_v20 = vpack.c.bf16 %v1073_v13, %v1072_v10 }
 0x1dd   : > { %4843 = vmatprep.subr.bf16.mxu1 %v4842_v36  ;;  %v315_v36 = vld [vmem:[%s5482_s15 + $0x58] sm:$0xff] }
 0x1de   : > { %v1283_v50 = vcombine.high %v315_v36, %v315_v36  ;;  %v6365_v58 = vrot.slane %v315_v36, %v5555_v14  ;;  %v1044_v36 = vld [vmem:[%s5489_s14 + $0x16c0] sm:$0xff]  ;;  %v1051_v10 = vld [vmem:[%s5489_s14 + $0x16f8] sm:$0xff] }
 0x1df   : > { %4813 = vmatpush3.bf16.msra.mxu0 %v4812_v41  ;;  %v1002_v41 = vld [vmem:[%s5489_s14 + $0x1570] sm:$0xff] }
 0x1e0   : > { %4845 = vmatpush3.bf16.msra.mxu1 %v4844_v42  ;;  %4815 = vmatprep.subr.bf16.mxu0 %v4814_v44  ;;  %v4862_v44 = vpack.c.bf16 %v1019_v32, %v1018_v31  ;;  %v4864_v54 = vpack.c.bf16 %v1003_v45, %v1002_v41  ;;  %v6370_v11 = vrot.slane %v1283_v50, %v5555_v14  ;;  %v1041_v14 = vld [vmem:[%s5489_s14 + $0x16a8] sm:$0xff]  ;;  %v1026_v31 = vld [vmem:[%s5489_s14 + $0x1630] sm:$0xff]  ;;  %v1027_v32 = vld [vmem:[%s5489_s14 + $0x1638] sm:$0xff] }
 0x1e1   : > { %4847 = vmatprep.subr.bf16.mxu1 %v4846_v48  ;;  %v1068_v48 = vld [vmem:[%s5489_s14 + $0x1780] sm:$0xff]  ;;  %v1298_v9 = vcombine.high %v6365_v58, %v6365_v58  ;;  %v1078_v50 = vld [vmem:[%s5489_s14 + $0x17d0] sm:$0xff] }
 0x1e2   : > { %v4898_v59 = vpack.c.bf16 %v1069_v49, %v1068_v48  ;;  %v1299_v15 = vcombine.high %v6370_v11, %v6370_v11  ;;  %v1060_v45 = vld [vmem:[%s5489_s14 + $0x1740] sm:$0xff]  ;;  %v1046_v48 = vld [vmem:[%s5489_s14 + $0x16d0] sm:$0xff]  ;;  %v1047_v49 = vld [vmem:[%s5489_s14 + $0x16d8] sm:$0xff] }
 0x1e3   : > { %4817 = vmatpush3.bf16.msra.mxu0 %v4816_v34  ;;  %v1020_v34 = vld [vmem:[%s5489_s14 + $0x1600] sm:$0xff] }
 0x1e4   : > { %4849 = vmatpush3.bf16.msra.mxu1 %v4848_v56  ;;  %4819 = vmatprep.subr.bf16.mxu0 %v4818_v57  ;;  %v1021_v56 = vld [vmem:[%s5489_s14 + $0x1608] sm:$0xff]  ;;  %v1052_v57 = vld [vmem:[%s5489_s14 + $0x1700] sm:$0xff] }
 0x1e5   : > { %4851 = vmatprep.subr.bf16.mxu1 %v4850_v52  ;;  %v1039_v52 = vld [vmem:[%s5489_s14 + $0x1698] sm:$0xff]  ;;  %v4868_v0 = vpack.c.bf16 %v1021_v56, %v1020_v34  ;;  %v4886_v34 = vpack.c.bf16 %v1047_v49, %v1046_v48  ;;  %v1030_v56 = vld [vmem:[%s5489_s14 + $0x1650] sm:$0xff] }
 0x1e7   : > { %4821 = vmatpush3.bf16.msra.mxu0 %v4820_v55  ;;  %v4900_v55 = vpack.c.bf16 %v1053_v60, %v1052_v57  ;;  %v1031_v57 = vld [vmem:[%s5489_s14 + $0x1658] sm:$0xff] }
 0x1e8   : > { %4853 = vmatpush3.bf16.msra.mxu1 %v4852_v1  ;;  %4823 = vmatprep.subr.bf16.mxu0 %v4822_v2  ;;  %v4870_v1 = vpack.c.bf16 %v1039_v52, %v1038_v61  ;;  %v1022_v2 = vld [vmem:[%s5489_s14 + $0x1610] sm:$0xff]  ;;  %v1063_v61 = vld [vmem:[%s5489_s14 + $0x1758] sm:$0xff]  ;;  %v1048_v52 = vld [vmem:[%s5489_s14 + $0x16e0] sm:$0xff] }
 0x1e9   : > { %v3512_v21 = vpop.f32.mrb[6].mxu0  ;;  %4855 = vmatprep.subr.bf16.mxu1 %v4854_v6  ;;  %v1055_v6 = vld [vmem:[%s5489_s14 + $0x1718] sm:$0xff] }
 0x1ea   : > { %v3513_v29 = vpop.f32.mrb[7].mxu0  ;;  %v3547_v30 = vpop.f32.mrb[6].mxu1 }
 0x1eb   : > { %v3514_v33 = vadd.f32 %v3513_v29, %v3512_v21  ;;  %4825 = vmatpush3.bf16.msra.mxu0 %v4824_v17  ;;  %v3548_v23 = vpop.f32.mrb[7].mxu1  ;;  %v4872_v17 = vpack.c.bf16 %v1023_v3, %v1022_v2  ;;  %v1057_v21 = vld [vmem:[%s5489_s14 + $0x1728] sm:$0xff]  ;;  %v4890_v2 = vpack.c.bf16 %v1049_v46, %v1048_v52  ;;  %v1032_v3 = vld [vmem:[%s5489_s14 + $0x1660] sm:$0xff] }
 0x1ec   : > { %v3549_v38 = vadd.f32 %v3548_v23, %v3547_v30  ;;  %4857 = vmatpush3.bf16.msra.mxu1 %v4856_v12  ;;  %4827 = vmatprep.subr.bf16.mxu0 %v4826_v18  ;;  %v4904_v12 = vpack.c.bf16 %v1055_v6, %v1054_v4  ;;  %v4874_v18 = vpack.c.bf16 %v1041_v14, %v1040_v7  ;;  %v1033_v4 = vld [vmem:[%s5489_s14 + $0x1668] sm:$0xff] }
 0x1ed   : > { %v1835_v42 = vadd.f32 %v3514_v33, %v6276_v63  ;;  %4859 = vmatprep.subr.bf16.mxu1 %v4858_v24  ;;  %v4832_v63 = vpack.c.bf16 %v971_v53, %v970_v26  ;;  %v1042_v24 = vld [vmem:[%s5489_s14 + $0x16b0] sm:$0xff]  ;;  %v4908_v29 = vpack.c.bf16 %v1057_v21, %v1056_v16  ;;  %v4880_v26 = vpack.c.bf16 %v1027_v32, %v1026_v31  ;;  %v1065_v14 = vld [vmem:[%s5489_s14 + $0x1768] sm:$0xff] }
 0x1ee   : > { %v4878_v30 = vpack.c.bf16 %v1043_v25, %v1042_v24  ;;  %v1058_v33 = vld [vmem:[%s5489_s14 + $0x1730] sm:$0xff]  ;;  %v1035_v25 = vld [vmem:[%s5489_s14 + $0x1678] sm:$0xff] }
 0x1ef   : > { %v6356_v51 = vadd.f32 %v3549_v38, %v1835_v42  ;;  %4829 = vmatpush3.bf16.msra.mxu0 %v4828_v35  ;;  %v1059_v35 = vld [vmem:[%s5489_s14 + $0x1738] sm:$0xff]  ;;  %v1045_v38 = vld [vmem:[%s5489_s14 + $0x16c8] sm:$0xff]  ;;  %v1028_v42 = vld [vmem:[%s5489_s14 + $0x1640] sm:$0xff] }
 0x1f0   : > { %4861 = vmatpush3.bf16.msra.mxu1 %v4860_v43  ;;  %4831 = vmatprep.subr.bf16.mxu0 %v4830_v40  ;;  %v1076_v43 = vld [vmem:[%s5489_s14 + $0x17c0] sm:$0xff]  ;;  %v1077_v40 = vld [vmem:[%s5489_s14 + $0x17c8] sm:$0xff]  ;;  %v4912_v53 = vpack.c.bf16 %v1059_v35, %v1058_v33  ;;  %v4882_v41 = vpack.c.bf16 %v1045_v38, %v1044_v36  ;;  %v1034_v24 = vld [vmem:[%s5489_s14 + $0x1670] sm:$0xff] }
 0x1f1   : > { %4863 = vmatprep.subr.bf16.mxu1 %v4862_v44  ;;  %v1029_v44 = vld [vmem:[%s5489_s14 + $0x1648] sm:$0xff]  ;;  %v4914_v47 = vpack.c.bf16 %v1077_v40, %v1076_v43  ;;  %v4896_v31 = vpack.c.bf16 %v1035_v25, %v1034_v24  ;;  %v303_v24 = vld [vmem:[#allocation2] sm:$0x3] }
 0x1f3   : > { %4833 = vmatpush3.bf16.msra.mxu0 %v4832_v63  ;;  %v1079_v63 = vld [vmem:[%s5489_s14 + $0x17d8] sm:$0xff] }
 0x1f4   : > { %4865 = vmatpush3.bf16.msra.mxu1 %v4864_v54  ;;  %4867 = vmatprep.subr.bf16.mxu0 %v4866_v39  ;;  %v4884_v54 = vpack.c.bf16 %v1029_v44, %v1028_v42  ;;  %v4916_v39 = vpack.c.bf16 %v1061_v37, %v1060_v45  ;;  %v4918_v60 = vpack.c.bf16 %v1079_v63, %v1078_v50 }
 0x1f5   : > { %4899 = vmatprep.subr.bf16.mxu1 %v4898_v59  ;;  %v1062_v59 = vld [vmem:[%s5489_s14 + $0x1750] sm:$0xff] }
 0x1f6   : > { %2813 = vmatmul.mubr.f32.vlgmr.msra.gmra.mrb[20].mxu0 %v6285_v8  ;;  %v1025_v8 = vld [vmem:[%s5489_s14 + $0x1628] sm:$0xff] }
 0x1f7   : > { %4869 = vmatpush3.bf16.msra.mxu0 %v4868_v0  ;;  %2883 = vmatmul.mubr.f32.vlgmr.msra.gmra.mrb[20].mxu1 %v6290_v22  ;;  %v1074_v22 = vld [vmem:[%s5489_s14 + $0x17b0] sm:$0xff]  ;;  %v4876_v28 = vpack.c.bf16 %v1025_v8, %v1024_v19  ;;  %v1081_v0 = vld [vmem:[%s5489_s14 + $0x17e8] sm:$0xff]  ;;  %v4892_v8 = vpack.c.bf16 %v1033_v4, %v1032_v3 }
 0x1f8   : > { %4901 = vmatpush3.bf16.msra.mxu1 %v4900_v55  ;;  %4871 = vmatprep.subr.bf16.mxu0 %v4870_v1  ;;  %v4910_v23 = vpack.c.bf16 %v1075_v27, %v1074_v22  ;;  %v4888_v55 = vpack.c.bf16 %v1031_v57, %v1030_v56  ;;  %v4920_v1 = vpack.c.bf16 %v1063_v61, %v1062_v59 }
 0x1f9   : > { %4903 = vmatprep.subr.bf16.mxu1 %v4902_v5  ;;  %2952 = vmatprep.mubr.f32.mxu0 %v1298_v9  ;;  %v1064_v5 = vld [vmem:[%s5489_s14 + $0x1760] sm:$0xff]  ;;  %v4922_v7 = vpack.c.bf16 %v1081_v0, %v1080_v62  ;;  %v1050_v9 = vld [vmem:[%s5489_s14 + $0x16f0] sm:$0xff] }
 0x1fa   : > { %3022 = vmatprep.mubr.f32.mxu1 %v1299_v15  ;;  %v4894_v21 = vpack.c.bf16 %v1051_v10, %v1050_v9 }
 0x1fb   : > { %4873 = vmatpush3.bf16.msra.mxu0 %v4872_v17  ;;  %v1082_v17 = vld [vmem:[%s5489_s14 + $0x17f0] sm:$0xff] }
 0x1fc   : > { %4905 = vmatpush3.bf16.msra.mxu1 %v4904_v12  ;;  %4875 = vmatprep.subr.bf16.mxu0 %v4874_v18  ;;  %v1083_v12 = vld [vmem:[%s5489_s14 + $0x17f8] sm:$0xff] }
 0x1fd   : > { %4907 = vmatprep.subr.bf16.mxu1 %v4906_v20  ;;  %v4924_v20 = vpack.c.bf16 %v1065_v14, %v1064_v5  ;;  %v4926_v27 = vpack.c.bf16 %v1083_v12, %v1082_v17 }
 0x1ff   : > { %4877 = vmatpush3.bf16.msra.mxu0 %v4876_v28  ;;  %v1066_v28 = vld [vmem:[%s5489_s14 + $0x1770] sm:$0xff] }
 0x200   : > { %4909 = vmatpush3.bf16.msra.mxu1 %v4908_v29  ;;  %4879 = vmatprep.subr.bf16.mxu0 %v4878_v30  ;;  %v1067_v29 = vld [vmem:[%s5489_s14 + $0x1778] sm:$0xff] }
 0x201   : > { %4911 = vmatprep.subr.bf16.mxu1 %v4910_v23  ;;  %v4928_v32 = vpack.c.bf16 %v1067_v29, %v1066_v28  ;;  %v3045_v28 = vld [vmem:[%s6524_s3 + $0x8] sm:$0xff] (!%p3261_p12)  ;;  %v3046_v29 = vld [vmem:[%s6524_s3 + $0x10] sm:$0xff] (!%p3261_p12) }
 0x203   : > { %4881 = vmatpush3.bf16.msra.mxu0 %v4880_v26 }
 0x204   : > { %4913 = vmatpush3.bf16.msra.mxu1 %v4912_v53  ;;  %4883 = vmatprep.subr.bf16.mxu0 %v4882_v41 }
 0x205   : > { %4915 = vmatprep.subr.bf16.mxu1 %v4914_v47 }
 0x207   : > { %4885 = vmatpush3.bf16.msra.mxu0 %v4884_v54 }
 0x208   : > { %4917 = vmatpush3.bf16.msra.mxu1 %v4916_v39  ;;  %4887 = vmatprep.subr.bf16.mxu0 %v4886_v34 }
 0x209   : > { %v3582_v6 = vpop.f32.mrb[8].mxu0  ;;  %4919 = vmatprep.subr.bf16.mxu1 %v4918_v60 }
 0x20a   : > { %v3583_v13 = vpop.f32.mrb[9].mxu0  ;;  %v3617_v15 = vpop.f32.mrb[8].mxu1 }
 0x20b   : > { %v3584_v18 = vadd.f32 %v3583_v13, %v3582_v6  ;;  %4889 = vmatpush3.bf16.msra.mxu0 %v4888_v55  ;;  %v3618_v19 = vpop.f32.mrb[9].mxu1 }
 0x20c   : > { %v3619_v16 = vadd.f32 %v3618_v19, %v3617_v15  ;;  %4921 = vmatpush3.bf16.msra.mxu1 %v4920_v1  ;;  %4891 = vmatprep.subr.bf16.mxu0 %v4890_v2 }
 0x20d   : > { %v1975_v22 = vadd.f32 %v3584_v18, %v6356_v51  ;;  %4923 = vmatprep.subr.bf16.mxu1 %v4922_v7 }
 0x20f   : > { %v2045_v30 = vadd.f32 %v3619_v16, %v1975_v22  ;;  %4893 = vmatpush3.bf16.msra.mxu0 %v4892_v8 }
 0x210   : > { %4925 = vmatpush3.bf16.msra.mxu1 %v4924_v20  ;;  %4895 = vmatprep.subr.bf16.mxu0 %v4894_v21 }
 0x211   : > { %4927 = vmatprep.subr.bf16.mxu1 %v4926_v27  ;;  %v3044_v27 = vld [vmem:[%s6524_s3] sm:$0xff] (!%p3261_p12) }
 0x213   : > { %4897 = vmatpush3.bf16.msra.mxu0 %v4896_v31  ;;  %v4931_v31 = vpack.c.bf16 (!%p3261_p12), %v3045_v28, %v3044_v27 }
 0x214   : > { %4929 = vmatpush3.bf16.msra.mxu1 %v4928_v32  ;;  %v3047_v32 = vld [vmem:[%s6524_s3 + $0x18] sm:$0xff] (!%p3261_p12) }
 0x216   : > { %2953 = vmatmul.mubr.f32.vlgmr.msra.gmra.mrb[22].mxu0 %v6365_v58 }
 0x217   : > { %3023 = vmatmul.mubr.f32.vlgmr.msra.gmra.mrb[22].mxu1 %v6370_v11 }
 0x229   : > { %v3652_v33 = vpop.f32.mrb[10].mxu0 }
 0x22a   : > { %v3653_v23 = vpop.f32.mrb[11].mxu0  ;;  %v3687_v51 = vpop.f32.mrb[10].mxu1 }
 0x22b   : > { %v3654_v35 = vadd.f32 %v3653_v23, %v3652_v33  ;;  %v3688_v36 = vpop.f32.mrb[11].mxu1  ;;  %v5257_v33 = vmov (!%p3261_p12), 0.0   ;;  %v4934_v23 = vpack.c.bf16 (!%p3261_p12), %v3047_v32, %v3046_v29 }
 0x22c   : > { %v3689_v38 = vadd.f32 %v3688_v36, %v3687_v51  ;;  %4159 = vmatprep.mubr.msk.f32.mxu0 (!%p3261_p12), %vm5256_vm1, %v5257_v33  ;;  %v3048_v51 = vld [vmem:[%s6524_s3 + $0x20] sm:$0xff] (!%p3261_p12) }
 0x22d   : > { %v2115_v43 = vadd.f32 %v3654_v35, %v2045_v30  ;;  %v5255_v30 = vmov (!%p3261_p12), 0.0|0.0   ;;  %v3049_v35 = vld [vmem:[%s6524_s3 + $0x28] sm:$0xff] (!%p3261_p12) }
 0x22e   : > { %4930 = vmatprep.subr.bf16.mxu0 (!%p3261_p12), %v5255_v30  ;;  %v4937_v36 = vpack.c.bf16 (!%p3261_p12), %v3049_v35, %v3048_v51 }
 0x22f   : > { %v2185_v40 = vadd.f32 %v3689_v38, %v2115_v43  ;;  %4932 = vmatpush3.bf16.msra.mxu0 (!%p3261_p12), %v4931_v31  ;;  %v3050_v38 = vld [vmem:[%s6524_s3 + $0x30] sm:$0xff] (!%p3261_p12)  ;;  %v3051_v43 = vld [vmem:[%s6524_s3 + $0x38] sm:$0xff] (!%p3261_p12) }
 0x230   : > { %4933 = vmatprep.subr.bf16.mxu0 (!%p3261_p12), %v5255_v30 }
 0x233   : > { %4935 = vmatpush3.bf16.msra.mxu0 (!%p3261_p12), %v4934_v23 }
 0x234   : > { %4936 = vmatprep.subr.bf16.mxu0 (!%p3261_p12), %v5255_v30 }
 0x237   : > { %4938 = vmatpush3.bf16.msra.mxu0 (!%p3261_p12), %v4937_v36 }
 0x238   : > { %4939 = vmatprep.subr.bf16.mxu0 (!%p3261_p12), %v5255_v30 }
 0x249   : > { %v3722_v26 = vpop.f32.mrb[12].mxu0 }
 0x24a   : > { %v3723_v53 = vpop.f32.mrb[13].mxu0  ;;  %v3757_v41 = vpop.f32.mrb[12].mxu1 }
 0x24b   : > { %v3724_v42 = vadd.f32 %v3723_v53, %v3722_v26  ;;  %v3758_v44 = vpop.f32.mrb[13].mxu1  ;;  %v3052_v26 = vld [vmem:[%s6524_s3 + $0x40] sm:$0xff] (!%p3261_p12)  ;;  %v3053_v53 = vld [vmem:[%s6524_s3 + $0x48] sm:$0xff] (!%p3261_p12) }
 0x24c   : > { %v3759_v45 = vadd.f32 %v3758_v44, %v3757_v41  ;;  %v4943_v41 = vpack.c.bf16 (!%p3261_p12), %v3053_v53, %v3052_v26  ;;  %v3055_v44 = vld [vmem:[%s6524_s3 + $0x58] sm:$0xff] (!%p3261_p12) }
 0x24d   : > { %v2255_v47 = vadd.f32 %v3724_v42, %v2185_v40  ;;  %v4940_v40 = vpack.c.bf16 (!%p3261_p12), %v3051_v43, %v3050_v38  ;;  %v3054_v42 = vld [vmem:[%s6524_s3 + $0x50] sm:$0xff] (!%p3261_p12) }
 0x24f   : > { %v2325_v37 = vadd.f32 %v3759_v45, %v2255_v47  ;;  %4941 = vmatpush3.bf16.msra.mxu0 (!%p3261_p12), %v4940_v40  ;;  %v4946_v45 = vpack.c.bf16 (!%p3261_p12), %v3055_v44, %v3054_v42  ;;  %v3056_v47 = vld [vmem:[%s6524_s3 + $0x60] sm:$0xff] (!%p3261_p12) }
 0x250   : > { %4942 = vmatprep.subr.bf16.mxu0 (!%p3261_p12), %v5255_v30 }
 0x253   : > { %4944 = vmatpush3.bf16.msra.mxu0 (!%p3261_p12), %v4943_v41 }
 0x254   : > { %4945 = vmatprep.subr.bf16.mxu0 (!%p3261_p12), %v5255_v30 }
 0x257   : > { %4947 = vmatpush3.bf16.msra.mxu0 (!%p3261_p12), %v4946_v45 }
 0x258   : > { %4948 = vmatprep.subr.bf16.mxu0 (!%p3261_p12), %v5255_v30 }
 0x269   : > { %v3792_v48 = vpop.f32.mrb[14].mxu0 }
 0x26a   : > { %v3793_v58 = vpop.f32.mrb[15].mxu0  ;;  %v3827_v49 = vpop.f32.mrb[14].mxu1 }
 0x26b   : > { %v3794_v11 = vadd.f32 %v3793_v58, %v3792_v48  ;;  %v3828_v50 = vpop.f32.mrb[15].mxu1 }
 0x26c   : > { %v3829_v63 = vadd.f32 %v3828_v50, %v3827_v49  ;;  %v3262_v49 = vld [vmem:[#allocation8] ss:$0 sm:$0xff] (!%p3261_p12)  ;;  %v3059_v50 = vld [vmem:[%s6524_s3 + $0x78] sm:$0xff] (!%p3261_p12) }
 0x26d   : > { %v2395_v54 = vadd.f32 %v3794_v11, %v2325_v37  ;;  %v3057_v37 = vld [vmem:[%s6524_s3 + $0x68] sm:$0xff] (!%p3261_p12)  ;;  %v3058_v11 = vld [vmem:[%s6524_s3 + $0x70] sm:$0xff] (!%p3261_p12) }
 0x26e   : > { %v4949_v48 = vpack.c.bf16 (!%p3261_p12), %v3057_v37, %v3056_v47 }
 0x26f   : > { %v2465_v39 = vadd.f32 %v3829_v63, %v2395_v54  ;;  %v4952_v54 = vpack.c.bf16 (!%p3261_p12), %v3059_v50, %v3058_v11 }
 0x270   : > { %4950 = vmatpush3.bf16.msra.mxu0 (!%p3261_p12), %v4949_v48 }
 0x271   : > { %4951 = vmatprep.subr.bf16.mxu0 (!%p3261_p12), %v5255_v30 }
 0x274   : > { %4953 = vmatpush3.bf16.msra.mxu0 (!%p3261_p12), %v4952_v54 }
 0x289   : > { %v3862_v34 = vpop.f32.mrb[16].mxu0 }
 0x28a   : > { %v3863_v56 = vpop.f32.mrb[17].mxu0  ;;  %v3897_v57 = vpop.f32.mrb[16].mxu1 }
 0x28b   : > { %v3864_v59 = vadd.f32 %v3863_v56, %v3862_v34  ;;  %v3898_v60 = vpop.f32.mrb[17].mxu1  ;;  %v3263_v34 = vld [vmem:[#allocation9] ss:$0 sm:$0xff] (!%p3261_p12) }
 0x28c   : > { %v3899_v61 = vadd.f32 %v3898_v60, %v3897_v57 }
 0x28d   : > { %v2535_v52 = vadd.f32 %v3864_v59, %v2465_v39 }
 0x28f   : > { %v2605_v46 = vadd.f32 %v3899_v61, %v2535_v52 }
 0x2a9   : > { %v3932_v62 = vpop.f32.mrb[18].mxu0 }
 0x2aa   : > { %v3933_v0 = vpop.f32.mrb[19].mxu0  ;;  %v3967_v55 = vpop.f32.mrb[18].mxu1 }
 0x2ab   : > { %v3934_v1 = vadd.f32 %v3933_v0, %v3932_v62  ;;  %v3968_v2 = vpop.f32.mrb[19].mxu1 }
 0x2ac   : > { %v3969_v3 = vadd.f32 %v3968_v2, %v3967_v55 }
 0x2ad   : > { %v2675_v4 = vadd.f32 %v3934_v1, %v2605_v46 }
 0x2af   : > { %v2745_v5 = vadd.f32 %v3969_v3, %v2675_v4 }
 0x2c9   : > { %v4002_v6 = vpop.f32.mrb[20].mxu0 }
 0x2ca   : > { %v4003_v7 = vpop.f32.mrb[21].mxu0  ;;  %v4037_v14 = vpop.f32.mrb[20].mxu1 }
 0x2cb   : > { %v4004_v9 = vadd.f32 %v4003_v7, %v4002_v6  ;;  %v4038_v10 = vpop.f32.mrb[21].mxu1 }
 0x2cc   : > { %v4039_v13 = vadd.f32 %v4038_v10, %v4037_v14 }
 0x2cd   : > { %v2815_v15 = vadd.f32 %v4004_v9, %v2745_v5 }
 0x2cf   : > { %v2885_v17 = vadd.f32 %v4039_v13, %v2815_v15 }
 0x2e9   : > { %v4072_v12 = vpop.f32.mrb[22].mxu0 }
 0x2ea   : > { %v4073_v18 = vpop.f32.mrb[23].mxu0  ;;  %v4107_v19 = vpop.f32.mrb[22].mxu1 }
 0x2eb   : > { %v4074_v8 = vadd.f32 %v4073_v18, %v4072_v12  ;;  %v4108_v16 = vpop.f32.mrb[23].mxu1 }
 0x2ec   : > { %v4109_v20 = vadd.f32 %v4108_v16, %v4107_v19 }
 0x2ed   : > { %v2955_v21 = vadd.f32 %v4074_v8, %v2885_v17  ;;  %3033 = sbr.rel (%p3261_p12) target bundleno = 1298 (0x512), region = 64 }
 0x2ef   : > { %v3025_v25 = vadd.f32 %v4109_v20, %v2955_v21 }
 0x2f1   : > { %v3028_v22 = vadd.f32 %v3025_v25, %v303_v24 }
 0x2f3   : > { %3029 = vst [vmem:[#allocation2] sm:$0x3] %v3028_v22 }
 0x2fa   : > { %v3034_v58 = vld [vmem:[#allocation2] sm:$0x3] }
 0x2fb   : > { %v3042_v63 = vadd.f32 %v3262_v49, %v3034_v58 }
 0x2fd   : > { %v3043_v39 = vmax.f32 %v3042_v63, 0.0 }
 0x2ff   : > { %4160 = vmatmul.mubr.f32.vlgmr.msra.gmra.mrb[0].mxu0 %v3043_v39 }
 0x3d2   : > { %v3133_v56 = vpop.f32.mrb[0].mxu0 }
 0x3d3   : > { %v3134_v57 = vadd.f32 %v3263_v34, %v3133_v56  ;;  %v4161_v59 = vpop.f32.mrb[1].mxu0 }
 0x3d5   : > { %v3138_v60 = vsel %vm3137_vm2, %v3134_v57, -inf }
 0x3d6   : > { %3139 = vmax.xlane.f32.xlu0 %v3138_v60 }
 0x463   : > { %v3140_v61 = vpop.xlane.xlu0 %3139 }
 0x464   : > { %v3141_v52 = vsub.f32 %v3134_v57, %v3140_v61 }
 0x466   : > { %v3142_v46 = vmul.f32 1.442695, %v3141_v52 }
 0x468   : > { %5049 = vpow2.f32 %v3142_v46 }
 0x472   : > { %v5050_v62 = vpop.eup %5049 }
 0x473   : > { %v3144_v0 = vsel %vm3137_vm2, %v5050_v62, 0.0 }
 0x474   : > { %3145 = vadd.xlane.f32.xlu0 %v3144_v0 }
 0x501   : > { %v3146_v55 = vpop.xlane.xlu0 %3145 }
 0x502   : > { %5051 = vlog2.f32 %v3146_v55 }
 0x50c   : > { %v5052_v1 = vpop.eup %5051 }
 0x50d   : > { %v3148_v2 = vmul.f32 0.6931472, %v5052_v1 }
 0x50f   : > { %v3149_v3 = vsub.f32 %v3141_v52, %v3148_v2 }
 0x511   : > { %3150 = vst.msk [vmem:[#allocation11] sm:$0x3] %vm3137_vm2, %v3149_v3 }
 0x512 PF: > { %p4993_p0 = scmp.eq.s32.totalorder %s5308_s22, 1  ;;  %s5258_s12 = smov [#allocation11]  }
 0x513   : > { %s3158_s13 = sshll.u32 %s5258_s12, 4  ;;  %s3159_s13 = int_to_ptr.vmem [resolvable:$true] %s3158_s13 }
 0x514   : > { %s5169_s17 = scalar_lea.vmem %s3159_s13, 32  ;;  %p5176_p10 = scmp.lt.s32.totalorder %s3159_s13, %s3159_s13 }
 0x515   : > { %p5170_p2 = scmp.ne.s32.totalorder %s3159_s13, %s5169_s17  ;;  %p5177_p9 = scmp.lt.s32.totalorder %s5169_s17, %s5169_s17 }
 0x517   : > { %p5171_p13 = pnand %p5170_p2, %p4993_p0  ;;  %p5178_p11 = por %p5177_p9, %p5176_p10 }
 0x519   : > { %p5172_p3 = pneg %p5171_p13 }
 0x51b   : > { %p5179_p7 = pnand %p5178_p11, %p5172_p3 }
 0x51d   : > { %5182 = shalt.err (!%p5179_p7)
}
 0x51e   : > { %s5183_s6 = scalar_lea.hbm %s6526_s5, 32 }
 0x51f   : > { %p5184_p8 = scmp.ne.s32.totalorder %s6526_s5, %s5183_s6  ;;  %p5189_p5 = scmp.lt.u32.totalorder %s5183_s6, %s6526_s5 }
 0x521   : > { %p5185_p1 = pnand %p5184_p8, %p4993_p0 }
 0x523   : > { %p5186_p4 = pneg %p5185_p1 }
 0x525   : > { %p5191_p6 = pnand %p5189_p5, %p5186_p4 }
 0x527   : > { %5194 = shalt.err (!%p5191_p6)
}
 0x528   : > { %4971 = dma.vmem_to_hbm [thread:$0]  (%p4993_p0), %s3159_s13, 32, %s6526_s5, [#allocation5]  }
 0x529   : > { %5228 = dma.done.wait (%p4993_p0), [#allocation5], 32  }
 0x52a   : > { %5230 = vsyncadd (%p4993_p0), [#allocation5], 4294967264 }
 0x52b PF: > { %p20_p12 = scmp.ge.s32.totalorder %s5336_s30, 4   ;;  %s6541_s18 = smov %s5237_s19 }
 0x52c   : > { %s6542_s19 = smov %s5241_s20  ;;  %s6543_s20 = smov %s5396_s29 }
 0x52d   : > { %s6544_s21 = smov %s5336_s30  ;;  %22 = sbr.rel (!%p20_p12) target bundleno = 7 (0x7), region = 106 }
 0x534   :  { %3171 = vsyncpa [#allocation4], 1 }
 0x535   :  { %3173 = vsyncpa [#allocation4 + $0x1], 1 }
 0x536   :  { %3174 = vsyncpa [#allocation7], 1 }
 0x537   :  { %3176 = vsyncpa [#allocation7 + $0x1], 1 }
 0x538   :  { %3177 = vsyncpa [#allocation10], 1 }
 0x539   :  { %3178 = vsyncpa [#allocation5], 1 }
 0x53a   :  { %3180 = vsyncpa [#allocation5 + $0x1], 1 }

</bundles_post_ra>
